<compile_context>
chip_gen: v7x
topology: tpu7x:2x2x1
jax: 0.10.0
libtpu: 0.0.40
codegen_flags: <defaults>
</compile_context>

<pallas_src>
import numpy as np
import jax
import jax.numpy as jnp
from jax.experimental import pallas as pl
from jax.experimental.pallas import tpu as pltpu

TOP_K = 10               # k in recommend()
TOPK_PAD = 128           # lane-dense padded top-k output width
MASK_VALUE = -10000.0    # score assigned to train candidates
NEG_INIT = -1.0e30       # below any real / masked score
MASK_BITS = 8            # mask packing factor: 1 bit/item in int8 words
ROWS = 8                 # sublane row-block height for the vreg-resident top-k


def _pick_vmem_limit():
    """Per-generation VMEM limit: ~85% of physical, with a safe fallback."""
    cap = None
    try:
        info = pltpu.get_tpu_info()
        cap = getattr(info, "vmem_capacity_bytes", None)
    except Exception:
        cap = None
    if not cap:
        return 56 * 1024 * 1024                  # safe everywhere (v7x: 64 MiB/TC)
    return int(min(max(int(cap * 0.85), 32 * 1024 * 1024), 110 * 1024 * 1024))


def _pack_mask(train_mask, tile_i):
    """Bit-pack the dense [U, I] train mask into int8 [U, I//8].

    Within each item tile of width tile_i, local item l = b*(tile_i//8) + r is
    stored as bit b of packed word r, so the kernel unpacks with 8 shift/AND
    passes and one lane concat (no lane gather needed).
    """
    U, I = train_mask.shape
    n_i = I // tile_i
    w = tile_i // MASK_BITS
    m = (train_mask != 0).astype(jnp.int32).reshape(U, n_i, MASK_BITS, w)
    shifts = jnp.arange(MASK_BITS, dtype=jnp.int32).reshape(1, 1, MASK_BITS, 1)
    p32 = jnp.sum(m << shifts, axis=2)               # 0..255
    p32 = jnp.where(p32 > 127, p32 - 256, p32)        # two's complement in int32
    return p32.astype(jnp.int8).reshape(U, I // MASK_BITS)


def _make_kernel(*, write_scores, top_k, topk_pad, rows):
    def kernel(u_ref, vT_ref, mask_ref, *refs):
        if write_scores:
            scores_out_ref = refs[0]
            refs = refs[1:]
        topk_ref, scores_sc, vals_sc, idx_sc = refs

        tu = u_ref.shape[0]
        ti = vT_ref.shape[1]
        j = pl.program_id(1)

        # ---- scoring (MXU): bf16 x bf16 -> f32; item table pre-transposed ----
        scores = jnp.dot(u_ref[...], vT_ref[...],
                         preferred_element_type=jnp.float32)

        # ---- unpack bit-packed train mask (8 items / int8 word) and mask ----
        words = mask_ref[...].astype(jnp.int32)                    # [tu, ti//8]
        mbits = jnp.concatenate(
            [(words >> b) & 1 for b in range(MASK_BITS)], axis=-1)  # [tu, ti]
        scores = jnp.where(mbits != 0, jnp.float32(MASK_VALUE), scores)

        if write_scores:
            scores_out_ref[...] = scores.astype(scores_out_ref.dtype)
        scores_sc[...] = scores          # f32 slab consumed by the top-k stage

        # ---- running top-k scratch: init on the first item tile ----
        @pl.when(j == 0)
        def _():
            vals_sc[...] = jnp.full(vals_sc.shape, NEG_INIT, jnp.float32)
            idx_sc[...] = jnp.zeros(idx_sc.shape, jnp.int32)

        lane = jax.lax.broadcasted_iota(jnp.int32, (rows, ti), 1)
        pool_lane = jax.lax.broadcasted_iota(jnp.int32, (rows, 2 * topk_pad), 1)
        base = j * ti

        def row_block(rb, carry):
            r0 = pl.multiple_of(rb * rows, rows)

            # Tile-local top-k on a vreg-resident [rows, ti] slab:
            # one wide max + one wide min-index + one wide invalidate per k.
            work = scores_sc[pl.ds(r0, rows), :]
            loc_v, loc_i = [], []
            for _ in range(top_k):
                vmax = jnp.max(work, axis=-1, keepdims=True)          # value
                p = jnp.min(jnp.where(work == vmax, lane, jnp.int32(ti)),
                            axis=-1, keepdims=True)                   # index
                loc_v.append(vmax)
                loc_i.append(p + base)                                # global idx
                work = jnp.where(lane == p, jnp.float32(NEG_INIT), work)

            tvals = jnp.concatenate(
                loc_v + [jnp.full((rows, topk_pad - top_k), NEG_INIT,
                                  jnp.float32)], axis=-1)             # [rows,128]
            tidx = jnp.concatenate(
                loc_i + [jnp.zeros((rows, topk_pad - top_k), jnp.int32)],
                axis=-1)                                              # [rows,128]

            # Narrow merge: running top-k (128 lanes) + tile-local (128 lanes).
            pool_v = jnp.concatenate([vals_sc[pl.ds(r0, rows), :], tvals],
                                     axis=-1)                         # [rows,256]
            pool_i = jnp.concatenate([idx_sc[pl.ds(r0, rows), :], tidx],
                                     axis=-1)
            new_v, new_i = [], []
            for _ in range(top_k):
                vmax = jnp.max(pool_v, axis=-1, keepdims=True)
                p = jnp.min(jnp.where(pool_v == vmax, pool_lane,
                                      jnp.int32(2 * topk_pad)),
                            axis=-1, keepdims=True)
                sel = pool_lane == p
                new_v.append(vmax)
                new_i.append(jnp.sum(jnp.where(sel, pool_i, 0),
                                     axis=-1, keepdims=True))
                pool_v = jnp.where(sel, jnp.float32(NEG_INIT), pool_v)

            vals_sc[pl.ds(r0, rows), :] = jnp.concatenate(
                new_v + [jnp.full((rows, topk_pad - top_k), NEG_INIT,
                                  jnp.float32)], axis=-1)
            idx_sc[pl.ds(r0, rows), :] = jnp.concatenate(
                new_i + [jnp.zeros((rows, topk_pad - top_k), jnp.int32)],
                axis=-1)
            return carry

        jax.lax.fori_loop(0, tu // rows, row_block, 0)

        # Lane-dense (tu, 128) store of the final indices on the last item tile.
        @pl.when(j == pl.num_programs(1) - 1)
        def _():
            topk_ref[...] = idx_sc[...]

    return kernel


def recommend(user_emb, item_emb, train_mask, *, tile_u=None, tile_i=None,
              top_k=TOP_K, return_scores=False):
    """Fused dot-product scoring + train-item masking + top-k.

    Returns top-k item indices [U, top_k] (plus the masked bf16 score matrix
    [U, I] when return_scores=True).
    """
    U, D = user_emb.shape
    I, D2 = item_emb.shape
    assert D == D2
    vmem_limit = _pick_vmem_limit()

    # --- user tiling: large tiles amortize the vT stream; keep >= 2 grid steps
    #     along the "parallel" user axis so both v7x TensorCores get work. ---
    if tile_u is None:
        tile_u = 256
    tile_u = max(min(tile_u, U), ROWS)
    while U // tile_u < 2 and tile_u > ROWS:
        tile_u //= 2
    # TODO(synk): pad ragged U / I instead of asserting divisibility.
    assert U % tile_u == 0 and tile_u % ROWS == 0

    # --- item tiling: resident if it fits the VMEM budget, else tiled merge ---
    if tile_i is None:
        per_item = (2 * 2 * D                        # vT bf16, double-buffered
                    + 2 * tile_u // MASK_BITS        # packed mask, double-buffered
                    + 4 * tile_u                     # f32 score scratch slab
                    + (2 * 2 * tile_u if return_scores else 0))  # bf16 scores out
        budget = int(vmem_limit * 0.6)
        if I * per_item <= budget:
            tile_i = I
        else:
            tile_i = max(1024, min(I, budget // per_item) // 1024 * 1024)
            while I % tile_i != 0 and tile_i > 1024:
                tile_i -= 1024
    assert I % tile_i == 0
    assert tile_i % MASK_BITS == 0
    assert tile_i == I or tile_i % (128 * MASK_BITS) == 0, (
        "tiled item axis needs tile_i to be a multiple of 1024 "
        "(128-lane blocks of the bit-packed mask)")
    assert top_k <= min(tile_i, TOPK_PAD)
    n_u, n_i = U // tile_u, I // tile_i

    # One-time layout / dtype changes (XLA side, outside the grid loop).
    u_bf = user_emb.astype(jnp.bfloat16)
    vT_bf = item_emb.astype(jnp.bfloat16).T          # [D, I], items lane-dense
    mask_packed = _pack_mask(train_mask, tile_i)     # int8 [U, I//8]

    kernel = _make_kernel(write_scores=return_scores, top_k=top_k,
                          topk_pad=TOPK_PAD, rows=ROWS)

    w = tile_i // MASK_BITS
    in_specs = [
        pl.BlockSpec((tile_u, D), lambda i, j: (i, 0)),      # user tile
        pl.BlockSpec((D, tile_i), lambda i, j: (0, j)),      # item tile [D, ti]
        pl.BlockSpec((tile_u, w), lambda i, j: (i, j)),      # packed mask tile
    ]
    out_shapes, out_specs = [], []
    if return_scores:
        out_shapes.append(jax.ShapeDtypeStruct((U, I), jnp.bfloat16))
        out_specs.append(pl.BlockSpec((tile_u, tile_i), lambda i, j: (i, j)))
    out_shapes.append(jax.ShapeDtypeStruct((U, TOPK_PAD), jnp.int32))
    out_specs.append(pl.BlockSpec((tile_u, TOPK_PAD), lambda i, j: (i, 0)))

    outs = pl.pallas_call(
        kernel,
        out_shape=tuple(out_shapes),
        grid_spec=pltpu.PrefetchScalarGridSpec(
            num_scalar_prefetch=0,
            grid=(n_u, n_i),
            in_specs=in_specs,
            out_specs=out_specs,
            scratch_shapes=[
                pltpu.VMEM((tile_u, tile_i), jnp.float32),    # masked f32 scores
                pltpu.VMEM((tile_u, TOPK_PAD), jnp.float32),  # running top-k vals
                pltpu.VMEM((tile_u, TOPK_PAD), jnp.int32),    # running top-k idx
            ],
        ),
        compiler_params=pltpu.CompilerParams(
            dimension_semantics=("parallel", "arbitrary"),
            vmem_limit_bytes=vmem_limit,
        ),
    )(u_bf, vT_bf, mask_packed)

    if return_scores:
        scores, topk_padded = outs
        return scores, topk_padded[:, :top_k]
    return outs[0][:, :top_k]


if __name__ == "__main__":
    num_users, num_items, dim = 128, 2048, 32

    key = jax.random.PRNGKey(0)
    k_u, k_v = jax.random.split(key)
    user_emb = jax.random.normal(k_u, (num_users, dim), dtype=jnp.float32)
    item_emb = jax.random.normal(k_v, (num_items, dim), dtype=jnp.float32)

    # Deterministic synthetic train_candidates -> dense mask (host-side glue,
    # mirrors the dict-based mask construction in recommend()).
    mask_np = np.zeros((num_users, num_items), dtype=np.int8)
    for u in range(num_users):
        for it in (u % num_items, (u * 3 + 1) % num_items, (u * 7 + 2) % num_items):
            mask_np[u, it] = 1
    train_mask = jnp.asarray(mask_np)

    # Variant 1: scores + top-k, item axis tiled (running top-k merge path).
    scores, topk_tiled = recommend(user_emb, item_emb, train_mask,
                                   tile_i=1024, return_scores=True)
    # Variant 2: top-k only, auto tiling (whole item table resident here).
    topk_auto = recommend(user_emb, item_emb, train_mask)

    scores = jax.block_until_ready(scores)
    topk_tiled = jax.block_until_ready(topk_tiled)
    topk_auto = jax.block_until_ready(topk_auto)

    # Sanity check vs plain-f32 JAX reference (loose: kernel matmul and the
    # emitted score matrix are bf16).
    scores_f32 = np.asarray(scores.astype(jnp.float32))
    ref_scores = np.asarray(
        jnp.where(train_mask != 0, MASK_VALUE, user_emb @ item_emb.T))
    np.testing.assert_allclose(scores_f32, ref_scores, rtol=5e-2, atol=2e-1)

    # Top-k correctness: compare selected score values (tie indices may differ)
    # against jax.lax.top_k over the kernel's own score matrix.
    ref_vals = np.asarray(jax.lax.top_k(scores.astype(jnp.float32), TOP_K)[0])
    for name, topk in (("tiled", topk_tiled), ("auto", topk_auto)):
        idx = np.asarray(topk)
        assert idx.shape == (num_users, TOP_K), name
        got_vals = np.take_along_axis(scores_f32, idx, axis=1)
        np.testing.assert_allclose(got_vals, ref_vals, rtol=1e-6, atol=1e-6,
                                   err_msg=name)

    print("KERNEL_OK")
</pallas_src>

<mosaic_0001>
module attributes {stable_mosaic.version = 11 : i64} {
  func.func @kernel(%arg0: i32, %arg1: i32, %arg2: memref<64x32xbf16, #tpu.memory_space<vmem>>, %arg3: memref<32x1024xbf16, #tpu.memory_space<vmem>>, %arg4: memref<64x128xi8, #tpu.memory_space<vmem>>, %arg5: memref<64x1024xbf16, #tpu.memory_space<vmem>>, %arg6: memref<64x128xi32, #tpu.memory_space<vmem>>, %arg7: memref<64x1024xf32, #tpu.memory_space<vmem>>, %arg8: memref<64x128xf32, #tpu.memory_space<vmem>>, %arg9: memref<64x128xi32, #tpu.memory_space<vmem>>) attributes {dimension_semantics = [#tpu.dimension_semantics<parallel>, #tpu.dimension_semantics<arbitrary>], iteration_bounds = array<i64: 2, 2>, scalar_prefetch = 0 : i64, scratch_operands = 3 : i64, tpu.core_type = #tpu.core_type<tc>, window_params = [{transform_indices = @transform_0, window_bounds = array<i64: 64, 32>}, {transform_indices = @transform_1, window_bounds = array<i64: 32, 1024>}, {transform_indices = @transform_2, window_bounds = array<i64: 64, 128>}, {transform_indices = @transform_3, window_bounds = array<i64: 64, 1024>}, {transform_indices = @transform_4, window_bounds = array<i64: 64, 128>}]} {
    %c0 = arith.constant 0 : index
    %c0_0 = arith.constant 0 : index
    %0 = vector.load %arg2[%c0, %c0_0] : memref<64x32xbf16, #tpu.memory_space<vmem>>, vector<64x32xbf16>
    %c0_1 = arith.constant 0 : index
    %c0_2 = arith.constant 0 : index
    %1 = vector.load %arg3[%c0_1, %c0_2] : memref<32x1024xbf16, #tpu.memory_space<vmem>>, vector<32x1024xbf16>
    %cst = arith.constant dense<0.000000e+00> : vector<64x1024xf32>
    %2 = tpu.matmul %0, %1, %cst {dimension_numbers = #tpu.dot_dimension_numbers<[1], [0], [0], [1], [0, 0, 1, 1], [], []>} : vector<64x32xbf16>, vector<32x1024xbf16>, vector<64x1024xf32> -> vector<64x1024xf32>
    %c0_3 = arith.constant 0 : index
    %c0_4 = arith.constant 0 : index
    %3 = vector.load %arg4[%c0_3, %c0_4] : memref<64x128xi8, #tpu.memory_space<vmem>>, vector<64x128xi8>
    %4 = arith.extsi %3 : vector<64x128xi8> to vector<64x128xi32>
    %c0_i32 = arith.constant 0 : i32
    %5 = vector.broadcast %c0_i32 : i32 to vector<64x128xi32>
    %6 = arith.shrsi %4, %5 : vector<64x128xi32>
    %c1_i32 = arith.constant 1 : i32
    %7 = vector.broadcast %c1_i32 : i32 to vector<64x128xi32>
    %8 = arith.andi %6, %7 : vector<64x128xi32>
    %c1_i32_5 = arith.constant 1 : i32
    %9 = vector.broadcast %c1_i32_5 : i32 to vector<64x128xi32>
    %10 = arith.shrsi %4, %9 : vector<64x128xi32>
    %c1_i32_6 = arith.constant 1 : i32
    %11 = vector.broadcast %c1_i32_6 : i32 to vector<64x128xi32>
    %12 = arith.andi %10, %11 : vector<64x128xi32>
    %c2_i32 = arith.constant 2 : i32
    %13 = vector.broadcast %c2_i32 : i32 to vector<64x128xi32>
    %14 = arith.shrsi %4, %13 : vector<64x128xi32>
    %c1_i32_7 = arith.constant 1 : i32
    %15 = vector.broadcast %c1_i32_7 : i32 to vector<64x128xi32>
    %16 = arith.andi %14, %15 : vector<64x128xi32>
    %c3_i32 = arith.constant 3 : i32
    %17 = vector.broadcast %c3_i32 : i32 to vector<64x128xi32>
    %18 = arith.shrsi %4, %17 : vector<64x128xi32>
    %c1_i32_8 = arith.constant 1 : i32
    %19 = vector.broadcast %c1_i32_8 : i32 to vector<64x128xi32>
    %20 = arith.andi %18, %19 : vector<64x128xi32>
    %c4_i32 = arith.constant 4 : i32
    %21 = vector.broadcast %c4_i32 : i32 to vector<64x128xi32>
    %22 = arith.shrsi %4, %21 : vector<64x128xi32>
    %c1_i32_9 = arith.constant 1 : i32
    %23 = vector.broadcast %c1_i32_9 : i32 to vector<64x128xi32>
    %24 = arith.andi %22, %23 : vector<64x128xi32>
    %c5_i32 = arith.constant 5 : i32
    %25 = vector.broadcast %c5_i32 : i32 to vector<64x128xi32>
    %26 = arith.shrsi %4, %25 : vector<64x128xi32>
    %c1_i32_10 = arith.constant 1 : i32
    %27 = vector.broadcast %c1_i32_10 : i32 to vector<64x128xi32>
    %28 = arith.andi %26, %27 : vector<64x128xi32>
    %c6_i32 = arith.constant 6 : i32
    %29 = vector.broadcast %c6_i32 : i32 to vector<64x128xi32>
    %30 = arith.shrsi %4, %29 : vector<64x128xi32>
    %c1_i32_11 = arith.constant 1 : i32
    %31 = vector.broadcast %c1_i32_11 : i32 to vector<64x128xi32>
    %32 = arith.andi %30, %31 : vector<64x128xi32>
    %c7_i32 = arith.constant 7 : i32
    %33 = vector.broadcast %c7_i32 : i32 to vector<64x128xi32>
    %34 = arith.shrsi %4, %33 : vector<64x128xi32>
    %c1_i32_12 = arith.constant 1 : i32
    %35 = vector.broadcast %c1_i32_12 : i32 to vector<64x128xi32>
    %36 = arith.andi %34, %35 : vector<64x128xi32>
    %37 = tpu.concatenate %8, %12, %16, %20, %24, %28, %32, %36 in 1 : vector<64x128xi32>, vector<64x128xi32>, vector<64x128xi32>, vector<64x128xi32>, vector<64x128xi32>, vector<64x128xi32>, vector<64x128xi32>, vector<64x128xi32> -> vector<64x1024xi32>
    %c0_i32_13 = arith.constant 0 : i32
    %38 = vector.broadcast %c0_i32_13 : i32 to vector<64x1024xi32>
    %39 = arith.cmpi ne, %37, %38 : vector<64x1024xi32>
    %cst_14 = arith.constant -1.000000e+04 : f32
    %40 = vector.broadcast %cst_14 : f32 to vector<64x1024xf32>
    %41 = arith.select %39, %40, %2 : vector<64x1024xi1>, vector<64x1024xf32>
    %42 = arith.truncf %41 : vector<64x1024xf32> to vector<64x1024xbf16>
    %c0_15 = arith.constant 0 : index
    %c0_16 = arith.constant 0 : index
    %43 = vector.load %arg5[%c0_15, %c0_16] : memref<64x1024xbf16, #tpu.memory_space<vmem>>, vector<64x1024xbf16>
    tpu.vector_store %arg5[%c0_15, %c0_16], %42 {strides = array<i32>} : memref<64x1024xbf16, #tpu.memory_space<vmem>>, vector<64x1024xbf16>,
    %c0_17 = arith.constant 0 : index
    %c0_18 = arith.constant 0 : index
    %44 = vector.load %arg7[%c0_17, %c0_18] : memref<64x1024xf32, #tpu.memory_space<vmem>>, vector<64x1024xf32>
    tpu.vector_store %arg7[%c0_17, %c0_18], %41 {strides = array<i32>} : memref<64x1024xf32, #tpu.memory_space<vmem>>, vector<64x1024xf32>,
    %c0_i32_19 = arith.constant 0 : i32
    %45 = arith.cmpi eq, %arg1, %c0_i32_19 : i32
    %46 = arith.extui %45 : i1 to i32
    %c0_i32_20 = arith.constant 0 : i32
    %47 = arith.cmpi ne, %46, %c0_i32_20 : i32
    scf.if %47 {
      %cst_26 = arith.constant -1.000000e+30 : f32
      %55 = vector.broadcast %cst_26 : f32 to vector<64x128xf32>
      %c0_27 = arith.constant 0 : index
      %c0_28 = arith.constant 0 : index
      %56 = vector.load %arg8[%c0_27, %c0_28] : memref<64x128xf32, #tpu.memory_space<vmem>>, vector<64x128xf32>
      tpu.vector_store %arg8[%c0_27, %c0_28], %55 {strides = array<i32>} : memref<64x128xf32, #tpu.memory_space<vmem>>, vector<64x128xf32>,
      %c0_i32_29 = arith.constant 0 : i32
      %57 = vector.broadcast %c0_i32_29 : i32 to vector<64x128xi32>
      %c0_30 = arith.constant 0 : index
      %c0_31 = arith.constant 0 : index
      %58 = vector.load %arg9[%c0_30, %c0_31] : memref<64x128xi32, #tpu.memory_space<vmem>>, vector<64x128xi32>
      tpu.vector_store %arg9[%c0_30, %c0_31], %57 {strides = array<i32>} : memref<64x128xi32, #tpu.memory_space<vmem>>, vector<64x128xi32>,
    } else {
    }
    %48 = tpu.iota {dimensions = array<i32: 1>} : vector<8x1024xi32>
    %49 = tpu.iota {dimensions = array<i32: 1>} : vector<8x256xi32>
    %c1024_i32 = arith.constant 1024 : i32
    %50 = arith.muli %arg1, %c1024_i32 : i32
    %c0_i32_21 = arith.constant 0 : i32
    %c8_i32 = arith.constant 8 : i32
    %51 = arith.addi %c0_i32_21, %c8_i32 : i32
    %c1_i32_22 = arith.constant 1 : i32
    scf.for %arg10 = %c0_i32_21 to %51 step %c1_i32_22  : i32 {
      %c8_i32_26 = arith.constant 8 : i32
      %55 = arith.muli %arg10, %c8_i32_26 : i32
      %56 = tpu.assume_multiple %55, 8 : i32
      %57 = arith.index_cast %56 : i32 to index
      %c0_27 = arith.constant 0 : index
      %58 = vector.load %arg7[%57, %c0_27] : memref<64x1024xf32, #tpu.memory_space<vmem>>, vector<8x1024xf32>
      %cst_28 = arith.constant dense<0xFF800000> : vector<8xf32>
      %59 = vector.multi_reduction <maximumf>, %58, %cst_28 [1] : vector<8x1024xf32> to vector<8xf32>
      %60 = vector.shape_cast %59 : vector<8xf32> to vector<8x1xf32>
      %61 = vector.broadcast %60 : vector<8x1xf32> to vector<8x1024xf32>
      %62 = arith.cmpf oeq, %58, %61 : vector<8x1024xf32>
      %c1024_i32_29 = arith.constant 1024 : i32
      %63 = vector.broadcast %c1024_i32_29 : i32 to vector<8x1024xi32>
      %64 = arith.select %62, %48, %63 : vector<8x1024xi1>, vector<8x1024xi32>
      %cst_30 = arith.constant dense<2147483647> : vector<8xi32>
      %65 = vector.multi_reduction <minsi>, %64, %cst_30 [1] : vector<8x1024xi32> to vector<8xi32>
      %66 = vector.shape_cast %65 : vector<8xi32> to vector<8x1xi32>
      %67 = vector.broadcast %50 : i32 to vector<8x1xi32>
      %68 = arith.addi %66, %67 : vector<8x1xi32>
      %69 = vector.broadcast %66 : vector<8x1xi32> to vector<8x1024xi32>
      %70 = arith.cmpi eq, %48, %69 : vector<8x1024xi32>
      %cst_31 = arith.constant -1.000000e+30 : f32
      %71 = vector.broadcast %cst_31 : f32 to vector<8x1024xf32>
      %72 = arith.select %70, %71, %58 : vector<8x1024xi1>, vector<8x1024xf32>
      %cst_32 = arith.constant dense<0xFF800000> : vector<8xf32>
      %73 = vector.multi_reduction <maximumf>, %72, %cst_32 [1] : vector<8x1024xf32> to vector<8xf32>
      %74 = vector.shape_cast %73 : vector<8xf32> to vector<8x1xf32>
      %75 = vector.broadcast %74 : vector<8x1xf32> to vector<8x1024xf32>
      %76 = arith.cmpf oeq, %72, %75 : vector<8x1024xf32>
      %c1024_i32_33 = arith.constant 1024 : i32
      %77 = vector.broadcast %c1024_i32_33 : i32 to vector<8x1024xi32>
      %78 = arith.select %76, %48, %77 : vector<8x1024xi1>, vector<8x1024xi32>
      %cst_34 = arith.constant dense<2147483647> : vector<8xi32>
      %79 = vector.multi_reduction <minsi>, %78, %cst_34 [1] : vector<8x1024xi32> to vector<8xi32>
      %80 = vector.shape_cast %79 : vector<8xi32> to vector<8x1xi32>
      %81 = vector.broadcast %50 : i32 to vector<8x1xi32>
      %82 = arith.addi %80, %81 : vector<8x1xi32>
      %83 = vector.broadcast %80 : vector<8x1xi32> to vector<8x1024xi32>
      %84 = arith.cmpi eq, %48, %83 : vector<8x1024xi32>
      %cst_35 = arith.constant -1.000000e+30 : f32
      %85 = vector.broadcast %cst_35 : f32 to vector<8x1024xf32>
      %86 = arith.select %84, %85, %72 : vector<8x1024xi1>, vector<8x1024xf32>
      %cst_36 = arith.constant dense<0xFF800000> : vector<8xf32>
      %87 = vector.multi_reduction <maximumf>, %86, %cst_36 [1] : vector<8x1024xf32> to vector<8xf32>
      %88 = vector.shape_cast %87 : vector<8xf32> to vector<8x1xf32>
      %89 = vector.broadcast %88 : vector<8x1xf32> to vector<8x1024xf32>
      %90 = arith.cmpf oeq, %86, %89 : vector<8x1024xf32>
      %c1024_i32_37 = arith.constant 1024 : i32
      %91 = vector.broadcast %c1024_i32_37 : i32 to vector<8x1024xi32>
      %92 = arith.select %90, %48, %91 : vector<8x1024xi1>, vector<8x1024xi32>
      %cst_38 = arith.constant dense<2147483647> : vector<8xi32>
      %93 = vector.multi_reduction <minsi>, %92, %cst_38 [1] : vector<8x1024xi32> to vector<8xi32>
      %94 = vector.shape_cast %93 : vector<8xi32> to vector<8x1xi32>
      %95 = vector.broadcast %50 : i32 to vector<8x1xi32>
      %96 = arith.addi %94, %95 : vector<8x1xi32>
      %97 = vector.broadcast %94 : vector<8x1xi32> to vector<8x1024xi32>
      %98 = arith.cmpi eq, %48, %97 : vector<8x1024xi32>
      %cst_39 = arith.constant -1.000000e+30 : f32
      %99 = vector.broadcast %cst_39 : f32 to vector<8x1024xf32>
      %100 = arith.select %98, %99, %86 : vector<8x1024xi1>, vector<8x1024xf32>
      %cst_40 = arith.constant dense<0xFF800000> : vector<8xf32>
      %101 = vector.multi_reduction <maximumf>, %100, %cst_40 [1] : vector<8x1024xf32> to vector<8xf32>
      %102 = vector.shape_cast %101 : vector<8xf32> to vector<8x1xf32>
      %103 = vector.broadcast %102 : vector<8x1xf32> to vector<8x1024xf32>
      %104 = arith.cmpf oeq, %100, %103 : vector<8x1024xf32>
      %c1024_i32_41 = arith.constant 1024 : i32
      %105 = vector.broadcast %c1024_i32_41 : i32 to vector<8x1024xi32>
      %106 = arith.select %104, %48, %105 : vector<8x1024xi1>, vector<8x1024xi32>
      %cst_42 = arith.constant dense<2147483647> : vector<8xi32>
      %107 = vector.multi_reduction <minsi>, %106, %cst_42 [1] : vector<8x1024xi32> to vector<8xi32>
      %108 = vector.shape_cast %107 : vector<8xi32> to vector<8x1xi32>
      %109 = vector.broadcast %50 : i32 to vector<8x1xi32>
      %110 = arith.addi %108, %109 : vector<8x1xi32>
      %111 = vector.broadcast %108 : vector<8x1xi32> to vector<8x1024xi32>
      %112 = arith.cmpi eq, %48, %111 : vector<8x1024xi32>
      %cst_43 = arith.constant -1.000000e+30 : f32
      %113 = vector.broadcast %cst_43 : f32 to vector<8x1024xf32>
      %114 = arith.select %112, %113, %100 : vector<8x1024xi1>, vector<8x1024xf32>
      %cst_44 = arith.constant dense<0xFF800000> : vector<8xf32>
      %115 = vector.multi_reduction <maximumf>, %114, %cst_44 [1] : vector<8x1024xf32> to vector<8xf32>
      %116 = vector.shape_cast %115 : vector<8xf32> to vector<8x1xf32>
      %117 = vector.broadcast %116 : vector<8x1xf32> to vector<8x1024xf32>
      %118 = arith.cmpf oeq, %114, %117 : vector<8x1024xf32>
      %c1024_i32_45 = arith.constant 1024 : i32
      %119 = vector.broadcast %c1024_i32_45 : i32 to vector<8x1024xi32>
      %120 = arith.select %118, %48, %119 : vector<8x1024xi1>, vector<8x1024xi32>
      %cst_46 = arith.constant dense<2147483647> : vector<8xi32>
      %121 = vector.multi_reduction <minsi>, %120, %cst_46 [1] : vector<8x1024xi32> to vector<8xi32>
      %122 = vector.shape_cast %121 : vector<8xi32> to vector<8x1xi32>
      %123 = vector.broadcast %50 : i32 to vector<8x1xi32>
      %124 = arith.addi %122, %123 : vector<8x1xi32>
      %125 = vector.broadcast %122 : vector<8x1xi32> to vector<8x1024xi32>
      %126 = arith.cmpi eq, %48, %125 : vector<8x1024xi32>
      %cst_47 = arith.constant -1.000000e+30 : f32
      %127 = vector.broadcast %cst_47 : f32 to vector<8x1024xf32>
      %128 = arith.select %126, %127, %114 : vector<8x1024xi1>, vector<8x1024xf32>
      %cst_48 = arith.constant dense<0xFF800000> : vector<8xf32>
      %129 = vector.multi_reduction <maximumf>, %128, %cst_48 [1] : vector<8x1024xf32> to vector<8xf32>
      %130 = vector.shape_cast %129 : vector<8xf32> to vector<8x1xf32>
      %131 = vector.broadcast %130 : vector<8x1xf32> to vector<8x1024xf32>
      %132 = arith.cmpf oeq, %128, %131 : vector<8x1024xf32>
      %c1024_i32_49 = arith.constant 1024 : i32
      %133 = vector.broadcast %c1024_i32_49 : i32 to vector<8x1024xi32>
      %134 = arith.select %132, %48, %133 : vector<8x1024xi1>, vector<8x1024xi32>
      %cst_50 = arith.constant dense<2147483647> : vector<8xi32>
      %135 = vector.multi_reduction <minsi>, %134, %cst_50 [1] : vector<8x1024xi32> to vector<8xi32>
      %136 = vector.shape_cast %135 : vector<8xi32> to vector<8x1xi32>
      %137 = vector.broadcast %50 : i32 to vector<8x1xi32>
      %138 = arith.addi %136, %137 : vector<8x1xi32>
      %139 = vector.broadcast %136 : vector<8x1xi32> to vector<8x1024xi32>
      %140 = arith.cmpi eq, %48, %139 : vector<8x1024xi32>
      %cst_51 = arith.constant -1.000000e+30 : f32
      %141 = vector.broadcast %cst_51 : f32 to vector<8x1024xf32>
      %142 = arith.select %140, %141, %128 : vector<8x1024xi1>, vector<8x1024xf32>
      %cst_52 = arith.constant dense<0xFF800000> : vector<8xf32>
      %143 = vector.multi_reduction <maximumf>, %142, %cst_52 [1] : vector<8x1024xf32> to vector<8xf32>
      %144 = vector.shape_cast %143 : vector<8xf32> to vector<8x1xf32>
      %145 = vector.broadcast %144 : vector<8x1xf32> to vector<8x1024xf32>
      %146 = arith.cmpf oeq, %142, %145 : vector<8x1024xf32>
      %c1024_i32_53 = arith.constant 1024 : i32
      %147 = vector.broadcast %c1024_i32_53 : i32 to vector<8x1024xi32>
      %148 = arith.select %146, %48, %147 : vector<8x1024xi1>, vector<8x1024xi32>
      %cst_54 = arith.constant dense<2147483647> : vector<8xi32>
      %149 = vector.multi_reduction <minsi>, %148, %cst_54 [1] : vector<8x1024xi32> to vector<8xi32>
      %150 = vector.shape_cast %149 : vector<8xi32> to vector<8x1xi32>
      %151 = vector.broadcast %50 : i32 to vector<8x1xi32>
      %152 = arith.addi %150, %151 : vector<8x1xi32>
      %153 = vector.broadcast %150 : vector<8x1xi32> to vector<8x1024xi32>
      %154 = arith.cmpi eq, %48, %153 : vector<8x1024xi32>
      %cst_55 = arith.constant -1.000000e+30 : f32
      %155 = vector.broadcast %cst_55 : f32 to vector<8x1024xf32>
      %156 = arith.select %154, %155, %142 : vector<8x1024xi1>, vector<8x1024xf32>
      %cst_56 = arith.constant dense<0xFF800000> : vector<8xf32>
      %157 = vector.multi_reduction <maximumf>, %156, %cst_56 [1] : vector<8x1024xf32> to vector<8xf32>
      %158 = vector.shape_cast %157 : vector<8xf32> to vector<8x1xf32>
      %159 = vector.broadcast %158 : vector<8x1xf32> to vector<8x1024xf32>
      %160 = arith.cmpf oeq, %156, %159 : vector<8x1024xf32>
      %c1024_i32_57 = arith.constant 1024 : i32
      %161 = vector.broadcast %c1024_i32_57 : i32 to vector<8x1024xi32>
      %162 = arith.select %160, %48, %161 : vector<8x1024xi1>, vector<8x1024xi32>
      %cst_58 = arith.constant dense<2147483647> : vector<8xi32>
      %163 = vector.multi_reduction <minsi>, %162, %cst_58 [1] : vector<8x1024xi32> to vector<8xi32>
      %164 = vector.shape_cast %163 : vector<8xi32> to vector<8x1xi32>
      %165 = vector.broadcast %50 : i32 to vector<8x1xi32>
      %166 = arith.addi %164, %165 : vector<8x1xi32>
      %167 = vector.broadcast %164 : vector<8x1xi32> to vector<8x1024xi32>
      %168 = arith.cmpi eq, %48, %167 : vector<8x1024xi32>
      %cst_59 = arith.constant -1.000000e+30 : f32
      %169 = vector.broadcast %cst_59 : f32 to vector<8x1024xf32>
      %170 = arith.select %168, %169, %156 : vector<8x1024xi1>, vector<8x1024xf32>
      %cst_60 = arith.constant dense<0xFF800000> : vector<8xf32>
      %171 = vector.multi_reduction <maximumf>, %170, %cst_60 [1] : vector<8x1024xf32> to vector<8xf32>
      %172 = vector.shape_cast %171 : vector<8xf32> to vector<8x1xf32>
      %173 = vector.broadcast %172 : vector<8x1xf32> to vector<8x1024xf32>
      %174 = arith.cmpf oeq, %170, %173 : vector<8x1024xf32>
      %c1024_i32_61 = arith.constant 1024 : i32
      %175 = vector.broadcast %c1024_i32_61 : i32 to vector<8x1024xi32>
      %176 = arith.select %174, %48, %175 : vector<8x1024xi1>, vector<8x1024xi32>
      %cst_62 = arith.constant dense<2147483647> : vector<8xi32>
      %177 = vector.multi_reduction <minsi>, %176, %cst_62 [1] : vector<8x1024xi32> to vector<8xi32>
      %178 = vector.shape_cast %177 : vector<8xi32> to vector<8x1xi32>
      %179 = vector.broadcast %50 : i32 to vector<8x1xi32>
      %180 = arith.addi %178, %179 : vector<8x1xi32>
      %181 = vector.broadcast %178 : vector<8x1xi32> to vector<8x1024xi32>
      %182 = arith.cmpi eq, %48, %181 : vector<8x1024xi32>
      %cst_63 = arith.constant -1.000000e+30 : f32
      %183 = vector.broadcast %cst_63 : f32 to vector<8x1024xf32>
      %184 = arith.select %182, %183, %170 : vector<8x1024xi1>, vector<8x1024xf32>
      %cst_64 = arith.constant dense<0xFF800000> : vector<8xf32>
      %185 = vector.multi_reduction <maximumf>, %184, %cst_64 [1] : vector<8x1024xf32> to vector<8xf32>
      %186 = vector.shape_cast %185 : vector<8xf32> to vector<8x1xf32>
      %187 = vector.broadcast %186 : vector<8x1xf32> to vector<8x1024xf32>
      %188 = arith.cmpf oeq, %184, %187 : vector<8x1024xf32>
      %c1024_i32_65 = arith.constant 1024 : i32
      %189 = vector.broadcast %c1024_i32_65 : i32 to vector<8x1024xi32>
      %190 = arith.select %188, %48, %189 : vector<8x1024xi1>, vector<8x1024xi32>
      %cst_66 = arith.constant dense<2147483647> : vector<8xi32>
      %191 = vector.multi_reduction <minsi>, %190, %cst_66 [1] : vector<8x1024xi32> to vector<8xi32>
      %192 = vector.shape_cast %191 : vector<8xi32> to vector<8x1xi32>
      %193 = vector.broadcast %50 : i32 to vector<8x1xi32>
      %194 = arith.addi %192, %193 : vector<8x1xi32>
      %cst_67 = arith.constant -1.000000e+30 : f32
      %195 = vector.broadcast %cst_67 : f32 to vector<8x118xf32>
      %196 = tpu.concatenate %60, %74, %88, %102, %116, %130, %144, %158, %172, %186, %195 in 1 : vector<8x1xf32>, vector<8x1xf32>, vector<8x1xf32>, vector<8x1xf32>, vector<8x1xf32>, vector<8x1xf32>, vector<8x1xf32>, vector<8x1xf32>, vector<8x1xf32>, vector<8x1xf32>, vector<8x118xf32> -> vector<8x128xf32>
      %c0_i32_68 = arith.constant 0 : i32
      %197 = vector.broadcast %c0_i32_68 : i32 to vector<8x118xi32>
      %198 = tpu.concatenate %68, %82, %96, %110, %124, %138, %152, %166, %180, %194, %197 in 1 : vector<8x1xi32>, vector<8x1xi32>, vector<8x1xi32>, vector<8x1xi32>, vector<8x1xi32>, vector<8x1xi32>, vector<8x1xi32>, vector<8x1xi32>, vector<8x1xi32>, vector<8x1xi32>, vector<8x118xi32> -> vector<8x128xi32>
      %199 = arith.index_cast %56 : i32 to index
      %c0_69 = arith.constant 0 : index
      %200 = vector.load %arg8[%199, %c0_69] : memref<64x128xf32, #tpu.memory_space<vmem>>, vector<8x128xf32>
      %201 = tpu.concatenate %200, %196 in 1 : vector<8x128xf32>, vector<8x128xf32> -> vector<8x256xf32>
      %202 = arith.index_cast %56 : i32 to index
      %c0_70 = arith.constant 0 : index
      %203 = vector.load %arg9[%202, %c0_70] : memref<64x128xi32, #tpu.memory_space<vmem>>, vector<8x128xi32>
      %204 = tpu.concatenate %203, %198 in 1 : vector<8x128xi32>, vector<8x128xi32> -> vector<8x256xi32>
      %cst_71 = arith.constant dense<0xFF800000> : vector<8xf32>
      %205 = vector.multi_reduction <maximumf>, %201, %cst_71 [1] : vector<8x256xf32> to vector<8xf32>
      %206 = vector.shape_cast %205 : vector<8xf32> to vector<8x1xf32>
      %207 = vector.broadcast %206 : vector<8x1xf32> to vector<8x256xf32>
      %208 = arith.cmpf oeq, %201, %207 : vector<8x256xf32>
      %c256_i32 = arith.constant 256 : i32
      %209 = vector.broadcast %c256_i32 : i32 to vector<8x256xi32>
      %210 = arith.select %208, %49, %209 : vector<8x256xi1>, vector<8x256xi32>
      %cst_72 = arith.constant dense<2147483647> : vector<8xi32>
      %211 = vector.multi_reduction <minsi>, %210, %cst_72 [1] : vector<8x256xi32> to vector<8xi32>
      %212 = vector.shape_cast %211 : vector<8xi32> to vector<8x1xi32>
      %213 = vector.broadcast %212 : vector<8x1xi32> to vector<8x256xi32>
      %214 = arith.cmpi eq, %49, %213 : vector<8x256xi32>
      %c0_i32_73 = arith.constant 0 : i32
      %215 = vector.broadcast %c0_i32_73 : i32 to vector<8x256xi32>
      %216 = arith.select %214, %204, %215 : vector<8x256xi1>, vector<8x256xi32>
      %cst_74 = arith.constant dense<0> : vector<8xi32>
      %217 = vector.multi_reduction <add>, %216, %cst_74 [1] : vector<8x256xi32> to vector<8xi32>
      %218 = vector.shape_cast %217 : vector<8xi32> to vector<8x1xi32>
      %cst_75 = arith.constant -1.000000e+30 : f32
      %219 = vector.broadcast %cst_75 : f32 to vector<8x256xf32>
      %220 = arith.select %214, %219, %201 : vector<8x256xi1>, vector<8x256xf32>
      %cst_76 = arith.constant dense<0xFF800000> : vector<8xf32>
      %221 = vector.multi_reduction <maximumf>, %220, %cst_76 [1] : vector<8x256xf32> to vector<8xf32>
      %222 = vector.shape_cast %221 : vector<8xf32> to vector<8x1xf32>
      %223 = vector.broadcast %222 : vector<8x1xf32> to vector<8x256xf32>
      %224 = arith.cmpf oeq, %220, %223 : vector<8x256xf32>
      %c256_i32_77 = arith.constant 256 : i32
      %225 = vector.broadcast %c256_i32_77 : i32 to vector<8x256xi32>
      %226 = arith.select %224, %49, %225 : vector<8x256xi1>, vector<8x256xi32>
      %cst_78 = arith.constant dense<2147483647> : vector<8xi32>
      %227 = vector.multi_reduction <minsi>, %226, %cst_78 [1] : vector<8x256xi32> to vector<8xi32>
      %228 = vector.shape_cast %227 : vector<8xi32> to vector<8x1xi32>
      %229 = vector.broadcast %228 : vector<8x1xi32> to vector<8x256xi32>
      %230 = arith.cmpi eq, %49, %229 : vector<8x256xi32>
      %c0_i32_79 = arith.constant 0 : i32
      %231 = vector.broadcast %c0_i32_79 : i32 to vector<8x256xi32>
      %232 = arith.select %230, %204, %231 : vector<8x256xi1>, vector<8x256xi32>
      %cst_80 = arith.constant dense<0> : vector<8xi32>
      %233 = vector.multi_reduction <add>, %232, %cst_80 [1] : vector<8x256xi32> to vector<8xi32>
      %234 = vector.shape_cast %233 : vector<8xi32> to vector<8x1xi32>
      %cst_81 = arith.constant -1.000000e+30 : f32
      %235 = vector.broadcast %cst_81 : f32 to vector<8x256xf32>
      %236 = arith.select %230, %235, %220 : vector<8x256xi1>, vector<8x256xf32>
      %cst_82 = arith.constant dense<0xFF800000> : vector<8xf32>
      %237 = vector.multi_reduction <maximumf>, %236, %cst_82 [1] : vector<8x256xf32> to vector<8xf32>
      %238 = vector.shape_cast %237 : vector<8xf32> to vector<8x1xf32>
      %239 = vector.broadcast %238 : vector<8x1xf32> to vector<8x256xf32>
      %240 = arith.cmpf oeq, %236, %239 : vector<8x256xf32>
      %c256_i32_83 = arith.constant 256 : i32
      %241 = vector.broadcast %c256_i32_83 : i32 to vector<8x256xi32>
      %242 = arith.select %240, %49, %241 : vector<8x256xi1>, vector<8x256xi32>
      %cst_84 = arith.constant dense<2147483647> : vector<8xi32>
      %243 = vector.multi_reduction <minsi>, %242, %cst_84 [1] : vector<8x256xi32> to vector<8xi32>
      %244 = vector.shape_cast %243 : vector<8xi32> to vector<8x1xi32>
      %245 = vector.broadcast %244 : vector<8x1xi32> to vector<8x256xi32>
      %246 = arith.cmpi eq, %49, %245 : vector<8x256xi32>
      %c0_i32_85 = arith.constant 0 : i32
      %247 = vector.broadcast %c0_i32_85 : i32 to vector<8x256xi32>
      %248 = arith.select %246, %204, %247 : vector<8x256xi1>, vector<8x256xi32>
      %cst_86 = arith.constant dense<0> : vector<8xi32>
      %249 = vector.multi_reduction <add>, %248, %cst_86 [1] : vector<8x256xi32> to vector<8xi32>
      %250 = vector.shape_cast %249 : vector<8xi32> to vector<8x1xi32>
      %cst_87 = arith.constant -1.000000e+30 : f32
      %251 = vector.broadcast %cst_87 : f32 to vector<8x256xf32>
      %252 = arith.select %246, %251, %236 : vector<8x256xi1>, vector<8x256xf32>
      %cst_88 = arith.constant dense<0xFF800000> : vector<8xf32>
      %253 = vector.multi_reduction <maximumf>, %252, %cst_88 [1] : vector<8x256xf32> to vector<8xf32>
      %254 = vector.shape_cast %253 : vector<8xf32> to vector<8x1xf32>
      %255 = vector.broadcast %254 : vector<8x1xf32> to vector<8x256xf32>
      %256 = arith.cmpf oeq, %252, %255 : vector<8x256xf32>
      %c256_i32_89 = arith.constant 256 : i32
      %257 = vector.broadcast %c256_i32_89 : i32 to vector<8x256xi32>
      %258 = arith.select %256, %49, %257 : vector<8x256xi1>, vector<8x256xi32>
      %cst_90 = arith.constant dense<2147483647> : vector<8xi32>
      %259 = vector.multi_reduction <minsi>, %258, %cst_90 [1] : vector<8x256xi32> to vector<8xi32>
      %260 = vector.shape_cast %259 : vector<8xi32> to vector<8x1xi32>
      %261 = vector.broadcast %260 : vector<8x1xi32> to vector<8x256xi32>
      %262 = arith.cmpi eq, %49, %261 : vector<8x256xi32>
      %c0_i32_91 = arith.constant 0 : i32
      %263 = vector.broadcast %c0_i32_91 : i32 to vector<8x256xi32>
      %264 = arith.select %262, %204, %263 : vector<8x256xi1>, vector<8x256xi32>
      %cst_92 = arith.constant dense<0> : vector<8xi32>
      %265 = vector.multi_reduction <add>, %264, %cst_92 [1] : vector<8x256xi32> to vector<8xi32>
      %266 = vector.shape_cast %265 : vector<8xi32> to vector<8x1xi32>
      %cst_93 = arith.constant -1.000000e+30 : f32
      %267 = vector.broadcast %cst_93 : f32 to vector<8x256xf32>
      %268 = arith.select %262, %267, %252 : vector<8x256xi1>, vector<8x256xf32>
      %cst_94 = arith.constant dense<0xFF800000> : vector<8xf32>
      %269 = vector.multi_reduction <maximumf>, %268, %cst_94 [1] : vector<8x256xf32> to vector<8xf32>
      %270 = vector.shape_cast %269 : vector<8xf32> to vector<8x1xf32>
      %271 = vector.broadcast %270 : vector<8x1xf32> to vector<8x256xf32>
      %272 = arith.cmpf oeq, %268, %271 : vector<8x256xf32>
      %c256_i32_95 = arith.constant 256 : i32
      %273 = vector.broadcast %c256_i32_95 : i32 to vector<8x256xi32>
      %274 = arith.select %272, %49, %273 : vector<8x256xi1>, vector<8x256xi32>
      %cst_96 = arith.constant dense<2147483647> : vector<8xi32>
      %275 = vector.multi_reduction <minsi>, %274, %cst_96 [1] : vector<8x256xi32> to vector<8xi32>
      %276 = vector.shape_cast %275 : vector<8xi32> to vector<8x1xi32>
      %277 = vector.broadcast %276 : vector<8x1xi32> to vector<8x256xi32>
      %278 = arith.cmpi eq, %49, %277 : vector<8x256xi32>
      %c0_i32_97 = arith.constant 0 : i32
      %279 = vector.broadcast %c0_i32_97 : i32 to vector<8x256xi32>
      %280 = arith.select %278, %204, %279 : vector<8x256xi1>, vector<8x256xi32>
      %cst_98 = arith.constant dense<0> : vector<8xi32>
      %281 = vector.multi_reduction <add>, %280, %cst_98 [1] : vector<8x256xi32> to vector<8xi32>
      %282 = vector.shape_cast %281 : vector<8xi32> to vector<8x1xi32>
      %cst_99 = arith.constant -1.000000e+30 : f32
      %283 = vector.broadcast %cst_99 : f32 to vector<8x256xf32>
      %284 = arith.select %278, %283, %268 : vector<8x256xi1>, vector<8x256xf32>
      %cst_100 = arith.constant dense<0xFF800000> : vector<8xf32>
      %285 = vector.multi_reduction <maximumf>, %284, %cst_100 [1] : vector<8x256xf32> to vector<8xf32>
      %286 = vector.shape_cast %285 : vector<8xf32> to vector<8x1xf32>
      %287 = vector.broadcast %286 : vector<8x1xf32> to vector<8x256xf32>
      %288 = arith.cmpf oeq, %284, %287 : vector<8x256xf32>
      %c256_i32_101 = arith.constant 256 : i32
      %289 = vector.broadcast %c256_i32_101 : i32 to vector<8x256xi32>
      %290 = arith.select %288, %49, %289 : vector<8x256xi1>, vector<8x256xi32>
      %cst_102 = arith.constant dense<2147483647> : vector<8xi32>
      %291 = vector.multi_reduction <minsi>, %290, %cst_102 [1] : vector<8x256xi32> to vector<8xi32>
      %292 = vector.shape_cast %291 : vector<8xi32> to vector<8x1xi32>
      %293 = vector.broadcast %292 : vector<8x1xi32> to vector<8x256xi32>
      %294 = arith.cmpi eq, %49, %293 : vector<8x256xi32>
      %c0_i32_103 = arith.constant 0 : i32
      %295 = vector.broadcast %c0_i32_103 : i32 to vector<8x256xi32>
      %296 = arith.select %294, %204, %295 : vector<8x256xi1>, vector<8x256xi32>
      %cst_104 = arith.constant dense<0> : vector<8xi32>
      %297 = vector.multi_reduction <add>, %296, %cst_104 [1] : vector<8x256xi32> to vector<8xi32>
      %298 = vector.shape_cast %297 : vector<8xi32> to vector<8x1xi32>
      %cst_105 = arith.constant -1.000000e+30 : f32
      %299 = vector.broadcast %cst_105 : f32 to vector<8x256xf32>
      %300 = arith.select %294, %299, %284 : vector<8x256xi1>, vector<8x256xf32>
      %cst_106 = arith.constant dense<0xFF800000> : vector<8xf32>
      %301 = vector.multi_reduction <maximumf>, %300, %cst_106 [1] : vector<8x256xf32> to vector<8xf32>
      %302 = vector.shape_cast %301 : vector<8xf32> to vector<8x1xf32>
      %303 = vector.broadcast %302 : vector<8x1xf32> to vector<8x256xf32>
      %304 = arith.cmpf oeq, %300, %303 : vector<8x256xf32>
      %c256_i32_107 = arith.constant 256 : i32
      %305 = vector.broadcast %c256_i32_107 : i32 to vector<8x256xi32>
      %306 = arith.select %304, %49, %305 : vector<8x256xi1>, vector<8x256xi32>
      %cst_108 = arith.constant dense<2147483647> : vector<8xi32>
      %307 = vector.multi_reduction <minsi>, %306, %cst_108 [1] : vector<8x256xi32> to vector<8xi32>
      %308 = vector.shape_cast %307 : vector<8xi32> to vector<8x1xi32>
      %309 = vector.broadcast %308 : vector<8x1xi32> to vector<8x256xi32>
      %310 = arith.cmpi eq, %49, %309 : vector<8x256xi32>
      %c0_i32_109 = arith.constant 0 : i32
      %311 = vector.broadcast %c0_i32_109 : i32 to vector<8x256xi32>
      %312 = arith.select %310, %204, %311 : vector<8x256xi1>, vector<8x256xi32>
      %cst_110 = arith.constant dense<0> : vector<8xi32>
      %313 = vector.multi_reduction <add>, %312, %cst_110 [1] : vector<8x256xi32> to vector<8xi32>
      %314 = vector.shape_cast %313 : vector<8xi32> to vector<8x1xi32>
      %cst_111 = arith.constant -1.000000e+30 : f32
      %315 = vector.broadcast %cst_111 : f32 to vector<8x256xf32>
      %316 = arith.select %310, %315, %300 : vector<8x256xi1>, vector<8x256xf32>
      %cst_112 = arith.constant dense<0xFF800000> : vector<8xf32>
      %317 = vector.multi_reduction <maximumf>, %316, %cst_112 [1] : vector<8x256xf32> to vector<8xf32>
      %318 = vector.shape_cast %317 : vector<8xf32> to vector<8x1xf32>
      %319 = vector.broadcast %318 : vector<8x1xf32> to vector<8x256xf32>
      %320 = arith.cmpf oeq, %316, %319 : vector<8x256xf32>
      %c256_i32_113 = arith.constant 256 : i32
      %321 = vector.broadcast %c256_i32_113 : i32 to vector<8x256xi32>
      %322 = arith.select %320, %49, %321 : vector<8x256xi1>, vector<8x256xi32>
      %cst_114 = arith.constant dense<2147483647> : vector<8xi32>
      %323 = vector.multi_reduction <minsi>, %322, %cst_114 [1] : vector<8x256xi32> to vector<8xi32>
      %324 = vector.shape_cast %323 : vector<8xi32> to vector<8x1xi32>
      %325 = vector.broadcast %324 : vector<8x1xi32> to vector<8x256xi32>
      %326 = arith.cmpi eq, %49, %325 : vector<8x256xi32>
      %c0_i32_115 = arith.constant 0 : i32
      %327 = vector.broadcast %c0_i32_115 : i32 to vector<8x256xi32>
      %328 = arith.select %326, %204, %327 : vector<8x256xi1>, vector<8x256xi32>
      %cst_116 = arith.constant dense<0> : vector<8xi32>
      %329 = vector.multi_reduction <add>, %328, %cst_116 [1] : vector<8x256xi32> to vector<8xi32>
      %330 = vector.shape_cast %329 : vector<8xi32> to vector<8x1xi32>
      %cst_117 = arith.constant -1.000000e+30 : f32
      %331 = vector.broadcast %cst_117 : f32 to vector<8x256xf32>
      %332 = arith.select %326, %331, %316 : vector<8x256xi1>, vector<8x256xf32>
      %cst_118 = arith.constant dense<0xFF800000> : vector<8xf32>
      %333 = vector.multi_reduction <maximumf>, %332, %cst_118 [1] : vector<8x256xf32> to vector<8xf32>
      %334 = vector.shape_cast %333 : vector<8xf32> to vector<8x1xf32>
      %335 = vector.broadcast %334 : vector<8x1xf32> to vector<8x256xf32>
      %336 = arith.cmpf oeq, %332, %335 : vector<8x256xf32>
      %c256_i32_119 = arith.constant 256 : i32
      %337 = vector.broadcast %c256_i32_119 : i32 to vector<8x256xi32>
      %338 = arith.select %336, %49, %337 : vector<8x256xi1>, vector<8x256xi32>
      %cst_120 = arith.constant dense<2147483647> : vector<8xi32>
      %339 = vector.multi_reduction <minsi>, %338, %cst_120 [1] : vector<8x256xi32> to vector<8xi32>
      %340 = vector.shape_cast %339 : vector<8xi32> to vector<8x1xi32>
      %341 = vector.broadcast %340 : vector<8x1xi32> to vector<8x256xi32>
      %342 = arith.cmpi eq, %49, %341 : vector<8x256xi32>
      %c0_i32_121 = arith.constant 0 : i32
      %343 = vector.broadcast %c0_i32_121 : i32 to vector<8x256xi32>
      %344 = arith.select %342, %204, %343 : vector<8x256xi1>, vector<8x256xi32>
      %cst_122 = arith.constant dense<0> : vector<8xi32>
      %345 = vector.multi_reduction <add>, %344, %cst_122 [1] : vector<8x256xi32> to vector<8xi32>
      %346 = vector.shape_cast %345 : vector<8xi32> to vector<8x1xi32>
      %cst_123 = arith.constant -1.000000e+30 : f32
      %347 = vector.broadcast %cst_123 : f32 to vector<8x256xf32>
      %348 = arith.select %342, %347, %332 : vector<8x256xi1>, vector<8x256xf32>
      %cst_124 = arith.constant dense<0xFF800000> : vector<8xf32>
      %349 = vector.multi_reduction <maximumf>, %348, %cst_124 [1] : vector<8x256xf32> to vector<8xf32>
      %350 = vector.shape_cast %349 : vector<8xf32> to vector<8x1xf32>
      %351 = vector.broadcast %350 : vector<8x1xf32> to vector<8x256xf32>
      %352 = arith.cmpf oeq, %348, %351 : vector<8x256xf32>
      %c256_i32_125 = arith.constant 256 : i32
      %353 = vector.broadcast %c256_i32_125 : i32 to vector<8x256xi32>
      %354 = arith.select %352, %49, %353 : vector<8x256xi1>, vector<8x256xi32>
      %cst_126 = arith.constant dense<2147483647> : vector<8xi32>
      %355 = vector.multi_reduction <minsi>, %354, %cst_126 [1] : vector<8x256xi32> to vector<8xi32>
      %356 = vector.shape_cast %355 : vector<8xi32> to vector<8x1xi32>
      %357 = vector.broadcast %356 : vector<8x1xi32> to vector<8x256xi32>
      %358 = arith.cmpi eq, %49, %357 : vector<8x256xi32>
      %c0_i32_127 = arith.constant 0 : i32
      %359 = vector.broadcast %c0_i32_127 : i32 to vector<8x256xi32>
      %360 = arith.select %358, %204, %359 : vector<8x256xi1>, vector<8x256xi32>
      %cst_128 = arith.constant dense<0> : vector<8xi32>
      %361 = vector.multi_reduction <add>, %360, %cst_128 [1] : vector<8x256xi32> to vector<8xi32>
      %362 = vector.shape_cast %361 : vector<8xi32> to vector<8x1xi32>
      %cst_129 = arith.constant -1.000000e+30 : f32
      %363 = vector.broadcast %cst_129 : f32 to vector<8x118xf32>
      %364 = tpu.concatenate %206, %222, %238, %254, %270, %286, %302, %318, %334, %350, %363 in 1 : vector<8x1xf32>, vector<8x1xf32>, vector<8x1xf32>, vector<8x1xf32>, vector<8x1xf32>, vector<8x1xf32>, vector<8x1xf32>, vector<8x1xf32>, vector<8x1xf32>, vector<8x1xf32>, vector<8x118xf32> -> vector<8x128xf32>
      %365 = arith.index_cast %56 : i32 to index
      %c0_130 = arith.constant 0 : index
      %366 = vector.load %arg8[%365, %c0_130] : memref<64x128xf32, #tpu.memory_space<vmem>>, vector<8x128xf32>
      tpu.vector_store %arg8[%365, %c0_130], %364 {strides = array<i32>} : memref<64x128xf32, #tpu.memory_space<vmem>>, vector<8x128xf32>,
      %c0_i32_131 = arith.constant 0 : i32
      %367 = vector.broadcast %c0_i32_131 : i32 to vector<8x118xi32>
      %368 = tpu.concatenate %218, %234, %250, %266, %282, %298, %314, %330, %346, %362, %367 in 1 : vector<8x1xi32>, vector<8x1xi32>, vector<8x1xi32>, vector<8x1xi32>, vector<8x1xi32>, vector<8x1xi32>, vector<8x1xi32>, vector<8x1xi32>, vector<8x1xi32>, vector<8x1xi32>, vector<8x118xi32> -> vector<8x128xi32>
      %369 = arith.index_cast %56 : i32 to index
      %c0_132 = arith.constant 0 : index
      %370 = vector.load %arg9[%369, %c0_132] : memref<64x128xi32, #tpu.memory_space<vmem>>, vector<8x128xi32>
      tpu.vector_store %arg9[%369, %c0_132], %368 {strides = array<i32>} : memref<64x128xi32, #tpu.memory_space<vmem>>, vector<8x128xi32>,
    }
    %c8_i32_23 = arith.constant 8 : i32
    %c1_i32_24 = arith.constant 1 : i32
    %52 = arith.cmpi eq, %arg1, %c1_i32_24 : i32
    %53 = arith.extui %52 : i1 to i32
    %c0_i32_25 = arith.constant 0 : i32
    %54 = arith.cmpi ne, %53, %c0_i32_25 : i32
    scf.if %54 {
      %c0_26 = arith.constant 0 : index
      %c0_27 = arith.constant 0 : index
      %55 = vector.load %arg9[%c0_26, %c0_27] : memref<64x128xi32, #tpu.memory_space<vmem>>, vector<64x128xi32>
      %c0_28 = arith.constant 0 : index
      %c0_29 = arith.constant 0 : index
      %56 = vector.load %arg6[%c0_28, %c0_29] : memref<64x128xi32, #tpu.memory_space<vmem>>, vector<64x128xi32>
      tpu.vector_store %arg6[%c0_28, %c0_29], %55 {strides = array<i32>} : memref<64x128xi32, #tpu.memory_space<vmem>>, vector<64x128xi32>,
    } else {
    }
    return
  }
  func.func @transform_0(%arg0: i32, %arg1: i32) -> (i32, i32) {
    %c0_i32 = arith.constant 0 : i32
    %c0_i32_0 = arith.constant 0 : i32
    return %arg0, %c0_i32 : i32, i32
  }
  func.func @transform_1(%arg0: i32, %arg1: i32) -> (i32, i32) {
    %c0_i32 = arith.constant 0 : i32
    %c0_i32_0 = arith.constant 0 : i32
    return %c0_i32, %arg1 : i32, i32
  }
  func.func @transform_2(%arg0: i32, %arg1: i32) -> (i32, i32) {
    %c0_i32 = arith.constant 0 : i32
    return %arg0, %arg1 : i32, i32
  }
  func.func @transform_3(%arg0: i32, %arg1: i32) -> (i32, i32) {
    %c0_i32 = arith.constant 0 : i32
    return %arg0, %arg1 : i32, i32
  }
  func.func @transform_4(%arg0: i32, %arg1: i32) -> (i32, i32) {
    %c0_i32 = arith.constant 0 : i32
    %c0_i32_0 = arith.constant 0 : i32
    return %arg0, %c0_i32 : i32, i32
  }
}

</mosaic_0001>

<bundles_post_ra>
// kernel: tpu_custom_call.1
= control target key start
LH: loop header
LB: loop body
LE: loop exit
PB: predicated region body
PF: predicated region fallthrough
CT: control target
= control target key end

     0   :  { %s5123_s0 = inlined_call_operand.vmem [shape: bf16[128,32], index: 0, kind: input, shape index: {}]   ;;  %s5124_s1 = inlined_call_operand.hbm [shape: bf16[32,2048], index: 1, kind: input, shape index: {}]   ;;  %s5125_s2 = inlined_call_operand.vmem [shape: s8[128,256], index: 2, kind: input, shape index: {}]   ;;  %s5126_s3 = inlined_call_operand.hbm [shape: bf16[128,2048], index: 3, kind: output, shape index: {0}]   ;;  %s5127_s4 = inlined_call_operand.hbm [shape: s32[128,128], index: 4, kind: output, shape index: {1}]  }
   0x1   :  { %5164 = sst [smem:[#allocation27_spill]] %s5124_s1 }
   0x2   :  { %5165 = sst [smem:[#allocation28_spill]] %s5127_s4 }
   0x3   :  { %10 = vsyncpa [#allocation6], 0 }
   0x4   :  { %12 = vsyncpa [#allocation6 + $0x1], 0 }
   0x5   :  { %13 = vsyncpa [#allocation7], 0 }
   0x6   :  { %15 = vsyncpa [#allocation7 + $0x1], 0 }
   0x7   :  { %16 = vsyncpa [#allocation11], 0 }
   0x8   :  { %18 = vsyncpa [#allocation11 + $0x1], 0  ;;  %s3279_s15 = smov 0   ;;  %s3281_s16 = smov 0  }
   0x9   :  { %s3283_s17 = smov 0   ;;  %s3285_s18 = smov 0  }
   0xa   :  { %s3287_s19 = smov 0   ;;  %s3289_s20 = smov 0  }
   0xb   :  { %s3291_s21 = smov 0   ;;  %s3293_s22 = smov 0  }
   0xc   :  { %s3295_s23 = smov 0   ;;  %s3297_s24 = smov 0  }
   0xd   :  { %s3299_s25 = smov 0   ;;  %s3301_s26 = smov 0  }
   0xe   :  { %s3303_s27 = smov 0   ;;  %s3305_s28 = smov 0  }
   0xf LB: > { %5166 = sst [smem:[#allocation15_spill]] %s3182_s15  ;;  %s2736_s29 = sadd.s32 4294967295, %s3234_s28   ;;  %s3234_s28 = sphi %s3305_s28, %s24_s28   ;;  %s3230_s27 = sphi %s3303_s27, %s5266_s27   ;;  %s3226_s26 = sphi %s3301_s26, %s5265_s26   ;;  %s3222_s25 = sphi %s3299_s25, %s5264_s25   ;;  %s3218_s24 = sphi %s3297_s24, %s5263_s24   ;;  %s3214_s23 = sphi %s3295_s23, %s5251_s23   ;;  %s3210_s22 = sphi %s3293_s22, %s5262_s22   ;;  %s3206_s21 = sphi %s3291_s21, %s5261_s21   ;;  %s3202_s20 = sphi %s3289_s20, %s5260_s20   ;;  %s3198_s19 = sphi %s3287_s19, %s5259_s19   ;;  %s3194_s18 = sphi %s3285_s18, %s5258_s18   ;;  %s3190_s17 = sphi %s3283_s17, %s5257_s17   ;;  %s3186_s16 = sphi %s3281_s16, %s5256_s16   ;;  %s3182_s15 = sphi %s3279_s15, %s5255_s15  }
  0x10   : > { %5167 = sst [smem:[#allocation16_spill]] %s3190_s17  ;;  %s2737_s30 = sadd.s32 4294967294, %s3234_s28  }
  0x11   : > { %5168 = sst [smem:[#allocation17_spill]] %s3194_s18  ;;  %s33_s5 = sadd.s32 1, %s3226_s26 }
  0x12   : > { %5169 = sst [smem:[#allocation18_spill]] %s3214_s23  ;;  %s36_s6 = sadd.s32 1, %s3230_s27 }
  0x13   : > { %p34_p0 = scmp.ge.s32.totalorder %s33_s5, 2  ;;  %s69_s7 = sadd.s32 1, %s3214_s23 }
  0x14   : > { %p76_p1 = scmp.ne.s32.totalorder %s3214_s23, %s3210_s22  ;;  %p77_p2 = scmp.eq.s32.totalorder %s3234_s28, 0 }
  0x15   : > { %s5268_s5 = smov (%p34_p0, %s33_s5), 0  ;;  %s5270_s6 = smov (!%p34_p0, %s36_s6), %s3230_s27 }
  0x16   : > { %5170 = sst [smem:[#allocation19_spill]] %s5268_s5  ;;  %s66_s8 = ssub.s32 %s3226_s26, %s5268_s5 }
  0x17   : > { %p3362_p3 = por %p77_p2, %p76_p1  ;;  %p38_p4 = scmp.ge.s32.totalorder %s5270_s6, 2 }
  0x18   : > { %p67_p5 = scmp.eq.s32.totalorder %s66_s8, 0  ;;  %p82_p6 = scmp.ne.s32.totalorder %s3210_s22, %s3206_s21 }
  0x19   : > { %p83_p7 = scmp.eq.s32.totalorder %s2736_s29, 0  ;;  %s5272_s6 = smov (%p38_p4, %s5270_s6), 0 }
  0x1a   : > { %5172 = sst [smem:[#allocation20_spill]] %s5272_s6  ;;  %s92_s12 = ssub.s32 %s3230_s27, %s5272_s6 }
  0x1b   : > { %s3370_s10 = scalar_select %p67_p5, %s3214_s23, %s69_s7  }
  0x1c   : > { %p3372_p8 = por %p83_p7, %p82_p6  ;;  %s94_s13 = sor.u32 %s92_s12, %s66_s8 }
  0x1d   : > { %5173 = sst [smem:[#allocation21_spill]] %s3370_s10  ;;  %s97_s14 = sadd.s32 1, %s3202_s20 }
  0x1e   : > { %s5174_s11 = scalar_select %p3372_p8, 1, 0 }
  0x1f   : > { %p95_p9 = scmp.eq.s32.totalorder %s94_s13, 0  ;;  %p104_p10 = scmp.ne.s32.totalorder %s3202_s20, %s3198_s19 }
  0x20   : > { %p136_p11 = scmp.eq.s32.totalorder %s2736_s29, 3  ;;  %p141_p12 = scmp.ne.s32.totalorder %s3198_s19, %s3194_s18 }
  0x21   : > { %s3384_s21 = scalar_select %p95_p9, %s3202_s20, %s97_s14  }
  0x22   : > { %p3388_p13 = por %p104_p10, %p77_p2  ;;  %p3392_p0 = por %p136_p11, %p104_p10 }
  0x23   : > { %5175 = sst [smem:[#allocation22_spill]] %s3384_s21  ;;  %p142_p1 = scmp.eq.s32.totalorder %s2737_s30, 3 }
  0x24   : > { %s5177_s5 = scalar_select %p3392_p0, 1, 0 }
  0x25   : > { %p149_p4 = scmp.eq.s32.totalorder %s92_s12, 0  ;;  %s151_s6 = sadd.s32 1, %s3190_s17 }
  0x26   : > { %p161_p5 = scmp.ne.s32.totalorder %s3190_s17, %s3186_s16  ;;  %p3399_p6 = por %p142_p1, %p141_p12 }
  0x27   : > { %p167_p7 = scmp.ne.s32.totalorder %s3186_s16, %s3182_s15  ;;  %p2739_p10 = scmp.ge.s32.totalorder %s3234_s28, 4 }
  0x28   : > { %s5178_s8 = scalar_select %p3399_p6, 1, 0 }
  0x29   : > { %s3406_s29 = scalar_select %p149_p4, %s3190_s17, %s151_s6  }
  0x2a   : > { %5179 = sst [smem:[#allocation23_spill]] %s5178_s8  ;;  %p3408_p9 = por %p161_p5, %p136_p11 }
  0x2b   : > { %5180 = sst [smem:[#allocation24_spill]] %s3406_s29  ;;  %p3412_p2 = por %p167_p7, %p142_p1 }
  0x2c   : > { %s5181_s13 = scalar_select %p3408_p9, 1, 0 }
  0x2d   : > { %s5183_s14 = scalar_select %p3412_p2, 1, 0 }
  0x2e   : > { %5182 = sst [smem:[#allocation25_spill]] %s5181_s13  ;;  %184 = sbr.rel (%p2739_p10) target bundleno = 85 (0x55), region = 16 }
  0x2f   : > { %5184 = sst [smem:[#allocation26_spill]] %s5183_s14  ;;  %s197_s30 = sand.u32 (!%p2739_p10), 1, %s3214_s23  }
  0x30   : > { %s2838_s12 = sshll.u32 (!%p2739_p10), %s3226_s26, 9  ;;  %s2740_s10 = sshll.u32 (!%p2739_p10), %s197_s30, 7 }
  0x31   : > { %s5185_s1 = sld [smem:[#allocation27_spill]] (!%p2739_p10)  ;;  %s201_s17 = scalar_lea.vmem (!%p2739_p10), [#allocation5], %s2740_s10 }
  0x32   : > { %s208_s14 = sshll.u32 (!%p2739_p10), %s201_s17, 4  ;;  %s3426_s15 = scalar_lea.sflag (!%p2739_p10), [#allocation6], %s197_s30  ;;  %s3424_s14 = int_to_ptr.vmem [resolvable:$true] %s208_s14 }
  0x37   : > { %s3422_s29 = scalar_lea.hbm %s5185_s1, %s2838_s12  ;;  %s3028_s21 = scalar_lea.hbm %s5185_s1, 4096 }
  0x38   : > { %s3024_s8 = scalar_lea.hbm %s3422_s29, 2048  ;;  %p3029_p4 = scmp.lt.u32.totalorder %s3422_s29, %s5185_s1 }
  0x39   : > { %p3025_p11 = scmp.ne.s32.totalorder %s3422_s29, %s3024_s8  ;;  %p3030_p5 = scmp.lt.u32.totalorder %s3028_s21, %s3024_s8 }
  0x3a   : > { %p3032_p10 = scmp.lt.u32.totalorder %s3024_s8, %s3422_s29 }
  0x3b   : > { %p3026_p12 = pnand %p3025_p11, %p3362_p3  ;;  %p3031_p7 = por %p3030_p5, %p3029_p4 }
  0x3d   : > { %p3027_p1 = pneg %p3026_p12  ;;  %p3033_p2 = por %p3032_p10, %p3031_p7 }
  0x3f   : > { %p3034_p6 = pnand %p3033_p2, %p3027_p1 }
  0x41   : > { %3037 = shalt.err (!%p3034_p6)
}
  0x42   : > { %s3038_s17 = scalar_lea.vmem %s3424_s14, 2048  ;;  %s3240_s18 = smov [#allocation5]  }
  0x43   : > { %p3039_p11 = scmp.ne.s32.totalorder %s3424_s14, %s3038_s17  ;;  %s3042_s23 = sshll.u32 %s3240_s18, 4  ;;  %s3043_s23 = int_to_ptr.vmem [resolvable:$false] %s3042_s23 }
  0x44   : > { %s3044_s10 = scalar_lea.vmem %s3043_s23, 4096  ;;  %p3045_p0 = scmp.lt.s32.totalorder %s3424_s14, %s3043_s23 }
  0x45   : > { %p3040_p12 = pnand %p3039_p11, %p3362_p3  ;;  %p3046_p8 = scmp.lt.s32.totalorder %s3044_s10, %s3038_s17 }
  0x47   : > { %p3041_p9 = pneg %p3040_p12  ;;  %p3047_p4 = por %p3046_p8, %p3045_p0 }
  0x49   : > { %p3048_p5 = pnand %p3047_p4, %p3041_p9 }
  0x4b   : > { %3051 = shalt.err (!%p3048_p5)
}
  0x4c   : > { %s3241_s8 = smov 1024   ;;  %s3242_s30 = smov 512  }
  0x4d   : > { %s3243_s21 = smov 32   ;;  %217 = sbr.rel (!%p3388_p13) target bundleno = 85 (0x55), region = 28 }
  0x4e   : > { %2875 = dma.hbm_to_vmem [thread:$0]  (%p3362_p3), %s3422_s29, 2048, %s3424_s14, %s3426_s15, %s3241_s8, %s3242_s30, %s3243_s21  }
  0x4f   : > { %s219_s12 = sand.u32 (%p3388_p13), 1, %s3202_s20   ;;  %s2839_s6 = sshll.u32 (%p3388_p13), %s3230_s27, 2 }
  0x50   : > { %s2743_s17 = sshll.u32 (%p3388_p13), %s219_s12, 4  ;;  %s224_s18 = sadd.s32 (%p3388_p13), %s3226_s26, %s2839_s6 }
  0x51   : > { %s2746_s23 = sshll.u32 (%p3388_p13), %s224_s18, 3  ;;  %s221_s13 = scalar_lea.vmem (%p3388_p13), [#allocation8], %s2743_s17 }
  0x52   : > { %s226_s4 = scalar_lea.vmem (%p3388_p13), %s5125_s2, %s2746_s23 }
  0x53   : > { %v256_v0 = vld [vmem:[%s226_s4] sm:$0xff] (%p3388_p13)  ;;  %v258_v1 = vld [vmem:[%s226_s4 + $0x10] sm:$0xff] (%p3388_p13) }
  0x54   : > { %257 = vst [vmem:[%s221_s13] sm:$0xff] %v256_v0  ;;  %259 = vst [vmem:[%s221_s13 + $0x8] sm:$0xff] %v258_v1 }
  0x55 PF: > { %p2747_p3 = scmp.ge.s32.totalorder %s3234_s28, 1  ;;  %p264_p8 = scmp.lt.s32.totalorder %s3234_s28, 5 }
  0x57   : > { %p265_p13 = pnand %p2747_p3, %p264_p8 }
  0x58   : > { %s270_s15 = sand.u32 (!%p265_p13), 1, %s3210_s22   ;;  %p5186_p0 = scmp.ne.s32.totalorder (!%p265_p13), %s5174_s11, 0 }
  0x59   : > { %268 = sbr.rel (%p265_p13) target bundleno = 9332 (0x2474), region = 66  ;;  %s2748_s9 = sshll.u32 (!%p265_p13), %s270_s15, 7 }
  0x5a   : > { %s271_s7 = scalar_lea.sflag (!%p265_p13), [#allocation6], %s270_s15  ;;  %s3461_s1 = scalar_lea.vmem (!%p265_p13), [#allocation5], %s2748_s9 }
  0x60   : > { %3169 = dma.done.wait (%p5186_p0), %s271_s7, 2048  }
  0x61   : > { %3171 = vsyncadd (%p5186_p0), %s271_s7, 4294965248  ;;  %s317_s4 = sand.u32 1, %s3186_s16   ;;  %s2752_s29 = sshll.u32 %s3222_s25, 3  ;;  %v3244_v2 = vmov 0   ;;  %v340_v3 = vld [vmem:[%s3461_s1] sm:$0xff]  ;;  %v341_v5 = vld [vmem:[%s3461_s1 + $0x8] sm:$0xff] }
  0x62   : > { %s3471_s13 = sshll.u32 %s317_s4, 6  ;;  %501 = vmatprep.mubr.bf16.mxu0 %v3244_v2  ;;  %574 = vmatprep.mubr.bf16.mxu1 %v3244_v2  ;;  %p321_p6 = scmp.lt.s32.totalorder %s2752_s29, 15  ;;  %v344_v4 = vld [vmem:[%s3461_s1 + $0x20] sm:$0xff]  ;;  %v345_v7 = vld [vmem:[%s3461_s1 + $0x28] sm:$0xff]  ;;  %v342_v17 = vld [vmem:[%s3461_s1 + $0x10] sm:$0xff]  ;;  %vm456_vm0 = vcmask 261120  }
  0x63   : > { %v2759_v6 = vcombine.high %v340_v3, %v344_v4  ;;  %v2758_v8 = vcombine.low %v340_v3, %v344_v4  ;;  %v348_v9 = vld [vmem:[%s3461_s1 + $0x40] sm:$0xff]  ;;  %v2761_v11 = vcombine.high %v341_v5, %v345_v7  ;;  %v2760_v12 = vcombine.low %v341_v5, %v345_v7  ;;  %v349_v14 = vld [vmem:[%s3461_s1 + $0x48] sm:$0xff]  ;;  %v346_v19 = vld [vmem:[%s3461_s1 + $0x30] sm:$0xff]  ;;  %s3531_s21 = sand.u32 1, %s3198_s19   ;;  %s3923_s23 = scalar_lea.vmem [#allocation10], %s3471_s13 }
  0x64   : > { %s5274_s29 = smov (!%p321_p6, %s2752_s29), 15  ;;  %v352_v10 = vld [vmem:[%s3461_s1 + $0x60] sm:$0xff]  ;;  %v353_v15 = vld [vmem:[%s3461_s1 + $0x68] sm:$0xff]  ;;  %v343_v20 = vld [vmem:[%s3461_s1 + $0x18] sm:$0xff]  ;;  %v2763_v23 = vcombine.high %v342_v17, %v346_v19  ;;  %v2762_v29 = vcombine.low %v342_v17, %v346_v19  ;;  %s2749_s12 = sshll.u32 %s3531_s21, 4 }
  0x65   : > { %s2753_s11 = sshll.u32 %s5274_s29, 2  ;;  %v2767_v13 = vcombine.high %v348_v9, %v352_v10  ;;  %469 = vmatprep.subr.bf16.mxu0 %v2759_v6  ;;  %v2769_v16 = vcombine.high %v349_v14, %v353_v15  ;;  %542 = vmatprep.subr.bf16.mxu1 %v2761_v11  ;;  %v2766_v18 = vcombine.low %v348_v9, %v352_v10  ;;  %v347_v21 = vld [vmem:[%s3461_s1 + $0x38] sm:$0xff]  ;;  %v350_v26 = vld [vmem:[%s3461_s1 + $0x50] sm:$0xff]  ;;  %s282_s6 = scalar_lea.vmem [#allocation8], %s2749_s12 }
  0x66   : > { %s3484_s30 = scalar_lea.vmem %s5123_s0, %s2753_s11  ;;  %470 = vmatpush1.bf16.msra.mxu0 %v2758_v8  ;;  %543 = vmatpush1.bf16.msra.mxu1 %v2760_v12  ;;  %v2768_v22 = vcombine.low %v349_v14, %v353_v15  ;;  %v2765_v25 = vcombine.high %v343_v20, %v347_v21  ;;  %v354_v27 = vld [vmem:[%s3461_s1 + $0x70] sm:$0xff]  ;;  %v351_v28 = vld [vmem:[%s3461_s1 + $0x58] sm:$0xff]  ;;  %v2764_v31 = vcombine.low %v343_v20, %v347_v21  ;;  %s2750_s17 = sshll.u32 %s3531_s21, 8 }
  0x67   : > { %471 = vmatprep.subr.bf16.mxu0 %v2767_v13  ;;  %544 = vmatprep.subr.bf16.mxu1 %v2769_v16  ;;  %v3020_v24 = vld [vmem:[%s3484_s30] sm:$0xff]   ;;  %v355_v30 = vld [vmem:[%s3461_s1 + $0x78] sm:$0xff]  ;;  %v2771_v32 = vcombine.high %v350_v26, %v354_v27  ;;  %v2770_v34 = vcombine.low %v350_v26, %v354_v27  ;;  %v3021_v36 = vld [vmem:[%s3484_s30 + $0x8] sm:$0xff]   ;;  %s3635_s18 = scalar_lea.vmem [#allocation9], %s2750_s17  ;;  %p2822_p9 = scmp.ne.s32.totalorder %s3218_s24, 0 }
  0x68   : > { %v2773_v33 = vcombine.high %v351_v28, %v355_v30  ;;  %v2772_v35 = vcombine.low %v351_v28, %v355_v30  ;;  %v3022_v37 = vld [vmem:[%s3484_s30 + $0x10] sm:$0xff]   ;;  %v3023_v38 = vld [vmem:[%s3484_s30 + $0x18] sm:$0xff]  }
  0x69   : > { %v761_v39 = vld [vmem:[%s282_s6] sm:$0xff]  ;;  %v3546_v49 = vld [vmem:[%s282_s6 + $0x8] sm:$0xff] }
  0x6a   : > { %472 = vmatpush1.bf16.msra.mxu0 %v2766_v18  ;;  %545 = vmatpush1.bf16.msra.mxu1 %v2768_v22  ;;  %v3534_v40 = vunpack.c.0.s8 %v761_v39  ;;  %v3539_v44 = vunpack.c.1.s8 %v761_v39  ;;  %v3541_v45 = vunpack.c.2.s8 %v761_v39  ;;  %v3544_v48 = vunpack.c.3.s8 %v761_v39 }
  0x6b   : > { %615 = vmatprep.subr.bf16.mxu0 %v2763_v23  ;;  %688 = vmatprep.subr.bf16.mxu1 %v2765_v25  ;;  %v3561_v59 = vunpack.c.0.s8 %v3546_v49  ;;  %v3585_v12 = vunpack.c.1.s8 %v3546_v49  ;;  %v3618_v26 = vunpack.c.2.s8 %v3546_v49 }
  0x6c   : > { %v795_v41 = vshra.s32 %v3534_v40, 2  ;;  %v779_v42 = vshra.s32 %v3534_v40, 1  ;;  %v811_v43 = vshra.s32 %v3534_v40, 3  ;;  %v771_v46 = vand.u32 1, %v3534_v40 }
  0x6d   : > { %2774 = vmatmul.mubr.msk.bf16.vlgmr.msra.gmra.mrb[0].mxu0 %vm456_vm0, %v3020_v24  ;;  %2778 = vmatmul.mubr.msk.bf16.vlgmr.msra.gmra.mrb[0].mxu1 %vm456_vm0, %v3020_v24  ;;  %v796_v52 = vshra.s32 %v3539_v44, 2  ;;  %v780_v53 = vshra.s32 %v3539_v44, 1  ;;  %v812_v54 = vshra.s32 %v3539_v44, 3  ;;  %v797_v55 = vshra.s32 %v3541_v45, 2 }
  0x6e   : > { %616 = vmatpush1.bf16.msra.mxu0 %v2762_v29  ;;  %689 = vmatpush1.bf16.msra.mxu1 %v2764_v31  ;;  %v803_v47 = vand.u32 1, %v795_v41  ;;  %v787_v50 = vand.u32 1, %v779_v42  ;;  %v3548_v51 = vand.u32 1, %v811_v43  ;;  %v781_v56 = vshra.s32 %v3541_v45, 1 }
  0x6f   : > { %511 = vmatprep.mubr.bf16.mxu0 %v3244_v2  ;;  %584 = vmatprep.mubr.bf16.mxu1 %v3244_v2  ;;  %vm3555_vm1 = vcmp.ne.s32.totalorder %v771_v46, 0  ;;  %v813_v58 = vshra.s32 %v3541_v45, 3  ;;  %v772_v60 = vand.u32 1, %v3539_v44  ;;  %v798_v61 = vshra.s32 %v3544_v48, 2 }
  0x70   : > { %617 = vmatprep.subr.bf16.mxu0 %v2771_v32  ;;  %690 = vmatprep.subr.bf16.mxu1 %v2773_v33  ;;  %vm893_vm2 = vcmp.ne.s32.totalorder %v803_v47, 0  ;;  %v782_v62 = vshra.s32 %v3544_v48, 1  ;;  %vm892_vm3 = vcmp.ne.s32.totalorder %v787_v50, 0  ;;  %vm894_vm4 = vcmp.ne.s32.totalorder %v3548_v51, 0 }
  0x71   : > { %v804_v63 = vand.u32 1, %v796_v52  ;;  %v788_v0 = vand.u32 1, %v780_v53  ;;  %v3567_v1 = vand.u32 1, %v812_v54  ;;  %v3570_v3 = vand.u32 1, %v797_v55 }
  0x72   : > { %618 = vmatpush1.bf16.msra.mxu0 %v2770_v34  ;;  %691 = vmatpush1.bf16.msra.mxu1 %v2772_v35  ;;  %v3572_v4 = vand.u32 1, %v781_v56  ;;  %v3574_v5 = vand.u32 1, %v813_v58  ;;  %v774_v6 = vand.u32 1, %v3544_v48  ;;  %v814_v7 = vshra.s32 %v3544_v48, 3 }
  0x73   : > { %v799_v8 = vshra.s32 %v3561_v59, 2  ;;  %v3579_v9 = vand.u32 1, %v798_v61  ;;  %v3581_v10 = vand.u32 1, %v782_v62  ;;  %v783_v11 = vshra.s32 %v3561_v59, 1 }
  0x74   : > { %vm3588_vm5 = vcmp.ne.s32.totalorder %v772_v60, 0  ;;  %vm901_vm6 = vcmp.ne.s32.totalorder %v804_v63, 0  ;;  %vm900_vm7 = vcmp.ne.s32.totalorder %v788_v0, 0  ;;  %v815_v14 = vshra.s32 %v3561_v59, 3 }
  0x75   : > { %2775 = vmatmul.mubr.msk.bf16.gmra.mrb[4].mxu0 %vm456_vm0, %v3021_v36  ;;  %2779 = vmatmul.mubr.msk.bf16.gmra.mrb[4].mxu1 %vm456_vm0, %v3021_v36  ;;  %vm902_vm8 = vcmp.ne.s32.totalorder %v3567_v1, 0  ;;  %vm909_vm10 = vcmp.ne.s32.totalorder %v3570_v3, 0  ;;  %vm908_vm11 = vcmp.ne.s32.totalorder %v3572_v4, 0  ;;  %vm910_vm12 = vcmp.ne.s32.totalorder %v3574_v5, 0 }
  0x76   : > { %521 = vmatprep.mubr.bf16.mxu0 %v3244_v2  ;;  %594 = vmatprep.mubr.bf16.mxu1 %v3244_v2  ;;  %vm3601_vm13 = vcmp.ne.s32.totalorder %v774_v6, 0  ;;  %v3605_v18 = vand.u32 1, %v814_v7  ;;  %v775_v19 = vand.u32 1, %v3561_v59  ;;  %v3608_v20 = vand.u32 1, %v799_v8 }
  0x77   : > { %vm917_vm14 = vcmp.ne.s32.totalorder %v3579_v9, 0  ;;  %vm916_vm15 = vcmp.ne.s32.totalorder %v3581_v10, 0  ;;  %v800_v25 = vshra.s32 %v3585_v12, 2  ;;  %v3622_v31 = vand.u32 1, %v815_v14 }
  0x78   : > { %v784_v32 = vshra.s32 %v3585_v12, 1  ;;  %v776_v46 = vand.u32 1, %v3585_v12  ;;  %v801_v51 = vshra.s32 %v3618_v26, 2  ;;  %v3642_v52 = vunpack.c.3.s8 %v3546_v49 }
  0x79   : > { %v785_v54 = vshra.s32 %v3618_v26, 1  ;;  %v817_v55 = vshra.s32 %v3618_v26, 3  ;;  %v3655_v49 = vand.u32 1, %v800_v25  ;;  %v777_v1 = vand.u32 1, %v3618_v26 }
  0x7a   : > { %v3663_v60 = vand.u32 1, %v784_v32  ;;  %v802_v6 = vshra.s32 %v3642_v52, 2  ;;  %v786_v4 = vshra.s32 %v3642_v52, 1  ;;  %v778_v9 = vand.u32 1, %v3642_v52 }
  0x7b   : > { %v3677_v14 = vand.u32 1, %v785_v54  ;;  %v3679_v15 = vand.u32 1, %v817_v55  ;;  %v827_v10 = vshra.s32 %v3534_v40, 4  ;;  %v859_v32 = vshra.s32 %v3534_v40, 6 }
  0x7d   : > { %2776 = vmatmul.mubr.msk.bf16.gmra.mrb[8].mxu0 %vm456_vm0, %v3022_v37  ;;  %2780 = vmatmul.mubr.msk.bf16.gmra.mrb[8].mxu1 %vm456_vm0, %v3022_v37  ;;  %v3730_v54 = vand.u32 1, %v859_v32 }
  0x7e   : > { %531 = vmatprep.mubr.bf16.mxu0 %v3244_v2  ;;  %604 = vmatprep.mubr.bf16.mxu1 %v3244_v2 }
  0x85   : > { %2777 = vmatmul.mubr.msk.bf16.gmra.mrb[12].mxu0 %vm456_vm0, %v3023_v38  ;;  %2781 = vmatmul.mubr.msk.bf16.gmra.mrb[12].mxu1 %vm456_vm0, %v3023_v38 }
  0x86   : > { %647 = vmatprep.mubr.bf16.mxu0 %v3244_v2  ;;  %720 = vmatprep.mubr.bf16.mxu1 %v3244_v2 }
  0x8d   : > { %2782 = vmatmul.mubr.msk.bf16.vlgmr.msra.gmra.mrb[16].mxu0 %vm456_vm0, %v3020_v24  ;;  %2786 = vmatmul.mubr.msk.bf16.vlgmr.msra.gmra.mrb[16].mxu1 %vm456_vm0, %v3020_v24  ;;  %v3614_v24 = vand.u32 1, %v783_v11 }
  0x8e   : > { %657 = vmatprep.mubr.bf16.mxu0 %v3244_v2  ;;  %730 = vmatprep.mubr.bf16.mxu1 %v3244_v2 }
  0x95   : > { %2783 = vmatmul.mubr.msk.bf16.gmra.mrb[20].mxu0 %vm456_vm0, %v3021_v36  ;;  %2787 = vmatmul.mubr.msk.bf16.gmra.mrb[20].mxu1 %vm456_vm0, %v3021_v36 }
  0x96   : > { %667 = vmatprep.mubr.bf16.mxu0 %v3244_v2  ;;  %740 = vmatprep.mubr.bf16.mxu1 %v3244_v2 }
  0x9d   : > { %2784 = vmatmul.mubr.msk.bf16.gmra.mrb[24].mxu0 %vm456_vm0, %v3022_v37  ;;  %2788 = vmatmul.mubr.msk.bf16.gmra.mrb[24].mxu1 %vm456_vm0, %v3022_v37 }
  0x9e   : > { %677 = vmatprep.mubr.bf16.mxu0 %v3244_v2  ;;  %750 = vmatprep.mubr.bf16.mxu1 %v3244_v2  ;;  %v773_v2 = vand.u32 1, %v3541_v45 }
  0xa0   : > { %vm3594_vm9 = vcmp.ne.s32.totalorder %v773_v2, 0  ;;  %v3670_v2 = vand.u32 1, %v801_v51 }
  0xa5   : > { %2785 = vmatmul.mubr.msk.bf16.gmra.mrb[28].mxu0 %vm456_vm0, %v3023_v38  ;;  %2789 = vmatmul.mubr.msk.bf16.gmra.mrb[28].mxu1 %vm456_vm0, %v3023_v38  ;;  %v816_v38 = vshra.s32 %v3585_v12, 3  ;;  %vm918_vm0 = vcmp.ne.s32.totalorder %v3605_v18, 0  ;;  %v3707_v18 = vand.u32 1, %v802_v6 }
  0xa7   : > { %v3665_v61 = vand.u32 1, %v816_v38 }
 0x140   : > { %v503_v16 = vpop.f32.mrb[0].mxu0  ;;  %v576_v22 = vpop.f32.mrb[0].mxu1 }
 0x141   : > { %v955_v21 = vsel %vm3555_vm1, -10000.0, %v503_v16  ;;  %v505_v23 = vpop.f32.mrb[1].mxu0  ;;  %v957_v27 = vsel %vm893_vm2, -10000.0, %v576_v22  ;;  %v578_v29 = vpop.f32.mrb[1].mxu1  ;;  %vm3649_vm1 = vcmp.ne.s32.totalorder %v775_v19, 0  ;;  %vm925_vm2 = vcmp.ne.s32.totalorder %v3608_v20, 0 }
 0x142   : > { %1243 = vst [vmem:[#allocation2] sm:$0xff] %v955_v21  ;;  %v956_v28 = vsel %vm892_vm3, -10000.0, %v505_v23  ;;  %v507_v30 = vpop.f32.mrb[2].mxu0  ;;  %1245 = vst [vmem:[#allocation2 + $0x10] sm:$0xff] %v957_v27  ;;  %v958_v34 = vsel %vm894_vm4, -10000.0, %v578_v29  ;;  %v580_v36 = vpop.f32.mrb[2].mxu1 }
 0x143   : > { %v2840_v33 = vpack.c.bf16 %v956_v28, %v955_v21  ;;  %1244 = vst [vmem:[#allocation2 + $0x8] sm:$0xff] %v956_v28  ;;  %v963_v35 = vsel %vm3588_vm5, -10000.0, %v507_v30  ;;  %v509_v37 = vpop.f32.mrb[3].mxu0  ;;  %v2841_v39 = vpack.c.bf16 %v958_v34, %v957_v27  ;;  %1246 = vst [vmem:[#allocation2 + $0x18] sm:$0xff] %v958_v34  ;;  %v965_v41 = vsel %vm901_vm6, -10000.0, %v580_v36  ;;  %v582_v43 = vpop.f32.mrb[3].mxu1 }
 0x144   : > { %1251 = vst [vmem:[#allocation2 + $0x40] sm:$0xff] %v963_v35  ;;  %v964_v42 = vsel %vm900_vm7, -10000.0, %v509_v37  ;;  %1253 = vst [vmem:[#allocation2 + $0x50] sm:$0xff] %v965_v41  ;;  %v966_v50 = vsel %vm902_vm8, -10000.0, %v582_v43  ;;  %vm924_vm3 = vcmp.ne.s32.totalorder %v3614_v24, 0  ;;  %vm926_vm4 = vcmp.ne.s32.totalorder %v3622_v31, 0 }
 0x145   : > { %1211 = vst [vmem:[%s3635_s18] sm:$0xff] %v2840_v33  ;;  %v2844_v47 = vpack.c.bf16 %v964_v42, %v963_v35  ;;  %1252 = vst [vmem:[#allocation2 + $0x48] sm:$0xff] %v964_v42  ;;  %v2845_v53 = vpack.c.bf16 %v966_v50, %v965_v41  ;;  %vm3659_vm5 = vcmp.ne.s32.totalorder %v776_v46, 0  ;;  %v818_v28 = vshra.s32 %v3642_v52, 3 }
 0x146   : > { %1212 = vst [vmem:[%s3635_s18 + $0x8] sm:$0xff] %v2841_v39  ;;  %1254 = vst [vmem:[#allocation2 + $0x58] sm:$0xff] %v966_v50  ;;  %vm933_vm6 = vcmp.ne.s32.totalorder %v3655_v49, 0  ;;  %vm932_vm7 = vcmp.ne.s32.totalorder %v3663_v60, 0  ;;  %vm934_vm8 = vcmp.ne.s32.totalorder %v3665_v61, 0  ;;  %v3712_v35 = vand.u32 1, %v786_v4 }
 0x147   : > { %1215 = vst [vmem:[%s3635_s18 + $0x20] sm:$0xff] %v2844_v47  ;;  %1216 = vst [vmem:[%s3635_s18 + $0x28] sm:$0xff] %v2845_v53  ;;  %v3714_v36 = vand.u32 1, %v818_v28  ;;  %v843_v42 = vshra.s32 %v3534_v40, 5  ;;  %v875_v43 = vshra.s32 %v3534_v40, 7  ;;  %v3728_v53 = vand.u32 1, %v827_v10 }
 0x148   : > { %v513_v57 = vpop.f32.mrb[4].mxu0  ;;  %v586_v63 = vpop.f32.mrb[4].mxu1  ;;  %v828_v24 = vshra.s32 %v3539_v44, 4  ;;  %v876_v49 = vshra.s32 %v3539_v44, 7  ;;  %v829_v60 = vshra.s32 %v3541_v45, 4 }
 0x149   : > { %v971_v62 = vsel %vm3594_vm9, -10000.0, %v513_v57  ;;  %v515_v0 = vpop.f32.mrb[5].mxu0  ;;  %v973_v7 = vsel %vm909_vm10, -10000.0, %v586_v63  ;;  %v588_v11 = vpop.f32.mrb[5].mxu1  ;;  %vm3702_vm9 = vcmp.ne.s32.totalorder %v777_v1, 0  ;;  %vm941_vm10 = vcmp.ne.s32.totalorder %v3670_v2, 0 }
 0x14a   : > { %1259 = vst [vmem:[#allocation2 + $0x80] sm:$0xff] %v971_v62  ;;  %v972_v8 = vsel %vm908_vm11, -10000.0, %v515_v0  ;;  %v517_v13 = vpop.f32.mrb[6].mxu0  ;;  %1261 = vst [vmem:[#allocation2 + $0x90] sm:$0xff] %v973_v7  ;;  %v974_v19 = vsel %vm910_vm12, -10000.0, %v588_v11  ;;  %v590_v21 = vpop.f32.mrb[6].mxu1 }
 0x14b   : > { %v2848_v16 = vpack.c.bf16 %v972_v8, %v971_v62  ;;  %1260 = vst [vmem:[#allocation2 + $0x88] sm:$0xff] %v972_v8  ;;  %v979_v3 = vsel %vm3601_vm13, -10000.0, %v517_v13  ;;  %v519_v22 = vpop.f32.mrb[7].mxu0  ;;  %v2849_v23 = vpack.c.bf16 %v974_v19, %v973_v7  ;;  %1262 = vst [vmem:[#allocation2 + $0x98] sm:$0xff] %v974_v19  ;;  %v981_v25 = vsel %vm917_vm14, -10000.0, %v590_v21  ;;  %v592_v5 = vpop.f32.mrb[7].mxu1 }
 0x14c   : > { %1267 = vst [vmem:[#allocation2 + $0xc0] sm:$0xff] %v979_v3  ;;  %v980_v27 = vsel %vm916_vm15, -10000.0, %v519_v22  ;;  %1269 = vst [vmem:[#allocation2 + $0xd0] sm:$0xff] %v981_v25  ;;  %v982_v29 = vsel %vm918_vm0, -10000.0, %v592_v5  ;;  %vm940_vm11 = vcmp.ne.s32.totalorder %v3677_v14, 0  ;;  %vm942_vm12 = vcmp.ne.s32.totalorder %v3679_v15, 0 }
 0x14d   : > { %1219 = vst [vmem:[%s3635_s18 + $0x40] sm:$0xff] %v2848_v16  ;;  %v2852_v17 = vpack.c.bf16 %v980_v27, %v979_v3  ;;  %1268 = vst [vmem:[#allocation2 + $0xc8] sm:$0xff] %v980_v27  ;;  %v2853_v30 = vpack.c.bf16 %v982_v29, %v981_v25  ;;  %vm3718_vm13 = vcmp.ne.s32.totalorder %v778_v9, 0  ;;  %v860_v1 = vshra.s32 %v3539_v44, 6 }
 0x14e   : > { %1220 = vst [vmem:[%s3635_s18 + $0x48] sm:$0xff] %v2849_v23  ;;  %1270 = vst [vmem:[#allocation2 + $0xd8] sm:$0xff] %v982_v29  ;;  %v844_v7 = vshra.s32 %v3539_v44, 5  ;;  %vm949_vm14 = vcmp.ne.s32.totalorder %v3707_v18, 0  ;;  %vm948_vm15 = vcmp.ne.s32.totalorder %v3712_v35, 0  ;;  %vm950_vm0 = vcmp.ne.s32.totalorder %v3714_v36, 0 }
 0x14f   : > { %1223 = vst [vmem:[%s3635_s18 + $0x60] sm:$0xff] %v2852_v17  ;;  %1224 = vst [vmem:[%s3635_s18 + $0x68] sm:$0xff] %v2853_v30  ;;  %v3753_v11 = vand.u32 1, %v843_v42  ;;  %v3755_v61 = vand.u32 1, %v875_v43  ;;  %v861_v13 = vshra.s32 %v3541_v45, 6  ;;  %v3761_v16 = vand.u32 1, %v828_v24 }
 0x150   : > { %v523_v34 = vpop.f32.mrb[8].mxu0  ;;  %v596_v38 = vpop.f32.mrb[8].mxu1  ;;  %v3763_v19 = vand.u32 1, %v860_v1  ;;  %v3767_v4 = vand.u32 1, %v844_v7  ;;  %v3769_v23 = vand.u32 1, %v876_v49  ;;  %v845_v25 = vshra.s32 %v3541_v45, 5 }
 0x151   : > { %v987_v37 = vsel %vm3649_vm1, -10000.0, %v523_v34  ;;  %v525_v39 = vpop.f32.mrb[9].mxu0  ;;  %v989_v46 = vsel %vm925_vm2, -10000.0, %v596_v38  ;;  %v598_v50 = vpop.f32.mrb[9].mxu1  ;;  %vm895_vm1 = vcmp.ne.s32.totalorder %v3728_v53, 0  ;;  %vm897_vm2 = vcmp.ne.s32.totalorder %v3730_v54, 0 }
 0x152   : > { %1275 = vst [vmem:[#allocation2 + $0x100] sm:$0xff] %v987_v37  ;;  %v988_v47 = vsel %vm924_vm3, -10000.0, %v525_v39  ;;  %v527_v51 = vpop.f32.mrb[10].mxu0  ;;  %1277 = vst [vmem:[#allocation2 + $0x110] sm:$0xff] %v989_v46  ;;  %v990_v40 = vsel %vm926_vm4, -10000.0, %v598_v50  ;;  %v600_v56 = vpop.f32.mrb[10].mxu1 }
 0x153   : > { %v2856_v55 = vpack.c.bf16 %v988_v47, %v987_v37  ;;  %1276 = vst [vmem:[#allocation2 + $0x108] sm:$0xff] %v988_v47  ;;  %v995_v20 = vsel %vm3659_vm5, -10000.0, %v527_v51  ;;  %v529_v57 = vpop.f32.mrb[11].mxu0  ;;  %v2857_v62 = vpack.c.bf16 %v990_v40, %v989_v46  ;;  %1278 = vst [vmem:[#allocation2 + $0x118] sm:$0xff] %v990_v40  ;;  %v997_v63 = vsel %vm933_vm6, -10000.0, %v600_v56  ;;  %v602_v31 = vpop.f32.mrb[11].mxu1 }
 0x154   : > { %1283 = vst [vmem:[#allocation2 + $0x140] sm:$0xff] %v995_v20  ;;  %v996_v0 = vsel %vm932_vm7, -10000.0, %v529_v57  ;;  %1285 = vst [vmem:[#allocation2 + $0x150] sm:$0xff] %v997_v63  ;;  %v998_v6 = vsel %vm934_vm8, -10000.0, %v602_v31  ;;  %v3776_v29 = vand.u32 1, %v829_v60  ;;  %v877_v9 = vshra.s32 %v3541_v45, 7 }
 0x155   : > { %1227 = vst [vmem:[%s3635_s18 + $0x80] sm:$0xff] %v2856_v55  ;;  %v2860_v58 = vpack.c.bf16 %v996_v0, %v995_v20  ;;  %1284 = vst [vmem:[#allocation2 + $0x148] sm:$0xff] %v996_v0  ;;  %v2861_v8 = vpack.c.bf16 %v998_v6, %v997_v63  ;;  %v3783_v14 = vand.u32 1, %v861_v13  ;;  %v830_v38 = vshra.s32 %v3544_v48, 4 }
 0x156   : > { %1228 = vst [vmem:[%s3635_s18 + $0x88] sm:$0xff] %v2857_v62  ;;  %1286 = vst [vmem:[#allocation2 + $0x158] sm:$0xff] %v998_v6  ;;  %v862_v42 = vshra.s32 %v3544_v48, 6  ;;  %v846_v18 = vshra.s32 %v3544_v48, 5  ;;  %vm896_vm3 = vcmp.ne.s32.totalorder %v3753_v11, 0  ;;  %vm898_vm4 = vcmp.ne.s32.totalorder %v3755_v61, 0 }
 0x157   : > { %1231 = vst [vmem:[%s3635_s18 + $0xa0] sm:$0xff] %v2860_v58  ;;  %1232 = vst [vmem:[%s3635_s18 + $0xa8] sm:$0xff] %v2861_v8  ;;  %v878_v35 = vshra.s32 %v3544_v48, 7  ;;  %vm903_vm5 = vcmp.ne.s32.totalorder %v3761_v16, 0  ;;  %vm905_vm6 = vcmp.ne.s32.totalorder %v3763_v19, 0  ;;  %vm904_vm7 = vcmp.ne.s32.totalorder %v3767_v4, 0 }
 0x158   : > { %v533_v44 = vpop.f32.mrb[12].mxu0  ;;  %v606_v21 = vpop.f32.mrb[12].mxu1  ;;  %vm906_vm8 = vcmp.ne.s32.totalorder %v3769_v23, 0  ;;  %v3807_v46 = vand.u32 1, %v845_v25  ;;  %v3809_v47 = vand.u32 1, %v877_v9  ;;  %v3813_v55 = vand.u32 1, %v830_v38 }
 0x159   : > { %v1003_v3 = vsel %vm3702_vm9, -10000.0, %v533_v44  ;;  %v535_v22 = vpop.f32.mrb[13].mxu0  ;;  %v1005_v27 = vsel %vm941_vm10, -10000.0, %v606_v21  ;;  %v608_v28 = vpop.f32.mrb[13].mxu1  ;;  %vm911_vm9 = vcmp.ne.s32.totalorder %v3776_v29, 0  ;;  %vm913_vm10 = vcmp.ne.s32.totalorder %v3783_v14, 0 }
 0x15a   : > { %1291 = vst [vmem:[#allocation2 + $0x180] sm:$0xff] %v1003_v3  ;;  %v1004_v5 = vsel %vm940_vm11, -10000.0, %v535_v22  ;;  %v537_v17 = vpop.f32.mrb[14].mxu0  ;;  %1293 = vst [vmem:[#allocation2 + $0x190] sm:$0xff] %v1005_v27  ;;  %v1006_v10 = vsel %vm942_vm12, -10000.0, %v608_v28  ;;  %v610_v32 = vpop.f32.mrb[14].mxu1 }
 0x15b   : > { %v2864_v30 = vpack.c.bf16 %v1004_v5, %v1003_v3  ;;  %1292 = vst [vmem:[#allocation2 + $0x188] sm:$0xff] %v1004_v5  ;;  %v1011_v2 = vsel %vm3718_vm13, -10000.0, %v537_v17  ;;  %v539_v33 = vpop.f32.mrb[15].mxu0  ;;  %v2865_v34 = vpack.c.bf16 %v1006_v10, %v1005_v27  ;;  %1294 = vst [vmem:[#allocation2 + $0x198] sm:$0xff] %v1006_v10  ;;  %v1013_v45 = vsel %vm949_vm14, -10000.0, %v610_v32  ;;  %v612_v15 = vpop.f32.mrb[15].mxu1 }
 0x15c   : > { %1299 = vst [vmem:[#allocation2 + $0x1c0] sm:$0xff] %v1011_v2  ;;  %v1012_v37 = vsel %vm948_vm15, -10000.0, %v539_v33  ;;  %1301 = vst [vmem:[#allocation2 + $0x1d0] sm:$0xff] %v1013_v45  ;;  %v1014_v41 = vsel %vm950_vm0, -10000.0, %v612_v15  ;;  %v3815_v40 = vand.u32 1, %v862_v42  ;;  %v3817_v20 = vand.u32 1, %v846_v18 }
 0x15d   : > { %1235 = vst [vmem:[%s3635_s18 + $0xc0] sm:$0xff] %v2864_v30  ;;  %v2868_v39 = vpack.c.bf16 %v1012_v37, %v1011_v2  ;;  %1300 = vst [vmem:[#allocation2 + $0x1c8] sm:$0xff] %v1012_v37  ;;  %v2869_v43 = vpack.c.bf16 %v1014_v41, %v1013_v45  ;;  %v3823_v63 = vand.u32 1, %v878_v35  ;;  %v831_v53 = vshra.s32 %v3561_v59, 4 }
 0x15e   : > { %1236 = vst [vmem:[%s3635_s18 + $0xc8] sm:$0xff] %v2865_v34  ;;  %1302 = vst [vmem:[#allocation2 + $0x1d8] sm:$0xff] %v1014_v41  ;;  %v863_v6 = vshra.s32 %v3561_v59, 6  ;;  %v847_v11 = vshra.s32 %v3561_v59, 5  ;;  %v879_v44 = vshra.s32 %v3561_v59, 7  ;;  %v832_v16 = vshra.s32 %v3585_v12, 4 }
 0x15f   : > { %1239 = vst [vmem:[%s3635_s18 + $0xe0] sm:$0xff] %v2868_v39  ;;  %1240 = vst [vmem:[%s3635_s18 + $0xe8] sm:$0xff] %v2869_v43  ;;  %vm912_vm11 = vcmp.ne.s32.totalorder %v3807_v46, 0  ;;  %v864_v3 = vshra.s32 %v3585_v12, 6  ;;  %v848_v21 = vshra.s32 %v3585_v12, 5  ;;  %vm914_vm12 = vcmp.ne.s32.totalorder %v3809_v47, 0 }
 0x160   : > { %v649_v36 = vpop.f32.mrb[16].mxu0  ;;  %v722_v50 = vpop.f32.mrb[16].mxu1  ;;  %vm919_vm13 = vcmp.ne.s32.totalorder %v3813_v55, 0  ;;  %vm921_vm14 = vcmp.ne.s32.totalorder %v3815_v40, 0  ;;  %v880_v59 = vshra.s32 %v3585_v12, 7  ;;  %vm920_vm15 = vcmp.ne.s32.totalorder %v3817_v20, 0 }
 0x161   : > { %v959_v48 = vsel %vm895_vm1, -10000.0, %v649_v36  ;;  %v651_v51 = vpop.f32.mrb[17].mxu0  ;;  %v961_v56 = vsel %vm897_vm2, -10000.0, %v722_v50  ;;  %v724_v24 = vpop.f32.mrb[17].mxu1  ;;  %vm922_vm0 = vcmp.ne.s32.totalorder %v3823_v63, 0  ;;  %v839_v4 = vand.u32 1, %v831_v53 }
 0x162   : > { %1247 = vst [vmem:[#allocation2 + $0x20] sm:$0xff] %v959_v48  ;;  %v960_v57 = vsel %vm896_vm3, -10000.0, %v651_v51  ;;  %v653_v62 = vpop.f32.mrb[18].mxu0  ;;  %1249 = vst [vmem:[#allocation2 + $0x30] sm:$0xff] %v961_v56  ;;  %v962_v31 = vsel %vm898_vm4, -10000.0, %v724_v24  ;;  %v726_v1 = vpop.f32.mrb[18].mxu1 }
 0x163   : > { %v2842_v0 = vpack.c.bf16 %v960_v57, %v959_v48  ;;  %1248 = vst [vmem:[#allocation2 + $0x28] sm:$0xff] %v960_v57  ;;  %v967_v54 = vsel %vm903_vm5, -10000.0, %v653_v62  ;;  %v655_v58 = vpop.f32.mrb[19].mxu0  ;;  %v2843_v7 = vpack.c.bf16 %v962_v31, %v961_v56  ;;  %1250 = vst [vmem:[#allocation2 + $0x38] sm:$0xff] %v962_v31  ;;  %v969_v49 = vsel %vm905_vm6, -10000.0, %v726_v1  ;;  %v728_v60 = vpop.f32.mrb[19].mxu1 }
 0x164   : > { %1255 = vst [vmem:[#allocation2 + $0x60] sm:$0xff] %v967_v54  ;;  %v968_v8 = vsel %vm904_vm7, -10000.0, %v655_v58  ;;  %1257 = vst [vmem:[#allocation2 + $0x70] sm:$0xff] %v969_v49  ;;  %v970_v13 = vsel %vm906_vm8, -10000.0, %v728_v60  ;;  %v871_v23 = vand.u32 1, %v863_v6  ;;  %v855_v28 = vand.u32 1, %v847_v11 }
 0x165   : > { %1213 = vst [vmem:[%s3635_s18 + $0x10] sm:$0xff] %v2842_v0  ;;  %v2846_v61 = vpack.c.bf16 %v968_v8, %v967_v54  ;;  %1256 = vst [vmem:[#allocation2 + $0x68] sm:$0xff] %v968_v8  ;;  %v2847_v19 = vpack.c.bf16 %v970_v13, %v969_v49  ;;  %v3855_v17 = vand.u32 1, %v879_v44  ;;  %v3857_v9 = vand.u32 1, %v832_v16 }
 0x166   : > { %1214 = vst [vmem:[%s3635_s18 + $0x18] sm:$0xff] %v2843_v7  ;;  %1258 = vst [vmem:[#allocation2 + $0x78] sm:$0xff] %v970_v13  ;;  %v3863_v32 = vand.u32 1, %v864_v3  ;;  %v3865_v29 = vand.u32 1, %v848_v21  ;;  %v3871_v15 = vand.u32 1, %v880_v59  ;;  %v833_v18 = vshra.s32 %v3618_v26, 4 }
 0x167   : > { %1217 = vst [vmem:[%s3635_s18 + $0x30] sm:$0xff] %v2846_v61  ;;  %1218 = vst [vmem:[%s3635_s18 + $0x38] sm:$0xff] %v2847_v19  ;;  %vm927_vm1 = vcmp.ne.s32.totalorder %v839_v4, 0  ;;  %v865_v36 = vshra.s32 %v3618_v26, 6  ;;  %vm929_vm2 = vcmp.ne.s32.totalorder %v871_v23, 0  ;;  %vm928_vm3 = vcmp.ne.s32.totalorder %v855_v28, 0 }
 0x168   : > { %v659_v22 = vpop.f32.mrb[20].mxu0  ;;  %v732_v27 = vpop.f32.mrb[20].mxu1  ;;  %v849_v47 = vshra.s32 %v3618_v26, 5  ;;  %vm930_vm4 = vcmp.ne.s32.totalorder %v3855_v17, 0  ;;  %vm935_vm5 = vcmp.ne.s32.totalorder %v3857_v9, 0  ;;  %vm937_vm6 = vcmp.ne.s32.totalorder %v3863_v32, 0 }
 0x169   : > { %v975_v25 = vsel %vm911_vm9, -10000.0, %v659_v22  ;;  %v661_v5 = vpop.f32.mrb[21].mxu0  ;;  %v977_v12 = vsel %vm913_vm10, -10000.0, %v732_v27  ;;  %v734_v10 = vpop.f32.mrb[21].mxu1  ;;  %v881_v48 = vshra.s32 %v3618_v26, 7  ;;  %vm936_vm7 = vcmp.ne.s32.totalorder %v3865_v29, 0 }
 0x16a   : > { %1263 = vst [vmem:[#allocation2 + $0xa0] sm:$0xff] %v975_v25  ;;  %v976_v30 = vsel %vm912_vm11, -10000.0, %v661_v5  ;;  %v663_v2 = vpop.f32.mrb[22].mxu0  ;;  %1265 = vst [vmem:[#allocation2 + $0xb0] sm:$0xff] %v977_v12  ;;  %v978_v34 = vsel %vm914_vm12, -10000.0, %v734_v10  ;;  %v736_v45 = vpop.f32.mrb[22].mxu1 }
 0x16b   : > { %v2850_v33 = vpack.c.bf16 %v976_v30, %v975_v25  ;;  %1264 = vst [vmem:[#allocation2 + $0xa8] sm:$0xff] %v976_v30  ;;  %v983_v14 = vsel %vm919_vm13, -10000.0, %v663_v2  ;;  %v665_v37 = vpop.f32.mrb[23].mxu0  ;;  %v2851_v38 = vpack.c.bf16 %v978_v34, %v977_v12  ;;  %1266 = vst [vmem:[#allocation2 + $0xb8] sm:$0xff] %v978_v34  ;;  %v985_v39 = vsel %vm921_vm14, -10000.0, %v736_v45  ;;  %v738_v42 = vpop.f32.mrb[23].mxu1 }
 0x16c   : > { %1271 = vst [vmem:[#allocation2 + $0xe0] sm:$0xff] %v983_v14  ;;  %v984_v41 = vsel %vm920_vm15, -10000.0, %v665_v37  ;;  %1273 = vst [vmem:[#allocation2 + $0xf0] sm:$0xff] %v985_v39  ;;  %v986_v35 = vsel %vm922_vm0, -10000.0, %v738_v42  ;;  %vm938_vm8 = vcmp.ne.s32.totalorder %v3871_v15, 0  ;;  %v841_v51 = vand.u32 1, %v833_v18 }
 0x16d   : > { %1221 = vst [vmem:[%s3635_s18 + $0x50] sm:$0xff] %v2850_v33  ;;  %v2854_v43 = vpack.c.bf16 %v984_v41, %v983_v14  ;;  %1272 = vst [vmem:[#allocation2 + $0xe8] sm:$0xff] %v984_v41  ;;  %v2855_v46 = vpack.c.bf16 %v986_v35, %v985_v39  ;;  %v834_v55 = vshra.s32 %v3642_v52, 4  ;;  %v873_v57 = vand.u32 1, %v865_v36 }
 0x16e   : > { %1222 = vst [vmem:[%s3635_s18 + $0x58] sm:$0xff] %v2851_v38  ;;  %1274 = vst [vmem:[#allocation2 + $0xf8] sm:$0xff] %v986_v35  ;;  %v866_v24 = vshra.s32 %v3642_v52, 6  ;;  %v850_v62 = vshra.s32 %v3642_v52, 5  ;;  %v857_v31 = vand.u32 1, %v849_v47  ;;  %v882_v54 = vshra.s32 %v3642_v52, 7 }
 0x16f   : > { %1225 = vst [vmem:[%s3635_s18 + $0x70] sm:$0xff] %v2854_v43  ;;  %1226 = vst [vmem:[%s3635_s18 + $0x78] sm:$0xff] %v2855_v46  ;;  %v889_v8 = vand.u32 1, %v881_v48  ;;  %v842_v13 = vand.u32 1, %v834_v55  ;;  %vm943_vm9 = vcmp.ne.s32.totalorder %v841_v51, 0  ;;  %vm945_vm10 = vcmp.ne.s32.totalorder %v873_v57, 0 }
 0x170   : > { %v669_v50 = vpop.f32.mrb[24].mxu0  ;;  %v742_v20 = vpop.f32.mrb[24].mxu1  ;;  %v874_v19 = vand.u32 1, %v866_v24  ;;  %v858_v3 = vand.u32 1, %v850_v62  ;;  %v890_v59 = vand.u32 1, %v882_v54  ;;  %vm944_vm11 = vcmp.ne.s32.totalorder %v857_v31, 0 }
 0x171   : > { %v991_v40 = vsel %vm927_vm1, -10000.0, %v669_v50  ;;  %v671_v56 = vpop.f32.mrb[25].mxu0  ;;  %v993_v26 = vsel %vm929_vm2, -10000.0, %v742_v20  ;;  %v744_v53 = vpop.f32.mrb[25].mxu1  ;;  %vm946_vm12 = vcmp.ne.s32.totalorder %v889_v8, 0  ;;  %vm951_vm13 = vcmp.ne.s32.totalorder %v842_v13, 0 }
 0x172   : > { %1279 = vst [vmem:[#allocation2 + $0x120] sm:$0xff] %v991_v40  ;;  %v992_v63 = vsel %vm928_vm3, -10000.0, %v671_v56  ;;  %v673_v0 = vpop.f32.mrb[26].mxu0  ;;  %1281 = vst [vmem:[#allocation2 + $0x130] sm:$0xff] %v993_v26  ;;  %v994_v58 = vsel %vm930_vm4, -10000.0, %v744_v53  ;;  %v746_v7 = vpop.f32.mrb[26].mxu1 }
 0x173   : > { %v2858_v1 = vpack.c.bf16 %v992_v63, %v991_v40  ;;  %1280 = vst [vmem:[#allocation2 + $0x128] sm:$0xff] %v992_v63  ;;  %v999_v6 = vsel %vm935_vm5, -10000.0, %v673_v0  ;;  %v675_v49 = vpop.f32.mrb[27].mxu0  ;;  %v2859_v60 = vpack.c.bf16 %v994_v58, %v993_v26  ;;  %1282 = vst [vmem:[#allocation2 + $0x138] sm:$0xff] %v994_v58  ;;  %v1001_v52 = vsel %vm937_vm6, -10000.0, %v746_v7  ;;  %v748_v61 = vpop.f32.mrb[27].mxu1 }
 0x174   : > { %1287 = vst [vmem:[#allocation2 + $0x160] sm:$0xff] %v999_v6  ;;  %v1000_v11 = vsel %vm936_vm7, -10000.0, %v675_v49  ;;  %1289 = vst [vmem:[#allocation2 + $0x170] sm:$0xff] %v1001_v52  ;;  %v1002_v16 = vsel %vm938_vm8, -10000.0, %v748_v61  ;;  %vm953_vm14 = vcmp.ne.s32.totalorder %v874_v19, 0  ;;  %vm952_vm15 = vcmp.ne.s32.totalorder %v858_v3, 0 }
 0x175   : > { %1229 = vst [vmem:[%s3635_s18 + $0x90] sm:$0xff] %v2858_v1  ;;  %v2862_v44 = vpack.c.bf16 %v1000_v11, %v999_v6  ;;  %1288 = vst [vmem:[#allocation2 + $0x168] sm:$0xff] %v1000_v11  ;;  %v2863_v21 = vpack.c.bf16 %v1002_v16, %v1001_v52  ;;  %vm954_vm0 = vcmp.ne.s32.totalorder %v890_v59, 0  ;;  %v3245_v15 = vmov (!%p2822_p9), -1e+30  }
 0x176   : > { %1230 = vst [vmem:[%s3635_s18 + $0x98] sm:$0xff] %v2859_v60  ;;  %1290 = vst [vmem:[#allocation2 + $0x178] sm:$0xff] %v1002_v16  ;;  %v3246_v38 = vmov (!%p2822_p9), 0  }
 0x177   : > { %1233 = vst [vmem:[%s3635_s18 + $0xb0] sm:$0xff] %v2862_v44  ;;  %1234 = vst [vmem:[%s3635_s18 + $0xb8] sm:$0xff] %v2863_v21 }
 0x178   : > { %v679_v22 = vpop.f32.mrb[28].mxu0  ;;  %v752_v23 = vpop.f32.mrb[28].mxu1  ;;  %1311 = vst [vmem:[#allocation3] sm:$0xff] (!%p2822_p9), %v3245_v15  ;;  %1312 = vst [vmem:[#allocation3 + $0x8] sm:$0xff] (!%p2822_p9), %v3245_v15 }
 0x179   : > { %v1007_v4 = vsel %vm943_vm9, -10000.0, %v679_v22  ;;  %v681_v25 = vpop.f32.mrb[29].mxu0  ;;  %v1009_v27 = vsel %vm945_vm10, -10000.0, %v752_v23  ;;  %v754_v28 = vpop.f32.mrb[29].mxu1  ;;  %1310 = sbr.rel (%p2822_p9) target bundleno = 391 (0x187), region = 78  ;;  %1313 = vst [vmem:[#allocation3 + $0x10] sm:$0xff] (!%p2822_p9), %v3245_v15 }
 0x17a   : > { %1295 = vst [vmem:[#allocation2 + $0x1a0] sm:$0xff] %v1007_v4  ;;  %v1008_v5 = vsel %vm944_vm11, -10000.0, %v681_v25  ;;  %v683_v17 = vpop.f32.mrb[30].mxu0  ;;  %1297 = vst [vmem:[#allocation2 + $0x1b0] sm:$0xff] %v1009_v27  ;;  %v1010_v12 = vsel %vm946_vm12, -10000.0, %v754_v28  ;;  %v756_v10 = vpop.f32.mrb[30].mxu1 }
 0x17b   : > { %v2866_v9 = vpack.c.bf16 %v1008_v5, %v1007_v4  ;;  %1296 = vst [vmem:[#allocation2 + $0x1a8] sm:$0xff] %v1008_v5  ;;  %v1015_v30 = vsel %vm951_vm13, -10000.0, %v683_v17  ;;  %v685_v2 = vpop.f32.mrb[31].mxu0  ;;  %v2867_v32 = vpack.c.bf16 %v1010_v12, %v1009_v27  ;;  %1298 = vst [vmem:[#allocation2 + $0x1b8] sm:$0xff] %v1010_v12  ;;  %v1017_v29 = vsel %vm953_vm14, -10000.0, %v756_v10  ;;  %v758_v34 = vpop.f32.mrb[31].mxu1 }
 0x17c   : > { %1303 = vst [vmem:[#allocation2 + $0x1e0] sm:$0xff] %v1015_v30  ;;  %v1016_v33 = vsel %vm952_vm15, -10000.0, %v685_v2  ;;  %1305 = vst [vmem:[#allocation2 + $0x1f0] sm:$0xff] %v1017_v29  ;;  %v1018_v45 = vsel %vm954_vm0, -10000.0, %v758_v34 }
 0x17d   : > { %1237 = vst [vmem:[%s3635_s18 + $0xd0] sm:$0xff] %v2866_v9  ;;  %v2870_v14 = vpack.c.bf16 %v1016_v33, %v1015_v30  ;;  %1304 = vst [vmem:[#allocation2 + $0x1e8] sm:$0xff] %v1016_v33  ;;  %v2871_v37 = vpack.c.bf16 %v1018_v45, %v1017_v29 }
 0x17e   : > { %1238 = vst [vmem:[%s3635_s18 + $0xd8] sm:$0xff] %v2867_v32  ;;  %1306 = vst [vmem:[#allocation2 + $0x1f8] sm:$0xff] %v1018_v45 }
 0x17f   : > { %1241 = vst [vmem:[%s3635_s18 + $0xf0] sm:$0xff] %v2870_v14  ;;  %1242 = vst [vmem:[%s3635_s18 + $0xf8] sm:$0xff] %v2871_v37 }
 0x180   : > { %1314 = vst [vmem:[#allocation3 + $0x18] sm:$0xff] %v3245_v15  ;;  %1315 = vst [vmem:[#allocation3 + $0x20] sm:$0xff] %v3245_v15 }
 0x181   : > { %1316 = vst [vmem:[#allocation3 + $0x28] sm:$0xff] %v3245_v15  ;;  %1317 = vst [vmem:[#allocation3 + $0x30] sm:$0xff] %v3245_v15 }
 0x182   : > { %1318 = vst [vmem:[#allocation3 + $0x38] sm:$0xff] %v3245_v15  ;;  %1319 = vst [vmem:[#allocation4] sm:$0xff] %v3246_v38 }
 0x183   : > { %1320 = vst [vmem:[#allocation4 + $0x8] sm:$0xff] %v3246_v38  ;;  %1321 = vst [vmem:[#allocation4 + $0x10] sm:$0xff] %v3246_v38 }
 0x184   : > { %1322 = vst [vmem:[#allocation4 + $0x18] sm:$0xff] %v3246_v38  ;;  %1323 = vst [vmem:[#allocation4 + $0x20] sm:$0xff] %v3246_v38 }
 0x185   : > { %1324 = vst [vmem:[#allocation4 + $0x28] sm:$0xff] %v3246_v38  ;;  %1325 = vst [vmem:[#allocation4 + $0x30] sm:$0xff] %v3246_v38 }
 0x186   : > { %1326 = vst [vmem:[#allocation4 + $0x38] sm:$0xff] %v3246_v38 }
 0x187 PF: > { %v1327_v39 = vlaneseq  ;;  %s2823_s10 = sshll.u32 %s3218_s24, 10  ;;  %s3950_s15 = smov 0  }
 0x189   : > { %v3927_v41 = vand.u32 127, %v1327_v39 }
 0x18b   : > { %v3930_v42 = vadd.s32 128, %v3927_v41  ;;  %v3933_v18 = vadd.s32 256, %v3927_v41  ;;  %v3936_v43 = vadd.s32 384, %v3927_v41  ;;  %v3939_v35 = vadd.s32 512, %v3927_v41 }
 0x18c   : > { %v3942_v36 = vadd.s32 640, %v3927_v41  ;;  %v3945_v46 = vadd.s32 768, %v3927_v41  ;;  %v3948_v47 = vadd.s32 896, %v3927_v41 }
 0x18d LB: >> { %s3956_s9 = sshll.u32 %s3238_s15, 3  ;;  %s1342_s15 = sadd.s32 1, %s3238_s15   ;;  %s3238_s15 = sphi %s3950_s15, %s1342_s15  }
 0x18e   : >> { %s1344_s7 = sshra.s32 %s3956_s9, 3  ;;  %s2072_s13 = scalar_lea.vmem [#allocation3], %s3956_s9 }
 0x18f   : >> { %s2872_s1 = sshll.u32 %s1344_s7, 6  ;;  %s2074_s11 = scalar_lea.vmem [#allocation4], %s3956_s9 }
 0x190   : >> { %s1348_s29 = scalar_lea.vmem [#allocation2], %s2872_s1  ;;  %p1339_p2 = scmp.ge.s32.totalorder %s1342_s15, 8  }
 0x191   : >> { %v3959_v48 = vld [vmem:[%s1348_s29] sm:$0xff]  ;;  %v3961_v50 = vld [vmem:[%s1348_s29 + $0x8] sm:$0xff]  ;;  %v3963_v51 = vld [vmem:[%s1348_s29 + $0x10] sm:$0xff]  ;;  %p2827_p1 = scmp.ne.s32.totalorder (%p1339_p2), %s3218_s24, 1 }
 0x192   : >> { %v3965_v55 = vld [vmem:[%s1348_s29 + $0x18] sm:$0xff]  ;;  %v3967_v40 = vld [vmem:[%s1348_s29 + $0x20] sm:$0xff]  ;;  %v3969_v20 = vld [vmem:[%s1348_s29 + $0x28] sm:$0xff] }
 0x193   : >> { %v3971_v56 = vld [vmem:[%s1348_s29 + $0x30] sm:$0xff]  ;;  %v3973_v57 = vld [vmem:[%s1348_s29 + $0x38] sm:$0xff]  ;;  %v1357_v24 = vmax.f32 %v3959_v48, %v3967_v40  ;;  %v1358_v62 = vmax.f32 %v3961_v50, %v3969_v20 }
 0x194   : >> { %v1359_v26 = vmax.f32 %v3963_v51, %v3971_v56  ;;  %v1360_v63 = vmax.f32 %v3965_v55, %v3973_v57 }
 0x195   : >> { %v1361_v53 = vmax.f32 %v1357_v24, %v1358_v62 }
 0x196   : >> { %v1362_v0 = vmax.f32 %v1359_v26, %v1360_v63 }
 0x198   : >> { %v1363_v31 = vmax.f32 %v1361_v53, %v1362_v0 }
 0x19a   : >> { %1364 = vmax.xlane.f32.xlu0 %v1363_v31 }
 0x227   : >> { %v3983_v54 = vpop.xlane.xlu0 %1364 }
 0x228   : >> { %vm1366_vm1 = vcmp.eq.f32.partialorder %v3959_v48, %v3983_v54  ;;  %vm1367_vm2 = vcmp.eq.f32.partialorder %v3961_v50, %v3983_v54  ;;  %vm1368_vm3 = vcmp.eq.f32.partialorder %v3963_v51, %v3983_v54  ;;  %vm1369_vm4 = vcmp.eq.f32.partialorder %v3965_v55, %v3983_v54 }
 0x229   : >> { %vm1370_vm5 = vcmp.eq.f32.partialorder %v3967_v40, %v3983_v54  ;;  %vm1371_vm6 = vcmp.eq.f32.partialorder %v3969_v20, %v3983_v54  ;;  %vm1372_vm7 = vcmp.eq.f32.partialorder %v3971_v56, %v3983_v54  ;;  %vm1373_vm8 = vcmp.eq.f32.partialorder %v3973_v57, %v3983_v54 }
 0x22a   : >> { %v1374_v1 = vsel %vm1366_vm1, %v3927_v41, 1024  ;;  %v1375_v58 = vsel %vm1367_vm2, %v3930_v42, 1024  ;;  %v1376_v6 = vsel %vm1368_vm3, %v3933_v18, 1024  ;;  %v1377_v7 = vsel %vm1369_vm4, %v3936_v43, 1024 }
 0x22b   : >> { %v1378_v49 = vsel %vm1370_vm5, %v3939_v35, 1024  ;;  %v1379_v8 = vsel %vm1371_vm6, %v3942_v36, 1024  ;;  %v1380_v60 = vsel %vm1372_vm7, %v3945_v46, 1024  ;;  %v1381_v52 = vsel %vm1373_vm8, %v3948_v47, 1024 }
 0x22c   : >> { %vm1382_vm9 = vcmp.lt.s32.totalorder %v1374_v1, %v1378_v49  ;;  %vm1384_vm10 = vcmp.lt.s32.totalorder %v1375_v58, %v1379_v8  ;;  %vm1386_vm11 = vcmp.lt.s32.totalorder %v1376_v6, %v1380_v60  ;;  %vm1388_vm12 = vcmp.lt.s32.totalorder %v1377_v7, %v1381_v52 }
 0x22d   : >> { %v1383_v11 = vsel %vm1382_vm9, %v1374_v1, %v1378_v49  ;;  %v1385_v61 = vsel %vm1384_vm10, %v1375_v58, %v1379_v8  ;;  %v1387_v13 = vsel %vm1386_vm11, %v1376_v6, %v1380_v60  ;;  %v1389_v44 = vsel %vm1388_vm12, %v1377_v7, %v1381_v52 }
 0x22e   : >> { %vm1390_vm13 = vcmp.lt.s32.totalorder %v1383_v11, %v1385_v61  ;;  %vm1392_vm14 = vcmp.lt.s32.totalorder %v1387_v13, %v1389_v44 }
 0x22f   : >> { %v1391_v16 = vsel %vm1390_vm13, %v1383_v11, %v1385_v61  ;;  %v1393_v19 = vsel %vm1392_vm14, %v1387_v13, %v1389_v44 }
 0x230   : >> { %vm1394_vm15 = vcmp.lt.s32.totalorder %v1391_v16, %v1393_v19 }
 0x231   : >> { %v1395_v3 = vsel %vm1394_vm15, %v1391_v16, %v1393_v19  ;;  %v4087_v19 = vstv %s2823_s10 }
 0x232   : >> { %v1397_v21 = vshra.s32 %v1395_v3, 16  ;;  %v1396_v22 = vand.u32 65535, %v1395_v3 }
 0x234   : >> { %v1399_v59 = vcvt.s32.f32 %v1397_v21  ;;  %v1398_v23 = vcvt.s32.f32 %v1396_v22 }
 0x236   : >> { %1400 = vmin.xlane.f32.xlu0 %v1399_v59 }
 0x2c3   : >> { %v1401_v4 = vpop.xlane.xlu0 %1400 }
 0x2c4   : >> { %vm1402_vm0 = vcmp.eq.f32.partialorder %v1399_v59, %v1401_v4  ;;  %v1407_v27 = vcvt.f32.s32 %v1401_v4 }
 0x2c5   : >> { %v1403_v25 = vsel %vm1402_vm0, %v1398_v23, inf }
 0x2c6   : >> { %1404 = vmin.xlane.f32.xlu1 %v1403_v25  ;;  %v1408_v28 = vshll.u32 %v1407_v27, 16 }
 0x353   : >> { %v1405_v5 = vpop.xlane.xlu1 %1404 }
 0x354   : >> { %v1406_v17 = vcvt.f32.s32 %v1405_v5 }
 0x356   : >> { %v4009_v9 = vadd.s32 %v1408_v28, %v1406_v17 }
 0x358   : >> { %vm1412_vm1 = vcmp.eq.s32.totalorder %v3927_v41, %v4009_v9  ;;  %vm1413_vm2 = vcmp.eq.s32.totalorder %v3930_v42, %v4009_v9  ;;  %vm1414_vm3 = vcmp.eq.s32.totalorder %v3933_v18, %v4009_v9  ;;  %vm1415_vm4 = vcmp.eq.s32.totalorder %v3936_v43, %v4009_v9 }
 0x359   : >> { %vm1416_vm5 = vcmp.eq.s32.totalorder %v3939_v35, %v4009_v9  ;;  %vm1417_vm6 = vcmp.eq.s32.totalorder %v3942_v36, %v4009_v9  ;;  %vm1418_vm7 = vcmp.eq.s32.totalorder %v3945_v46, %v4009_v9  ;;  %vm1419_vm8 = vcmp.eq.s32.totalorder %v3948_v47, %v4009_v9 }
 0x35a   : >> { %v4028_v12 = vsel %vm1412_vm1, -1e+30, %v3959_v48  ;;  %v4031_v30 = vsel %vm1413_vm2, -1e+30, %v3961_v50  ;;  %v4034_v10 = vsel %vm1414_vm3, -1e+30, %v3963_v51  ;;  %v1411_v27 = vadd.s32 %v4087_v19, %v4009_v9 }
 0x35b   : >> { %v4037_v2 = vsel %vm1415_vm4, -1e+30, %v3965_v55  ;;  %v4040_v32 = vsel %vm1416_vm5, -1e+30, %v3967_v40  ;;  %v4043_v29 = vsel %vm1417_vm6, -1e+30, %v3969_v20 }
 0x35c   : >> { %v4046_v33 = vsel %vm1418_vm7, -1e+30, %v3971_v56  ;;  %v4049_v34 = vsel %vm1419_vm8, -1e+30, %v3973_v57  ;;  %v1428_v14 = vmax.f32 %v4028_v12, %v4040_v32  ;;  %v1429_v45 = vmax.f32 %v4031_v30, %v4043_v29 }
 0x35d   : >> { %v1430_v37 = vmax.f32 %v4034_v10, %v4046_v33  ;;  %v1431_v15 = vmax.f32 %v4037_v2, %v4049_v34 }
 0x35e   : >> { %v1432_v38 = vmax.f32 %v1428_v14, %v1429_v45 }
 0x35f   : >> { %v1433_v39 = vmax.f32 %v1430_v37, %v1431_v15 }
 0x361   : >> { %v1434_v48 = vmax.f32 %v1432_v38, %v1433_v39 }
 0x363   : >> { %1435 = vmax.xlane.f32.xlu1 %v1434_v48 }
 0x3f0   : >> { %v4059_v50 = vpop.xlane.xlu1 %1435 }
 0x3f1   : >> { %vm1437_vm9 = vcmp.eq.f32.partialorder %v4028_v12, %v4059_v50  ;;  %vm1438_vm10 = vcmp.eq.f32.partialorder %v4031_v30, %v4059_v50  ;;  %vm1439_vm11 = vcmp.eq.f32.partialorder %v4034_v10, %v4059_v50  ;;  %vm1440_vm12 = vcmp.eq.f32.partialorder %v4037_v2, %v4059_v50 }
 0x3f2   : >> { %vm1441_vm13 = vcmp.eq.f32.partialorder %v4040_v32, %v4059_v50  ;;  %vm1442_vm14 = vcmp.eq.f32.partialorder %v4043_v29, %v4059_v50  ;;  %vm1443_vm15 = vcmp.eq.f32.partialorder %v4046_v33, %v4059_v50  ;;  %vm1444_vm0 = vcmp.eq.f32.partialorder %v4049_v34, %v4059_v50 }
 0x3f3   : >> { %v1445_v51 = vsel %vm1437_vm9, %v3927_v41, 1024  ;;  %v1446_v55 = vsel %vm1438_vm10, %v3930_v42, 1024  ;;  %v1447_v40 = vsel %vm1439_vm11, %v3933_v18, 1024  ;;  %v1448_v20 = vsel %vm1440_vm12, %v3936_v43, 1024 }
 0x3f4   : >> { %v1449_v56 = vsel %vm1441_vm13, %v3939_v35, 1024  ;;  %v1450_v57 = vsel %vm1442_vm14, %v3942_v36, 1024  ;;  %v1451_v24 = vsel %vm1443_vm15, %v3945_v46, 1024  ;;  %v1452_v62 = vsel %vm1444_vm0, %v3948_v47, 1024 }
 0x3f5   : >> { %vm1453_vm1 = vcmp.lt.s32.totalorder %v1445_v51, %v1449_v56  ;;  %vm1455_vm2 = vcmp.lt.s32.totalorder %v1446_v55, %v1450_v57  ;;  %vm1457_vm3 = vcmp.lt.s32.totalorder %v1447_v40, %v1451_v24  ;;  %vm1459_vm4 = vcmp.lt.s32.totalorder %v1448_v20, %v1452_v62 }
 0x3f6   : >> { %v1454_v26 = vsel %vm1453_vm1, %v1445_v51, %v1449_v56  ;;  %v1456_v63 = vsel %vm1455_vm2, %v1446_v55, %v1450_v57  ;;  %v1458_v53 = vsel %vm1457_vm3, %v1447_v40, %v1451_v24  ;;  %v1460_v0 = vsel %vm1459_vm4, %v1448_v20, %v1452_v62 }
 0x3f7   : >> { %vm1461_vm5 = vcmp.lt.s32.totalorder %v1454_v26, %v1456_v63  ;;  %vm1463_vm6 = vcmp.lt.s32.totalorder %v1458_v53, %v1460_v0  ;;  %vm2042_vm9 = vcmask 7168  }
 0x3f8   : >> { %v1462_v31 = vsel %vm1461_vm5, %v1454_v26, %v1456_v63  ;;  %v1464_v1 = vsel %vm1463_vm6, %v1458_v53, %v1460_v0 }
 0x3f9   : >> { %vm1465_vm7 = vcmp.lt.s32.totalorder %v1462_v31, %v1464_v1 }
 0x3fa   : >> { %v1466_v58 = vsel %vm1465_vm7, %v1462_v31, %v1464_v1 }
 0x3fb   : >> { %v1468_v6 = vshra.s32 %v1466_v58, 16  ;;  %v1467_v49 = vand.u32 65535, %v1466_v58 }
 0x3fd   : >> { %v1470_v7 = vcvt.s32.f32 %v1468_v6  ;;  %v1469_v60 = vcvt.s32.f32 %v1467_v49 }
 0x3ff   : >> { %1471 = vmin.xlane.f32.xlu0 %v1470_v7 }
 0x48c   : >> { %v1472_v8 = vpop.xlane.xlu0 %1471 }
 0x48d   : >> { %vm1473_vm8 = vcmp.eq.f32.partialorder %v1470_v7, %v1472_v8  ;;  %v1478_v11 = vcvt.f32.s32 %v1472_v8 }
 0x48e   : >> { %v1474_v52 = vsel %vm1473_vm8, %v1469_v60, inf }
 0x48f   : >> { %1475 = vmin.xlane.f32.xlu1 %v1474_v52  ;;  %v1479_v13 = vshll.u32 %v1478_v11, 16 }
 0x51c   : >> { %v1476_v61 = vpop.xlane.xlu1 %1475 }
 0x51d   : >> { %v1477_v44 = vcvt.f32.s32 %v1476_v61 }
 0x51f   : >> { %v1480_v16 = vadd.s32 %v1479_v13, %v1477_v44 }
 0x521   : >> { %vm1482_vm10 = vcmp.eq.s32.totalorder %v3927_v41, %v1480_v16  ;;  %vm1483_vm11 = vcmp.eq.s32.totalorder %v3930_v42, %v1480_v16  ;;  %vm1484_vm12 = vcmp.eq.s32.totalorder %v3933_v18, %v1480_v16  ;;  %vm1485_vm13 = vcmp.eq.s32.totalorder %v3936_v43, %v1480_v16 }
 0x522   : >> { %vm1486_vm14 = vcmp.eq.s32.totalorder %v3939_v35, %v1480_v16  ;;  %vm1487_vm15 = vcmp.eq.s32.totalorder %v3942_v36, %v1480_v16  ;;  %vm1488_vm0 = vcmp.eq.s32.totalorder %v3945_v46, %v1480_v16  ;;  %vm1489_vm1 = vcmp.eq.s32.totalorder %v3948_v47, %v1480_v16 }
 0x523   : >> { %v4098_v3 = vsel %vm1482_vm10, -1e+30, %v4028_v12  ;;  %v4101_v21 = vsel %vm1483_vm11, -1e+30, %v4031_v30  ;;  %v4104_v59 = vsel %vm1484_vm12, -1e+30, %v4034_v10  ;;  %v1481_v22 = vadd.s32 %v1480_v16, %v4087_v19 }
 0x524   : >> { %v4108_v4 = vsel %vm1485_vm13, -1e+30, %v4037_v2  ;;  %v4111_v23 = vsel %vm1486_vm14, -1e+30, %v4040_v32  ;;  %v4114_v25 = vsel %vm1487_vm15, -1e+30, %v4043_v29 }
 0x525   : >> { %v4119_v5 = vsel %vm1488_vm0, -1e+30, %v4046_v33  ;;  %v4122_v28 = vsel %vm1489_vm1, -1e+30, %v4049_v34  ;;  %v1498_v17 = vmax.f32 %v4098_v3, %v4111_v23  ;;  %v1499_v12 = vmax.f32 %v4101_v21, %v4114_v25 }
 0x526   : >> { %v1500_v30 = vmax.f32 %v4104_v59, %v4119_v5  ;;  %v1501_v10 = vmax.f32 %v4108_v4, %v4122_v28  ;;  %v4133_v9 = vsel %vm2042_vm9, %v1411_v27, %v1481_v22 }
 0x527   : >> { %v1502_v2 = vmax.f32 %v1498_v17, %v1499_v12 }
 0x528   : >> { %v1503_v32 = vmax.f32 %v1500_v30, %v1501_v10 }
 0x52a   : >> { %v1504_v29 = vmax.f32 %v1502_v2, %v1503_v32 }
 0x52c   : >> { %1505 = vmax.xlane.f32.xlu0 %v1504_v29 }
 0x5b9   : >> { %v4135_v33 = vpop.xlane.xlu0 %1505 }
 0x5ba   : >> { %vm1507_vm2 = vcmp.eq.f32.partialorder %v4098_v3, %v4135_v33  ;;  %vm1508_vm3 = vcmp.eq.f32.partialorder %v4101_v21, %v4135_v33  ;;  %vm1509_vm4 = vcmp.eq.f32.partialorder %v4104_v59, %v4135_v33  ;;  %vm1510_vm5 = vcmp.eq.f32.partialorder %v4108_v4, %v4135_v33 }
 0x5bb   : >> { %vm1511_vm6 = vcmp.eq.f32.partialorder %v4111_v23, %v4135_v33  ;;  %vm1512_vm7 = vcmp.eq.f32.partialorder %v4114_v25, %v4135_v33  ;;  %vm1513_vm8 = vcmp.eq.f32.partialorder %v4119_v5, %v4135_v33  ;;  %vm1514_vm10 = vcmp.eq.f32.partialorder %v4122_v28, %v4135_v33 }
 0x5bc   : >> { %v1515_v34 = vsel %vm1507_vm2, %v3927_v41, 1024  ;;  %v1516_v14 = vsel %vm1508_vm3, %v3930_v42, 1024  ;;  %v1517_v45 = vsel %vm1509_vm4, %v3933_v18, 1024  ;;  %v1518_v37 = vsel %vm1510_vm5, %v3936_v43, 1024 }
 0x5bd   : >> { %v1519_v15 = vsel %vm1511_vm6, %v3939_v35, 1024  ;;  %v1520_v38 = vsel %vm1512_vm7, %v3942_v36, 1024  ;;  %v1521_v39 = vsel %vm1513_vm8, %v3945_v46, 1024  ;;  %v1522_v48 = vsel %vm1514_vm10, %v3948_v47, 1024 }
 0x5be   : >> { %vm1523_vm11 = vcmp.lt.s32.totalorder %v1515_v34, %v1519_v15  ;;  %vm1525_vm12 = vcmp.lt.s32.totalorder %v1516_v14, %v1520_v38  ;;  %vm1527_vm13 = vcmp.lt.s32.totalorder %v1517_v45, %v1521_v39  ;;  %vm1529_vm14 = vcmp.lt.s32.totalorder %v1518_v37, %v1522_v48 }
 0x5bf   : >> { %v1524_v51 = vsel %vm1523_vm11, %v1515_v34, %v1519_v15  ;;  %v1526_v55 = vsel %vm1525_vm12, %v1516_v14, %v1520_v38  ;;  %v1528_v40 = vsel %vm1527_vm13, %v1517_v45, %v1521_v39  ;;  %v1530_v20 = vsel %vm1529_vm14, %v1518_v37, %v1522_v48 }
 0x5c0   : >> { %vm1531_vm15 = vcmp.lt.s32.totalorder %v1524_v51, %v1526_v55  ;;  %vm1533_vm0 = vcmp.lt.s32.totalorder %v1528_v40, %v1530_v20  ;;  %vm2044_vm3 = vcmask 15360  }
 0x5c1   : >> { %v1532_v56 = vsel %vm1531_vm15, %v1524_v51, %v1526_v55  ;;  %v1534_v57 = vsel %vm1533_vm0, %v1528_v40, %v1530_v20 }
 0x5c2   : >> { %vm1535_vm1 = vcmp.lt.s32.totalorder %v1532_v56, %v1534_v57 }
 0x5c3   : >> { %v1536_v24 = vsel %vm1535_vm1, %v1532_v56, %v1534_v57 }
 0x5c4   : >> { %v1538_v62 = vshra.s32 %v1536_v24, 16  ;;  %v1537_v63 = vand.u32 65535, %v1536_v24 }
 0x5c6   : >> { %v1540_v26 = vcvt.s32.f32 %v1538_v62  ;;  %v1539_v0 = vcvt.s32.f32 %v1537_v63 }
 0x5c8   : >> { %1541 = vmin.xlane.f32.xlu1 %v1540_v26 }
 0x655   : >> { %v1542_v53 = vpop.xlane.xlu1 %1541 }
 0x656   : >> { %vm1543_vm2 = vcmp.eq.f32.partialorder %v1540_v26, %v1542_v53  ;;  %v1548_v1 = vcvt.f32.s32 %v1542_v53 }
 0x657   : >> { %v1544_v31 = vsel %vm1543_vm2, %v1539_v0, inf }
 0x658   : >> { %1545 = vmin.xlane.f32.xlu0 %v1544_v31  ;;  %v1549_v6 = vshll.u32 %v1548_v1, 16 }
 0x6e5   : >> { %v1546_v58 = vpop.xlane.xlu0 %1545 }
 0x6e6   : >> { %v1547_v7 = vcvt.f32.s32 %v1546_v58 }
 0x6e8   : >> { %v1550_v49 = vadd.s32 %v1549_v6, %v1547_v7 }
 0x6ea   : >> { %vm1552_vm4 = vcmp.eq.s32.totalorder %v3927_v41, %v1550_v49  ;;  %vm1553_vm5 = vcmp.eq.s32.totalorder %v3930_v42, %v1550_v49  ;;  %vm1554_vm6 = vcmp.eq.s32.totalorder %v3933_v18, %v1550_v49  ;;  %vm1555_vm7 = vcmp.eq.s32.totalorder %v3936_v43, %v1550_v49 }
 0x6eb   : >> { %vm1556_vm8 = vcmp.eq.s32.totalorder %v3939_v35, %v1550_v49  ;;  %vm1557_vm10 = vcmp.eq.s32.totalorder %v3942_v36, %v1550_v49  ;;  %vm1558_vm11 = vcmp.eq.s32.totalorder %v3945_v46, %v1550_v49  ;;  %vm1559_vm12 = vcmp.eq.s32.totalorder %v3948_v47, %v1550_v49 }
 0x6ec   : >> { %v4170_v8 = vsel %vm1552_vm4, -1e+30, %v4098_v3  ;;  %v4173_v60 = vsel %vm1553_vm5, -1e+30, %v4101_v21  ;;  %v4176_v52 = vsel %vm1554_vm6, -1e+30, %v4104_v59  ;;  %v1551_v11 = vadd.s32 %v1550_v49, %v4087_v19 }
 0x6ed   : >> { %v4180_v61 = vsel %vm1555_vm7, -1e+30, %v4108_v4  ;;  %v4183_v13 = vsel %vm1556_vm8, -1e+30, %v4111_v23  ;;  %v4186_v44 = vsel %vm1557_vm10, -1e+30, %v4114_v25 }
 0x6ee   : >> { %v4189_v16 = vsel %vm1558_vm11, -1e+30, %v4119_v5  ;;  %v4192_v3 = vsel %vm1559_vm12, -1e+30, %v4122_v28  ;;  %v1568_v21 = vmax.f32 %v4170_v8, %v4183_v13  ;;  %v1569_v59 = vmax.f32 %v4173_v60, %v4186_v44 }
 0x6ef   : >> { %v1570_v22 = vmax.f32 %v4176_v52, %v4189_v16  ;;  %v1571_v4 = vmax.f32 %v4180_v61, %v4192_v3  ;;  %v4204_v23 = vsel %vm2044_vm3, %v4133_v9, %v1551_v11 }
 0x6f0   : >> { %v1572_v25 = vmax.f32 %v1568_v21, %v1569_v59 }
 0x6f1   : >> { %v1573_v27 = vmax.f32 %v1570_v22, %v1571_v4 }
 0x6f3   : >> { %v1574_v5 = vmax.f32 %v1572_v25, %v1573_v27 }
 0x6f5   : >> { %1575 = vmax.xlane.f32.xlu1 %v1574_v5 }
 0x782   : >> { %v4206_v28 = vpop.xlane.xlu1 %1575 }
 0x783   : >> { %vm1577_vm13 = vcmp.eq.f32.partialorder %v4170_v8, %v4206_v28  ;;  %vm1578_vm14 = vcmp.eq.f32.partialorder %v4173_v60, %v4206_v28  ;;  %vm1579_vm15 = vcmp.eq.f32.partialorder %v4176_v52, %v4206_v28  ;;  %vm1580_vm0 = vcmp.eq.f32.partialorder %v4180_v61, %v4206_v28 }
 0x784   : >> { %vm1581_vm1 = vcmp.eq.f32.partialorder %v4183_v13, %v4206_v28  ;;  %vm1582_vm2 = vcmp.eq.f32.partialorder %v4186_v44, %v4206_v28  ;;  %vm1583_vm4 = vcmp.eq.f32.partialorder %v4189_v16, %v4206_v28  ;;  %vm1584_vm5 = vcmp.eq.f32.partialorder %v4192_v3, %v4206_v28 }
 0x785   : >> { %v1585_v17 = vsel %vm1577_vm13, %v3927_v41, 1024  ;;  %v1586_v12 = vsel %vm1578_vm14, %v3930_v42, 1024  ;;  %v1587_v30 = vsel %vm1579_vm15, %v3933_v18, 1024  ;;  %v1588_v10 = vsel %vm1580_vm0, %v3936_v43, 1024 }
 0x786   : >> { %v1589_v9 = vsel %vm1581_vm1, %v3939_v35, 1024  ;;  %v1590_v2 = vsel %vm1582_vm2, %v3942_v36, 1024  ;;  %v1591_v32 = vsel %vm1583_vm4, %v3945_v46, 1024  ;;  %v1592_v29 = vsel %vm1584_vm5, %v3948_v47, 1024 }
 0x787   : >> { %vm1593_vm6 = vcmp.lt.s32.totalorder %v1585_v17, %v1589_v9  ;;  %vm1595_vm7 = vcmp.lt.s32.totalorder %v1586_v12, %v1590_v2  ;;  %vm1597_vm8 = vcmp.lt.s32.totalorder %v1587_v30, %v1591_v32  ;;  %vm1599_vm10 = vcmp.lt.s32.totalorder %v1588_v10, %v1592_v29 }
 0x788   : >> { %v1594_v34 = vsel %vm1593_vm6, %v1585_v17, %v1589_v9  ;;  %v1596_v14 = vsel %vm1595_vm7, %v1586_v12, %v1590_v2  ;;  %v1598_v45 = vsel %vm1597_vm8, %v1587_v30, %v1591_v32  ;;  %v1600_v37 = vsel %vm1599_vm10, %v1588_v10, %v1592_v29 }
 0x789   : >> { %vm1601_vm11 = vcmp.lt.s32.totalorder %v1594_v34, %v1596_v14  ;;  %vm1603_vm12 = vcmp.lt.s32.totalorder %v1598_v45, %v1600_v37  ;;  %vm2046_vm15 = vcmask 23552  }
 0x78a   : >> { %v1602_v15 = vsel %vm1601_vm11, %v1594_v34, %v1596_v14  ;;  %v1604_v38 = vsel %vm1603_vm12, %v1598_v45, %v1600_v37 }
 0x78b   : >> { %vm1605_vm13 = vcmp.lt.s32.totalorder %v1602_v15, %v1604_v38 }
 0x78c   : >> { %v1606_v39 = vsel %vm1605_vm13, %v1602_v15, %v1604_v38 }
 0x78d   : >> { %v1608_v48 = vshra.s32 %v1606_v39, 16  ;;  %v1607_v55 = vand.u32 65535, %v1606_v39 }
 0x78f   : >> { %v1610_v51 = vcvt.s32.f32 %v1608_v48  ;;  %v1609_v20 = vcvt.s32.f32 %v1607_v55 }
 0x791   : >> { %1611 = vmin.xlane.f32.xlu0 %v1610_v51 }
 0x81e   : >> { %v1612_v40 = vpop.xlane.xlu0 %1611 }
 0x81f   : >> { %vm1613_vm14 = vcmp.eq.f32.partialorder %v1610_v51, %v1612_v40  ;;  %v1618_v57 = vcvt.f32.s32 %v1612_v40 }
 0x820   : >> { %v1614_v56 = vsel %vm1613_vm14, %v1609_v20, inf }
 0x821   : >> { %1615 = vmin.xlane.f32.xlu1 %v1614_v56  ;;  %v1619_v62 = vshll.u32 %v1618_v57, 16 }
 0x8ae   : >> { %v1616_v24 = vpop.xlane.xlu1 %1615 }
 0x8af   : >> { %v1617_v26 = vcvt.f32.s32 %v1616_v24 }
 0x8b1   : >> { %v1620_v63 = vadd.s32 %v1619_v62, %v1617_v26 }
 0x8b3   : >> { %vm1622_vm0 = vcmp.eq.s32.totalorder %v3927_v41, %v1620_v63  ;;  %vm1623_vm1 = vcmp.eq.s32.totalorder %v3930_v42, %v1620_v63  ;;  %vm1624_vm2 = vcmp.eq.s32.totalorder %v3933_v18, %v1620_v63  ;;  %vm1625_vm4 = vcmp.eq.s32.totalorder %v3936_v43, %v1620_v63 }
 0x8b4   : >> { %vm1626_vm5 = vcmp.eq.s32.totalorder %v3939_v35, %v1620_v63  ;;  %vm1627_vm6 = vcmp.eq.s32.totalorder %v3942_v36, %v1620_v63  ;;  %vm1628_vm7 = vcmp.eq.s32.totalorder %v3945_v46, %v1620_v63  ;;  %vm1629_vm8 = vcmp.eq.s32.totalorder %v3948_v47, %v1620_v63 }
 0x8b5   : >> { %v4241_v53 = vsel %vm1622_vm0, -1e+30, %v4170_v8  ;;  %v4244_v0 = vsel %vm1623_vm1, -1e+30, %v4173_v60  ;;  %v4247_v31 = vsel %vm1624_vm2, -1e+30, %v4176_v52  ;;  %v1621_v1 = vadd.s32 %v1620_v63, %v4087_v19 }
 0x8b6   : >> { %v4251_v58 = vsel %vm1625_vm4, -1e+30, %v4180_v61  ;;  %v4254_v6 = vsel %vm1626_vm5, -1e+30, %v4183_v13  ;;  %v4257_v7 = vsel %vm1627_vm6, -1e+30, %v4186_v44 }
 0x8b7   : >> { %v4260_v49 = vsel %vm1628_vm7, -1e+30, %v4189_v16  ;;  %v4263_v8 = vsel %vm1629_vm8, -1e+30, %v4192_v3  ;;  %v1638_v60 = vmax.f32 %v4241_v53, %v4254_v6  ;;  %v1639_v52 = vmax.f32 %v4244_v0, %v4257_v7 }
 0x8b8   : >> { %v1640_v11 = vmax.f32 %v4247_v31, %v4260_v49  ;;  %v1641_v61 = vmax.f32 %v4251_v58, %v4263_v8  ;;  %v4275_v13 = vsel %vm2046_vm15, %v4204_v23, %v1621_v1 }
 0x8b9   : >> { %v1642_v44 = vmax.f32 %v1638_v60, %v1639_v52 }
 0x8ba   : >> { %v1643_v16 = vmax.f32 %v1640_v11, %v1641_v61 }
 0x8bc   : >> { %v1644_v3 = vmax.f32 %v1642_v44, %v1643_v16 }
 0x8be   : >> { %1645 = vmax.xlane.f32.xlu0 %v1644_v3 }
 0x94b   : >> { %v4277_v21 = vpop.xlane.xlu0 %1645 }
 0x94c   : >> { %vm1647_vm10 = vcmp.eq.f32.partialorder %v4241_v53, %v4277_v21  ;;  %vm1648_vm11 = vcmp.eq.f32.partialorder %v4244_v0, %v4277_v21  ;;  %vm1649_vm12 = vcmp.eq.f32.partialorder %v4247_v31, %v4277_v21  ;;  %vm1650_vm13 = vcmp.eq.f32.partialorder %v4251_v58, %v4277_v21 }
 0x94d   : >> { %vm1651_vm14 = vcmp.eq.f32.partialorder %v4254_v6, %v4277_v21  ;;  %vm1652_vm0 = vcmp.eq.f32.partialorder %v4257_v7, %v4277_v21  ;;  %vm1653_vm1 = vcmp.eq.f32.partialorder %v4260_v49, %v4277_v21  ;;  %vm1654_vm2 = vcmp.eq.f32.partialorder %v4263_v8, %v4277_v21 }
 0x94e   : >> { %v1655_v59 = vsel %vm1647_vm10, %v3927_v41, 1024  ;;  %v1656_v22 = vsel %vm1648_vm11, %v3930_v42, 1024  ;;  %v1657_v4 = vsel %vm1649_vm12, %v3933_v18, 1024  ;;  %v1658_v23 = vsel %vm1650_vm13, %v3936_v43, 1024 }
 0x94f   : >> { %v1659_v25 = vsel %vm1651_vm14, %v3939_v35, 1024  ;;  %v1660_v27 = vsel %vm1652_vm0, %v3942_v36, 1024  ;;  %v1661_v5 = vsel %vm1653_vm1, %v3945_v46, 1024  ;;  %v1662_v17 = vsel %vm1654_vm2, %v3948_v47, 1024 }
 0x950   : >> { %vm1663_vm4 = vcmp.lt.s32.totalorder %v1655_v59, %v1659_v25  ;;  %vm1665_vm5 = vcmp.lt.s32.totalorder %v1656_v22, %v1660_v27  ;;  %vm1667_vm6 = vcmp.lt.s32.totalorder %v1657_v4, %v1661_v5  ;;  %vm1669_vm7 = vcmp.lt.s32.totalorder %v1658_v23, %v1662_v17 }
 0x951   : >> { %v1664_v12 = vsel %vm1663_vm4, %v1655_v59, %v1659_v25  ;;  %v1666_v30 = vsel %vm1665_vm5, %v1656_v22, %v1660_v27  ;;  %v1668_v10 = vsel %vm1667_vm6, %v1657_v4, %v1661_v5  ;;  %v1670_v9 = vsel %vm1669_vm7, %v1658_v23, %v1662_v17 }
 0x952   : >> { %vm1671_vm8 = vcmp.lt.s32.totalorder %v1664_v12, %v1666_v30  ;;  %vm1673_vm10 = vcmp.lt.s32.totalorder %v1668_v10, %v1670_v9  ;;  %vm2048_vm13 = vcmask 31744  }
 0x953   : >> { %v1672_v2 = vsel %vm1671_vm8, %v1664_v12, %v1666_v30  ;;  %v1674_v32 = vsel %vm1673_vm10, %v1668_v10, %v1670_v9 }
 0x954   : >> { %vm1675_vm11 = vcmp.lt.s32.totalorder %v1672_v2, %v1674_v32 }
 0x955   : >> { %v1676_v29 = vsel %vm1675_vm11, %v1672_v2, %v1674_v32 }
 0x956   : >> { %v1678_v34 = vshra.s32 %v1676_v29, 16  ;;  %v1677_v45 = vand.u32 65535, %v1676_v29 }
 0x958   : >> { %v1680_v14 = vcvt.s32.f32 %v1678_v34  ;;  %v1679_v15 = vcvt.s32.f32 %v1677_v45 }
 0x95a   : >> { %1681 = vmin.xlane.f32.xlu1 %v1680_v14 }
 0x9e7   : >> { %v1682_v37 = vpop.xlane.xlu1 %1681 }
 0x9e8   : >> { %vm1683_vm12 = vcmp.eq.f32.partialorder %v1680_v14, %v1682_v37  ;;  %v1688_v39 = vcvt.f32.s32 %v1682_v37 }
 0x9e9   : >> { %v1684_v38 = vsel %vm1683_vm12, %v1679_v15, inf }
 0x9ea   : >> { %1685 = vmin.xlane.f32.xlu0 %v1684_v38  ;;  %v1689_v51 = vshll.u32 %v1688_v39, 16 }
 0xa77   : >> { %v1686_v48 = vpop.xlane.xlu0 %1685 }
 0xa78   : >> { %v1687_v55 = vcvt.f32.s32 %v1686_v48 }
 0xa7a   : >> { %v1690_v40 = vadd.s32 %v1689_v51, %v1687_v55 }
 0xa7c   : >> { %vm1692_vm14 = vcmp.eq.s32.totalorder %v3927_v41, %v1690_v40  ;;  %vm1693_vm0 = vcmp.eq.s32.totalorder %v3930_v42, %v1690_v40  ;;  %vm1694_vm1 = vcmp.eq.s32.totalorder %v3933_v18, %v1690_v40  ;;  %vm1695_vm2 = vcmp.eq.s32.totalorder %v3936_v43, %v1690_v40 }
 0xa7d   : >> { %vm1696_vm4 = vcmp.eq.s32.totalorder %v3939_v35, %v1690_v40  ;;  %vm1697_vm5 = vcmp.eq.s32.totalorder %v3942_v36, %v1690_v40  ;;  %vm1698_vm6 = vcmp.eq.s32.totalorder %v3945_v46, %v1690_v40  ;;  %vm1699_vm7 = vcmp.eq.s32.totalorder %v3948_v47, %v1690_v40 }
 0xa7e   : >> { %v4312_v20 = vsel %vm1692_vm14, -1e+30, %v4241_v53  ;;  %v4315_v56 = vsel %vm1693_vm0, -1e+30, %v4244_v0  ;;  %v4318_v57 = vsel %vm1694_vm1, -1e+30, %v4247_v31  ;;  %v1691_v24 = vadd.s32 %v1690_v40, %v4087_v19 }
 0xa7f   : >> { %v4322_v62 = vsel %vm1695_vm2, -1e+30, %v4251_v58  ;;  %v4325_v26 = vsel %vm1696_vm4, -1e+30, %v4254_v6  ;;  %v4328_v63 = vsel %vm1697_vm5, -1e+30, %v4257_v7 }
 0xa80   : >> { %v4331_v53 = vsel %vm1698_vm6, -1e+30, %v4260_v49  ;;  %v4334_v0 = vsel %vm1699_vm7, -1e+30, %v4263_v8  ;;  %v1708_v31 = vmax.f32 %v4312_v20, %v4325_v26  ;;  %v1709_v1 = vmax.f32 %v4315_v56, %v4328_v63 }
 0xa81   : >> { %v1710_v58 = vmax.f32 %v4318_v57, %v4331_v53  ;;  %v1711_v6 = vmax.f32 %v4322_v62, %v4334_v0  ;;  %v4346_v7 = vsel %vm2048_vm13, %v4275_v13, %v1691_v24 }
 0xa82   : >> { %v1712_v49 = vmax.f32 %v1708_v31, %v1709_v1 }
 0xa83   : >> { %v1713_v60 = vmax.f32 %v1710_v58, %v1711_v6 }
 0xa85   : >> { %v1714_v8 = vmax.f32 %v1712_v49, %v1713_v60 }
 0xa87   : >> { %1715 = vmax.xlane.f32.xlu1 %v1714_v8 }
 0xb14   : >> { %v4348_v52 = vpop.xlane.xlu1 %1715 }
 0xb15   : >> { %vm1717_vm8 = vcmp.eq.f32.partialorder %v4312_v20, %v4348_v52  ;;  %vm1718_vm10 = vcmp.eq.f32.partialorder %v4315_v56, %v4348_v52  ;;  %vm1719_vm11 = vcmp.eq.f32.partialorder %v4318_v57, %v4348_v52  ;;  %vm1720_vm12 = vcmp.eq.f32.partialorder %v4322_v62, %v4348_v52 }
 0xb16   : >> { %vm1721_vm14 = vcmp.eq.f32.partialorder %v4325_v26, %v4348_v52  ;;  %vm1722_vm0 = vcmp.eq.f32.partialorder %v4328_v63, %v4348_v52  ;;  %vm1723_vm1 = vcmp.eq.f32.partialorder %v4331_v53, %v4348_v52  ;;  %vm1724_vm2 = vcmp.eq.f32.partialorder %v4334_v0, %v4348_v52 }
 0xb17   : >> { %v1725_v11 = vsel %vm1717_vm8, %v3927_v41, 1024  ;;  %v1726_v61 = vsel %vm1718_vm10, %v3930_v42, 1024  ;;  %v1727_v13 = vsel %vm1719_vm11, %v3933_v18, 1024  ;;  %v1728_v44 = vsel %vm1720_vm12, %v3936_v43, 1024 }
 0xb18   : >> { %v1729_v16 = vsel %vm1721_vm14, %v3939_v35, 1024  ;;  %v1730_v3 = vsel %vm1722_vm0, %v3942_v36, 1024  ;;  %v1731_v59 = vsel %vm1723_vm1, %v3945_v46, 1024  ;;  %v1732_v22 = vsel %vm1724_vm2, %v3948_v47, 1024 }
 0xb19   : >> { %vm1733_vm4 = vcmp.lt.s32.totalorder %v1725_v11, %v1729_v16  ;;  %vm1735_vm5 = vcmp.lt.s32.totalorder %v1726_v61, %v1730_v3  ;;  %vm1737_vm6 = vcmp.lt.s32.totalorder %v1727_v13, %v1731_v59  ;;  %vm1739_vm7 = vcmp.lt.s32.totalorder %v1728_v44, %v1732_v22 }
 0xb1a   : >> { %v1734_v4 = vsel %vm1733_vm4, %v1725_v11, %v1729_v16  ;;  %v1736_v23 = vsel %vm1735_vm5, %v1726_v61, %v1730_v3  ;;  %v1738_v25 = vsel %vm1737_vm6, %v1727_v13, %v1731_v59  ;;  %v1740_v27 = vsel %vm1739_vm7, %v1728_v44, %v1732_v22 }
 0xb1b   : >> { %vm1741_vm8 = vcmp.lt.s32.totalorder %v1734_v4, %v1736_v23  ;;  %vm1743_vm10 = vcmp.lt.s32.totalorder %v1738_v25, %v1740_v27  ;;  %vm5142_vm14 = vcmask 39936  }
 0xb1c   : >> { %v1742_v5 = vsel %vm1741_vm8, %v1734_v4, %v1736_v23  ;;  %v1744_v17 = vsel %vm1743_vm10, %v1738_v25, %v1740_v27 }
 0xb1d   : >> { %vm1745_vm11 = vcmp.lt.s32.totalorder %v1742_v5, %v1744_v17 }
 0xb1e   : >> { %v1746_v12 = vsel %vm1745_vm11, %v1742_v5, %v1744_v17 }
 0xb1f   : >> { %v1748_v30 = vshra.s32 %v1746_v12, 16  ;;  %v1747_v9 = vand.u32 65535, %v1746_v12 }
 0xb21   : >> { %v1750_v10 = vcvt.s32.f32 %v1748_v30  ;;  %v1749_v32 = vcvt.s32.f32 %v1747_v9 }
 0xb23   : >> { %1751 = vmin.xlane.f32.xlu0 %v1750_v10 }
 0xbb0   : >> { %v1752_v2 = vpop.xlane.xlu0 %1751 }
 0xbb1   : >> { %vm1753_vm12 = vcmp.eq.f32.partialorder %v1750_v10, %v1752_v2  ;;  %v1758_v34 = vcvt.f32.s32 %v1752_v2 }
 0xbb2   : >> { %v1754_v29 = vsel %vm1753_vm12, %v1749_v32, inf }
 0xbb3   : >> { %1755 = vmin.xlane.f32.xlu1 %v1754_v29  ;;  %v1759_v45 = vshll.u32 %v1758_v34, 16 }
 0xc40   : >> { %v1756_v14 = vpop.xlane.xlu1 %1755 }
 0xc41   : >> { %v1757_v37 = vcvt.f32.s32 %v1756_v14 }
 0xc43   : >> { %v1760_v15 = vadd.s32 %v1759_v45, %v1757_v37 }
 0xc45   : >> { %vm1762_vm0 = vcmp.eq.s32.totalorder %v3927_v41, %v1760_v15  ;;  %vm1763_vm1 = vcmp.eq.s32.totalorder %v3930_v42, %v1760_v15  ;;  %vm1764_vm2 = vcmp.eq.s32.totalorder %v3933_v18, %v1760_v15  ;;  %vm1765_vm4 = vcmp.eq.s32.totalorder %v3936_v43, %v1760_v15 }
 0xc46   : >> { %vm1766_vm5 = vcmp.eq.s32.totalorder %v3939_v35, %v1760_v15  ;;  %vm1767_vm6 = vcmp.eq.s32.totalorder %v3942_v36, %v1760_v15  ;;  %vm1768_vm7 = vcmp.eq.s32.totalorder %v3945_v46, %v1760_v15  ;;  %vm1769_vm8 = vcmp.eq.s32.totalorder %v3948_v47, %v1760_v15 }
 0xc47   : >> { %v4383_v38 = vsel %vm1762_vm0, -1e+30, %v4312_v20  ;;  %v4386_v39 = vsel %vm1763_vm1, -1e+30, %v4315_v56  ;;  %v4389_v48 = vsel %vm1764_vm2, -1e+30, %v4318_v57  ;;  %v1761_v51 = vadd.s32 %v1760_v15, %v4087_v19 }
 0xc48   : >> { %v4393_v55 = vsel %vm1765_vm4, -1e+30, %v4322_v62  ;;  %v4396_v40 = vsel %vm1766_vm5, -1e+30, %v4325_v26  ;;  %v4399_v24 = vsel %vm1767_vm6, -1e+30, %v4328_v63 }
 0xc49   : >> { %v4402_v20 = vsel %vm1768_vm7, -1e+30, %v4331_v53  ;;  %v4405_v56 = vsel %vm1769_vm8, -1e+30, %v4334_v0  ;;  %v1778_v57 = vmax.f32 %v4383_v38, %v4396_v40  ;;  %v1779_v31 = vmax.f32 %v4386_v39, %v4399_v24 }
 0xc4a   : >> { %v1780_v62 = vmax.f32 %v4389_v48, %v4402_v20  ;;  %v1781_v26 = vmax.f32 %v4393_v55, %v4405_v56  ;;  %v4417_v63 = vsel %vm5142_vm14, %v4346_v7, %v1761_v51 }
 0xc4b   : >> { %v1782_v53 = vmax.f32 %v1778_v57, %v1779_v31 }
 0xc4c   : >> { %v1783_v1 = vmax.f32 %v1780_v62, %v1781_v26 }
 0xc4e   : >> { %v1784_v0 = vmax.f32 %v1782_v53, %v1783_v1 }
 0xc50   : >> { %1785 = vmax.xlane.f32.xlu0 %v1784_v0 }
 0xcdd   : >> { %v4419_v58 = vpop.xlane.xlu0 %1785 }
 0xcde   : >> { %vm1787_vm10 = vcmp.eq.f32.partialorder %v4383_v38, %v4419_v58  ;;  %vm1788_vm11 = vcmp.eq.f32.partialorder %v4386_v39, %v4419_v58  ;;  %vm1789_vm12 = vcmp.eq.f32.partialorder %v4389_v48, %v4419_v58  ;;  %vm1790_vm0 = vcmp.eq.f32.partialorder %v4393_v55, %v4419_v58 }
 0xcdf   : >> { %vm1791_vm1 = vcmp.eq.f32.partialorder %v4396_v40, %v4419_v58  ;;  %vm1792_vm2 = vcmp.eq.f32.partialorder %v4399_v24, %v4419_v58  ;;  %vm1793_vm4 = vcmp.eq.f32.partialorder %v4402_v20, %v4419_v58  ;;  %vm1794_vm5 = vcmp.eq.f32.partialorder %v4405_v56, %v4419_v58 }
 0xce0   : >> { %v1795_v6 = vsel %vm1787_vm10, %v3927_v41, 1024  ;;  %v1796_v7 = vsel %vm1788_vm11, %v3930_v42, 1024  ;;  %v1797_v49 = vsel %vm1789_vm12, %v3933_v18, 1024  ;;  %v1798_v60 = vsel %vm1790_vm0, %v3936_v43, 1024 }
 0xce1   : >> { %v1799_v8 = vsel %vm1791_vm1, %v3939_v35, 1024  ;;  %v1800_v11 = vsel %vm1792_vm2, %v3942_v36, 1024  ;;  %v1801_v61 = vsel %vm1793_vm4, %v3945_v46, 1024  ;;  %v1802_v13 = vsel %vm1794_vm5, %v3948_v47, 1024 }
 0xce2   : >> { %vm1803_vm6 = vcmp.lt.s32.totalorder %v1795_v6, %v1799_v8  ;;  %vm1805_vm7 = vcmp.lt.s32.totalorder %v1796_v7, %v1800_v11  ;;  %vm1807_vm8 = vcmp.lt.s32.totalorder %v1797_v49, %v1801_v61  ;;  %vm1809_vm14 = vcmp.lt.s32.totalorder %v1798_v60, %v1802_v13 }
 0xce3   : >> { %v1804_v44 = vsel %vm1803_vm6, %v1795_v6, %v1799_v8  ;;  %v1806_v16 = vsel %vm1805_vm7, %v1796_v7, %v1800_v11  ;;  %v1808_v3 = vsel %vm1807_vm8, %v1797_v49, %v1801_v61  ;;  %v1810_v59 = vsel %vm1809_vm14, %v1798_v60, %v1802_v13 }
 0xce4   : >> { %vm1811_vm10 = vcmp.lt.s32.totalorder %v1804_v44, %v1806_v16  ;;  %vm1813_vm11 = vcmp.lt.s32.totalorder %v1808_v3, %v1810_v59  ;;  %vm5143_vm14 = vcmask 48128  }
 0xce5   : >> { %v1812_v22 = vsel %vm1811_vm10, %v1804_v44, %v1806_v16  ;;  %v1814_v4 = vsel %vm1813_vm11, %v1808_v3, %v1810_v59 }
 0xce6   : >> { %vm1815_vm12 = vcmp.lt.s32.totalorder %v1812_v22, %v1814_v4 }
 0xce7   : >> { %v1816_v23 = vsel %vm1815_vm12, %v1812_v22, %v1814_v4 }
 0xce8   : >> { %v1818_v25 = vshra.s32 %v1816_v23, 16  ;;  %v1817_v5 = vand.u32 65535, %v1816_v23 }
 0xcea   : >> { %v1820_v27 = vcvt.s32.f32 %v1818_v25  ;;  %v1819_v12 = vcvt.s32.f32 %v1817_v5 }
 0xcec   : >> { %1821 = vmin.xlane.f32.xlu1 %v1820_v27 }
 0xd79   : >> { %v1822_v17 = vpop.xlane.xlu1 %1821 }
 0xd7a   : >> { %vm1823_vm0 = vcmp.eq.f32.partialorder %v1820_v27, %v1822_v17  ;;  %v1828_v10 = vcvt.f32.s32 %v1822_v17 }
 0xd7b   : >> { %v1824_v30 = vsel %vm1823_vm0, %v1819_v12, inf }
 0xd7c   : >> { %1825 = vmin.xlane.f32.xlu0 %v1824_v30  ;;  %v1829_v2 = vshll.u32 %v1828_v10, 16 }
 0xe09   : >> { %v1826_v9 = vpop.xlane.xlu0 %1825 }
 0xe0a   : >> { %v1827_v32 = vcvt.f32.s32 %v1826_v9 }
 0xe0c   : >> { %v1830_v29 = vadd.s32 %v1829_v2, %v1827_v32 }
 0xe0e   : >> { %vm1832_vm1 = vcmp.eq.s32.totalorder %v3927_v41, %v1830_v29  ;;  %vm1833_vm2 = vcmp.eq.s32.totalorder %v3930_v42, %v1830_v29  ;;  %vm1834_vm4 = vcmp.eq.s32.totalorder %v3933_v18, %v1830_v29  ;;  %vm1835_vm5 = vcmp.eq.s32.totalorder %v3936_v43, %v1830_v29 }
 0xe0f   : >> { %vm1836_vm6 = vcmp.eq.s32.totalorder %v3939_v35, %v1830_v29  ;;  %vm1837_vm7 = vcmp.eq.s32.totalorder %v3942_v36, %v1830_v29  ;;  %vm1838_vm8 = vcmp.eq.s32.totalorder %v3945_v46, %v1830_v29  ;;  %vm1839_vm10 = vcmp.eq.s32.totalorder %v3948_v47, %v1830_v29 }
 0xe10   : >> { %v4454_v34 = vsel %vm1832_vm1, -1e+30, %v4383_v38  ;;  %v4457_v14 = vsel %vm1833_vm2, -1e+30, %v4386_v39  ;;  %v4460_v45 = vsel %vm1834_vm4, -1e+30, %v4389_v48  ;;  %v1831_v37 = vadd.s32 %v1830_v29, %v4087_v19 }
 0xe11   : >> { %v4464_v15 = vsel %vm1835_vm5, -1e+30, %v4393_v55  ;;  %v4467_v51 = vsel %vm1836_vm6, -1e+30, %v4396_v40  ;;  %v4470_v57 = vsel %vm1837_vm7, -1e+30, %v4399_v24 }
 0xe12   : >> { %v4473_v38 = vsel %vm1838_vm8, -1e+30, %v4402_v20  ;;  %v4476_v39 = vsel %vm1839_vm10, -1e+30, %v4405_v56  ;;  %v1848_v48 = vmax.f32 %v4454_v34, %v4467_v51  ;;  %v1849_v31 = vmax.f32 %v4457_v14, %v4470_v57 }
 0xe13   : >> { %v1850_v55 = vmax.f32 %v4460_v45, %v4473_v38  ;;  %v1851_v40 = vmax.f32 %v4464_v15, %v4476_v39  ;;  %v4488_v24 = vsel %vm5143_vm14, %v4417_v63, %v1831_v37 }
 0xe14   : >> { %v1852_v20 = vmax.f32 %v1848_v48, %v1849_v31 }
 0xe15   : >> { %v1853_v62 = vmax.f32 %v1850_v55, %v1851_v40 }
 0xe17   : >> { %v1854_v56 = vmax.f32 %v1852_v20, %v1853_v62 }
 0xe19   : >> { %1855 = vmax.xlane.f32.xlu1 %v1854_v56 }
 0xea6   : >> { %v4490_v26 = vpop.xlane.xlu1 %1855 }
 0xea7   : >> { %vm1857_vm11 = vcmp.eq.f32.partialorder %v4454_v34, %v4490_v26  ;;  %vm1858_vm12 = vcmp.eq.f32.partialorder %v4457_v14, %v4490_v26  ;;  %vm1859_vm0 = vcmp.eq.f32.partialorder %v4460_v45, %v4490_v26  ;;  %vm1860_vm1 = vcmp.eq.f32.partialorder %v4464_v15, %v4490_v26 }
 0xea8   : >> { %vm1861_vm2 = vcmp.eq.f32.partialorder %v4467_v51, %v4490_v26  ;;  %vm1862_vm4 = vcmp.eq.f32.partialorder %v4470_v57, %v4490_v26  ;;  %vm1863_vm5 = vcmp.eq.f32.partialorder %v4473_v38, %v4490_v26  ;;  %vm1864_vm6 = vcmp.eq.f32.partialorder %v4476_v39, %v4490_v26 }
 0xea9   : >> { %v1865_v63 = vsel %vm1857_vm11, %v3927_v41, 1024  ;;  %v1866_v53 = vsel %vm1858_vm12, %v3930_v42, 1024  ;;  %v1867_v1 = vsel %vm1859_vm0, %v3933_v18, 1024  ;;  %v1868_v0 = vsel %vm1860_vm1, %v3936_v43, 1024 }
 0xeaa   : >> { %v1869_v6 = vsel %vm1861_vm2, %v3939_v35, 1024  ;;  %v1870_v7 = vsel %vm1862_vm4, %v3942_v36, 1024  ;;  %v1871_v49 = vsel %vm1863_vm5, %v3945_v46, 1024  ;;  %v1872_v60 = vsel %vm1864_vm6, %v3948_v47, 1024 }
 0xeab   : >> { %vm1873_vm7 = vcmp.lt.s32.totalorder %v1865_v63, %v1869_v6  ;;  %vm1875_vm8 = vcmp.lt.s32.totalorder %v1866_v53, %v1870_v7  ;;  %vm1877_vm10 = vcmp.lt.s32.totalorder %v1867_v1, %v1871_v49  ;;  %vm1879_vm14 = vcmp.lt.s32.totalorder %v1868_v0, %v1872_v60 }
 0xeac   : >> { %v1874_v8 = vsel %vm1873_vm7, %v1865_v63, %v1869_v6  ;;  %v1876_v11 = vsel %vm1875_vm8, %v1866_v53, %v1870_v7  ;;  %v1878_v61 = vsel %vm1877_vm10, %v1867_v1, %v1871_v49  ;;  %v1880_v13 = vsel %vm1879_vm14, %v1868_v0, %v1872_v60 }
 0xead   : >> { %vm1881_vm11 = vcmp.lt.s32.totalorder %v1874_v8, %v1876_v11  ;;  %vm1883_vm12 = vcmp.lt.s32.totalorder %v1878_v61, %v1880_v13  ;;  %vm5144_vm14 = vcmask 56320  }
 0xeae   : >> { %v1882_v44 = vsel %vm1881_vm11, %v1874_v8, %v1876_v11  ;;  %v1884_v16 = vsel %vm1883_vm12, %v1878_v61, %v1880_v13 }
 0xeaf   : >> { %vm1885_vm0 = vcmp.lt.s32.totalorder %v1882_v44, %v1884_v16 }
 0xeb0   : >> { %v1886_v3 = vsel %vm1885_vm0, %v1882_v44, %v1884_v16 }
 0xeb1   : >> { %v1888_v59 = vshra.s32 %v1886_v3, 16  ;;  %v1887_v4 = vand.u32 65535, %v1886_v3 }
 0xeb3   : >> { %v1890_v22 = vcvt.s32.f32 %v1888_v59  ;;  %v1889_v25 = vcvt.s32.f32 %v1887_v4 }
 0xeb5   : >> { %1891 = vmin.xlane.f32.xlu0 %v1890_v22 }
 0xf42   : >> { %v1892_v23 = vpop.xlane.xlu0 %1891 }
 0xf43   : >> { %vm1893_vm1 = vcmp.eq.f32.partialorder %v1890_v22, %v1892_v23  ;;  %v1898_v5 = vcvt.f32.s32 %v1892_v23 }
 0xf44   : >> { %v1894_v27 = vsel %vm1893_vm1, %v1889_v25, inf }
 0xf45   : >> { %1895 = vmin.xlane.f32.xlu1 %v1894_v27  ;;  %v1899_v12 = vshll.u32 %v1898_v5, 16 }
 0xfd2   : >> { %v1896_v17 = vpop.xlane.xlu1 %1895 }
 0xfd3   : >> { %v1897_v30 = vcvt.f32.s32 %v1896_v17 }
 0xfd5   : >> { %v1900_v10 = vadd.s32 %v1899_v12, %v1897_v30 }
 0xfd7   : >> { %vm1902_vm2 = vcmp.eq.s32.totalorder %v3927_v41, %v1900_v10  ;;  %vm1903_vm4 = vcmp.eq.s32.totalorder %v3930_v42, %v1900_v10  ;;  %vm1904_vm5 = vcmp.eq.s32.totalorder %v3933_v18, %v1900_v10  ;;  %vm1905_vm6 = vcmp.eq.s32.totalorder %v3936_v43, %v1900_v10 }
 0xfd8   : >> { %vm1906_vm7 = vcmp.eq.s32.totalorder %v3939_v35, %v1900_v10  ;;  %vm1907_vm8 = vcmp.eq.s32.totalorder %v3942_v36, %v1900_v10  ;;  %vm1908_vm10 = vcmp.eq.s32.totalorder %v3945_v46, %v1900_v10  ;;  %vm1909_vm11 = vcmp.eq.s32.totalorder %v3948_v47, %v1900_v10 }
 0xfd9   : >> { %v4525_v9 = vsel %vm1902_vm2, -1e+30, %v4454_v34  ;;  %v4528_v2 = vsel %vm1903_vm4, -1e+30, %v4457_v14  ;;  %v4531_v32 = vsel %vm1904_vm5, -1e+30, %v4460_v45  ;;  %v1901_v29 = vadd.s32 %v1900_v10, %v4087_v19 }
 0xfda   : >> { %v4535_v37 = vsel %vm1905_vm6, -1e+30, %v4464_v15  ;;  %v4538_v48 = vsel %vm1906_vm7, -1e+30, %v4467_v51  ;;  %v4541_v31 = vsel %vm1907_vm8, -1e+30, %v4470_v57 }
 0xfdb   : >> { %v4544_v34 = vsel %vm1908_vm10, -1e+30, %v4473_v38  ;;  %v4547_v14 = vsel %vm1909_vm11, -1e+30, %v4476_v39  ;;  %v1918_v45 = vmax.f32 %v4525_v9, %v4538_v48  ;;  %v1919_v55 = vmax.f32 %v4528_v2, %v4541_v31 }
 0xfdc   : >> { %v1920_v15 = vmax.f32 %v4531_v32, %v4544_v34  ;;  %v1921_v51 = vmax.f32 %v4535_v37, %v4547_v14  ;;  %v4559_v57 = vsel %vm5144_vm14, %v4488_v24, %v1901_v29 }
 0xfdd   : >> { %v1922_v38 = vmax.f32 %v1918_v45, %v1919_v55 }
 0xfde   : >> { %v1923_v40 = vmax.f32 %v1920_v15, %v1921_v51 }
 0xfe0   : >> { %v1924_v39 = vmax.f32 %v1922_v38, %v1923_v40  ;;  %v2043_v40 = vsel %vm2042_vm9, %v3983_v54, %v4059_v50 }
 0xfe2   : >> { %1925 = vmax.xlane.f32.xlu0 %v1924_v39  ;;  %v2045_v39 = vsel %vm2044_vm3, %v2043_v40, %v4135_v33  ;;  %v2073_v33 = vld [vmem:[%s2072_s13] sm:$0xff] }
0x106f   : >> { %v4561_v20 = vpop.xlane.xlu0 %1925 }
0x1070   : >> { %vm1927_vm12 = vcmp.eq.f32.partialorder %v4525_v9, %v4561_v20  ;;  %vm1928_vm0 = vcmp.eq.f32.partialorder %v4528_v2, %v4561_v20  ;;  %vm1929_vm1 = vcmp.eq.f32.partialorder %v4531_v32, %v4561_v20  ;;  %vm1930_vm2 = vcmp.eq.f32.partialorder %v4535_v37, %v4561_v20 }
0x1071   : >> { %vm1931_vm4 = vcmp.eq.f32.partialorder %v4538_v48, %v4561_v20  ;;  %vm1932_vm5 = vcmp.eq.f32.partialorder %v4541_v31, %v4561_v20  ;;  %vm1933_vm6 = vcmp.eq.f32.partialorder %v4544_v34, %v4561_v20  ;;  %vm1934_vm7 = vcmp.eq.f32.partialorder %v4547_v14, %v4561_v20 }
0x1072   : >> { %v1935_v24 = vsel %vm1927_vm12, %v3927_v41, 1024  ;;  %v1936_v62 = vsel %vm1928_vm0, %v3930_v42, 1024  ;;  %v1937_v56 = vsel %vm1929_vm1, %v3933_v18, 1024  ;;  %v1938_v63 = vsel %vm1930_vm2, %v3936_v43, 1024 }
0x1073   : >> { %v1939_v53 = vsel %vm1931_vm4, %v3939_v35, 1024  ;;  %v1940_v1 = vsel %vm1932_vm5, %v3942_v36, 1024  ;;  %v1941_v0 = vsel %vm1933_vm6, %v3945_v46, 1024  ;;  %v1942_v6 = vsel %vm1934_vm7, %v3948_v47, 1024 }
0x1074   : >> { %vm1943_vm8 = vcmp.lt.s32.totalorder %v1935_v24, %v1939_v53  ;;  %vm1945_vm10 = vcmp.lt.s32.totalorder %v1936_v62, %v1940_v1  ;;  %vm1947_vm11 = vcmp.lt.s32.totalorder %v1937_v56, %v1941_v0  ;;  %vm1949_vm14 = vcmp.lt.s32.totalorder %v1938_v63, %v1942_v6 }
0x1075   : >> { %v1944_v7 = vsel %vm1943_vm8, %v1935_v24, %v1939_v53  ;;  %v1946_v49 = vsel %vm1945_vm10, %v1936_v62, %v1940_v1  ;;  %v1948_v60 = vsel %vm1947_vm11, %v1937_v56, %v1941_v0  ;;  %v1950_v8 = vsel %vm1949_vm14, %v1938_v63, %v1942_v6 }
0x1076   : >> { %vm1951_vm12 = vcmp.lt.s32.totalorder %v1944_v7, %v1946_v49  ;;  %vm1953_vm0 = vcmp.lt.s32.totalorder %v1948_v60, %v1950_v8  ;;  %vm5163_vm14 = vcmask 64512   ;;  %v2047_v24 = vsel %vm2046_vm15, %v2045_v39, %v4206_v28 }
0x1077   : >> { %v1952_v11 = vsel %vm1951_vm12, %v1944_v7, %v1946_v49  ;;  %v1954_v61 = vsel %vm1953_vm0, %v1948_v60, %v1950_v8  ;;  %vm5203_vm0 = vcmask 39936  }
0x1078   : >> { %vm1955_vm1 = vcmp.lt.s32.totalorder %v1952_v11, %v1954_v61 }
0x1079   : >> { %v1956_v13 = vsel %vm1955_vm1, %v1952_v11, %v1954_v61  ;;  %vm5204_vm1 = vcmask 48128  }
0x107a   : >> { %v1958_v44 = vshra.s32 %v1956_v13, 16  ;;  %v1957_v3 = vand.u32 65535, %v1956_v13 }
0x107c   : >> { %v1960_v16 = vcvt.s32.f32 %v1958_v44  ;;  %v1959_v22 = vcvt.s32.f32 %v1957_v3 }
0x107e   : >> { %1961 = vmin.xlane.f32.xlu1 %v1960_v16 }
0x110b   : >> { %v1962_v59 = vpop.xlane.xlu1 %1961 }
0x110c   : >> { %vm1963_vm2 = vcmp.eq.f32.partialorder %v1960_v16, %v1962_v59  ;;  %v1968_v23 = vcvt.f32.s32 %v1962_v59 }
0x110d   : >> { %v1964_v4 = vsel %vm1963_vm2, %v1959_v22, inf  ;;  %vm5162_vm2 = vcmask 72704  }
0x110e   : >> { %1965 = vmin.xlane.f32.xlu0 %v1964_v4  ;;  %v1969_v27 = vshll.u32 %v1968_v23, 16 }
0x119b   : >> { %v1966_v25 = vpop.xlane.xlu0 %1965 }
0x119c   : >> { %v1967_v5 = vcvt.f32.s32 %v1966_v25 }
0x119e   : >> { %v1970_v17 = vadd.s32 %v1969_v27, %v1967_v5 }
0x11a0   : >> { %vm1972_vm4 = vcmp.eq.s32.totalorder %v3927_v41, %v1970_v17  ;;  %vm1973_vm5 = vcmp.eq.s32.totalorder %v3930_v42, %v1970_v17  ;;  %vm1974_vm6 = vcmp.eq.s32.totalorder %v3933_v18, %v1970_v17  ;;  %vm1975_vm7 = vcmp.eq.s32.totalorder %v3936_v43, %v1970_v17 }
0x11a1   : >> { %vm1976_vm8 = vcmp.eq.s32.totalorder %v3939_v35, %v1970_v17  ;;  %vm1977_vm10 = vcmp.eq.s32.totalorder %v3942_v36, %v1970_v17  ;;  %vm1978_vm11 = vcmp.eq.s32.totalorder %v3945_v46, %v1970_v17  ;;  %vm1979_vm12 = vcmp.eq.s32.totalorder %v3948_v47, %v1970_v17 }
0x11a2   : >> { %v4596_v12 = vsel %vm1972_vm4, -1e+30, %v4525_v9  ;;  %v4599_v30 = vsel %vm1973_vm5, -1e+30, %v4528_v2  ;;  %v4602_v10 = vsel %vm1974_vm6, -1e+30, %v4531_v32  ;;  %v1971_v29 = vadd.s32 %v1970_v17, %v4087_v19 }
0x11a3   : >> { %v4606_v45 = vsel %vm1975_vm7, -1e+30, %v4535_v37  ;;  %v4609_v55 = vsel %vm1976_vm8, -1e+30, %v4538_v48  ;;  %v4612_v15 = vsel %vm1977_vm10, -1e+30, %v4541_v31 }
0x11a4   : >> { %v4615_v9 = vsel %vm1978_vm11, -1e+30, %v4544_v34  ;;  %v4618_v2 = vsel %vm1979_vm12, -1e+30, %v4547_v14  ;;  %v1988_v32 = vmax.f32 %v4596_v12, %v4609_v55  ;;  %v1989_v51 = vmax.f32 %v4599_v30, %v4612_v15 }
0x11a5   : >> { %v1990_v37 = vmax.f32 %v4602_v10, %v4615_v9  ;;  %v1991_v48 = vmax.f32 %v4606_v45, %v4618_v2  ;;  %v4630_v31 = vsel %vm5163_vm14, %v4559_v57, %v1971_v29  ;;  %v2049_v57 = vsel %vm2048_vm13, %v2047_v24, %v4277_v21 }
0x11a6   : >> { %v1992_v34 = vmax.f32 %v1988_v32, %v1989_v51  ;;  %v2051_v62 = vsel %vm5203_vm0, %v2049_v57, %v4348_v52  ;;  %vm5205_vm4 = vcmask 56320   ;;  %vm5161_vm5 = vcmask 80896  }
0x11a7   : >> { %v1993_v14 = vmax.f32 %v1990_v37, %v1991_v48  ;;  %v2053_v56 = vsel %vm5204_vm1, %v2051_v62, %v4419_v58 }
0x11a8   : >> { %v2055_v63 = vsel %vm5205_vm4, %v2053_v56, %v4490_v26 }
0x11a9   : >> { %v1994_v38 = vmax.f32 %v1992_v34, %v1993_v14  ;;  %v2057_v50 = vsel %vm5163_vm14, %v2055_v63, %v4561_v20 }
0x11ab   : >> { %1995 = vmax.xlane.f32.xlu1 %v1994_v38 }
0x1238   : >> { %v4647_v54 = vpop.xlane.xlu1 %1995 }
0x1239   : >> { %v2059_v28 = vsel %vm5162_vm2, %v2057_v50, %v4647_v54 }
0x123a   : >> { %v2061_v21 = vsel %vm5161_vm5, %v2059_v28, -1e+30 }
0x123b   : >> { %v2076_v52 = vmax.f32 %v2073_v33, %v2061_v21 }
0x123d   : >> { %2077 = vmax.xlane.f32.xlu0 %v2076_v52 }
0x12ca   : >> { %v4657_v58 = vpop.xlane.xlu0 %2077 }
0x12cb   : >> { %vm2079_vm6 = vcmp.eq.f32.partialorder %v2073_v33, %v4657_v58  ;;  %vm2080_vm7 = vcmp.eq.f32.partialorder %v2061_v21, %v4657_v58 }
0x12cc   : >> { %v2081_v26 = vsel %vm2079_vm6, %v3927_v41, 256  ;;  %v2082_v20 = vsel %vm2080_vm7, %v3930_v42, 256 }
0x12cd   : >> { %vm2083_vm8 = vcmp.lt.s32.totalorder %v2081_v26, %v2082_v20 }
0x12ce   : >> { %v2084_v53 = vsel %vm2083_vm8, %v2081_v26, %v2082_v20 }
0x12cf   : >> { %v2086_v1 = vshra.s32 %v2084_v53, 16  ;;  %v2085_v6 = vand.u32 65535, %v2084_v53 }
0x12d1   : >> { %v2088_v0 = vcvt.s32.f32 %v2086_v1  ;;  %v2087_v49 = vcvt.s32.f32 %v2085_v6 }
0x12d3   : >> { %2089 = vmin.xlane.f32.xlu1 %v2088_v0 }
0x1360   : >> { %v2090_v7 = vpop.xlane.xlu1 %2089 }
0x1361   : >> { %vm2091_vm10 = vcmp.eq.f32.partialorder %v2088_v0, %v2090_v7  ;;  %v2096_v8 = vcvt.f32.s32 %v2090_v7 }
0x1362   : >> { %v2092_v60 = vsel %vm2091_vm10, %v2087_v49, inf }
0x1363   : >> { %2093 = vmin.xlane.f32.xlu0 %v2092_v60  ;;  %v2097_v61 = vshll.u32 %v2096_v8, 16 }
0x13f0   : >> { %v2094_v11 = vpop.xlane.xlu0 %2093 }
0x13f1   : >> { %v2095_v13 = vcvt.f32.s32 %v2094_v11 }
0x13f3   : >> { %v4663_v44 = vadd.s32 %v2097_v61, %v2095_v13 }
0x13f5   : >> { %vm5160_vm11 = vcmp.eq.s32.totalorder %v3927_v41, %v4663_v44  ;;  %vm5159_vm12 = vcmp.eq.s32.totalorder %v3930_v42, %v4663_v44 }
0x13f6   : >> { %v2116_v16 = vsel %vm5160_vm11, -1e+30, %v2073_v33  ;;  %v2117_v3 = vsel %vm5159_vm12, -1e+30, %v2061_v21  ;;  %vm2004_vm12 = vcmp.eq.f32.partialorder %v4618_v2, %v4647_v54 }
0x13f7   : >> { %v2118_v59 = vmax.f32 %v2116_v16, %v2117_v3 }
0x13f9   : >> { %2119 = vmax.xlane.f32.xlu1 %v2118_v59 }
0x1486   : >> { %v4675_v22 = vpop.xlane.xlu1 %2119 }
0x1487   : >> { %vm2121_vm0 = vcmp.eq.f32.partialorder %v2116_v16, %v4675_v22  ;;  %vm2122_vm1 = vcmp.eq.f32.partialorder %v2117_v3, %v4675_v22 }
0x1488   : >> { %v2123_v4 = vsel %vm2121_vm0, %v3927_v41, 256  ;;  %v2124_v23 = vsel %vm2122_vm1, %v3930_v42, 256 }
0x1489   : >> { %vm2125_vm4 = vcmp.lt.s32.totalorder %v2123_v4, %v2124_v23 }
0x148a   : >> { %v2126_v25 = vsel %vm2125_vm4, %v2123_v4, %v2124_v23 }
0x148b   : >> { %v2128_v27 = vshra.s32 %v2126_v25, 16  ;;  %v2127_v17 = vand.u32 65535, %v2126_v25 }
0x148d   : >> { %v2130_v5 = vcvt.s32.f32 %v2128_v27  ;;  %v2129_v32 = vcvt.s32.f32 %v2127_v17 }
0x148f   : >> { %2131 = vmin.xlane.f32.xlu0 %v2130_v5 }
0x151c   : >> { %v2132_v29 = vpop.xlane.xlu0 %2131 }
0x151d   : >> { %vm2133_vm6 = vcmp.eq.f32.partialorder %v2130_v5, %v2132_v29  ;;  %v2138_v37 = vcvt.f32.s32 %v2132_v29 }
0x151e   : >> { %v2134_v51 = vsel %vm2133_vm6, %v2129_v32, inf }
0x151f   : >> { %2135 = vmin.xlane.f32.xlu1 %v2134_v51  ;;  %v2139_v34 = vshll.u32 %v2138_v37, 16 }
0x15ac   : >> { %v2136_v48 = vpop.xlane.xlu1 %2135 }
0x15ad   : >> { %v2137_v14 = vcvt.f32.s32 %v2136_v48 }
0x15af   : >> { %v4681_v38 = vadd.s32 %v2139_v34, %v2137_v14 }
0x15b1   : >> { %vm5145_vm7 = vcmp.eq.s32.totalorder %v3927_v41, %v4681_v38  ;;  %vm5146_vm8 = vcmp.eq.s32.totalorder %v3930_v42, %v4681_v38 }
0x15b2   : >> { %v2158_v40 = vsel %vm5145_vm7, -1e+30, %v2116_v16  ;;  %v2159_v39 = vsel %vm5146_vm8, -1e+30, %v2117_v3 }
0x15b3   : >> { %v2160_v24 = vmax.f32 %v2158_v40, %v2159_v39 }
0x15b5   : >> { %2161 = vmax.xlane.f32.xlu0 %v2160_v24 }
0x1642   : >> { %v4693_v57 = vpop.xlane.xlu0 %2161 }
0x1643   : >> { %vm2163_vm10 = vcmp.eq.f32.partialorder %v2158_v40, %v4693_v57  ;;  %vm2164_vm0 = vcmp.eq.f32.partialorder %v2159_v39, %v4693_v57 }
0x1644   : >> { %v2165_v62 = vsel %vm2163_vm10, %v3927_v41, 256  ;;  %v2166_v56 = vsel %vm2164_vm0, %v3930_v42, 256 }
0x1645   : >> { %vm2167_vm1 = vcmp.lt.s32.totalorder %v2165_v62, %v2166_v56 }
0x1646   : >> { %v2168_v63 = vsel %vm2167_vm1, %v2165_v62, %v2166_v56 }
0x1647   : >> { %v2170_v50 = vshra.s32 %v2168_v63, 16  ;;  %v2169_v28 = vand.u32 65535, %v2168_v63 }
0x1649   : >> { %v2172_v33 = vcvt.s32.f32 %v2170_v50  ;;  %v2171_v52 = vcvt.s32.f32 %v2169_v28 }
0x164b   : >> { %2173 = vmin.xlane.f32.xlu1 %v2172_v33 }
0x16d8   : >> { %v2174_v21 = vpop.xlane.xlu1 %2173 }
0x16d9   : >> { %vm2175_vm4 = vcmp.eq.f32.partialorder %v2172_v33, %v2174_v21  ;;  %v2180_v20 = vcvt.f32.s32 %v2174_v21 }
0x16da   : >> { %v2176_v26 = vsel %vm2175_vm4, %v2171_v52, inf }
0x16db   : >> { %2177 = vmin.xlane.f32.xlu0 %v2176_v26  ;;  %v2181_v1 = vshll.u32 %v2180_v20, 16 }
0x1768   : >> { %v2178_v53 = vpop.xlane.xlu0 %2177 }
0x1769   : >> { %v2179_v0 = vcvt.f32.s32 %v2178_v53 }
0x176b   : >> { %v4699_v6 = vadd.s32 %v2181_v1, %v2179_v0 }
0x176d   : >> { %vm5158_vm6 = vcmp.eq.s32.totalorder %v3927_v41, %v4699_v6  ;;  %vm5157_vm10 = vcmp.eq.s32.totalorder %v3930_v42, %v4699_v6 }
0x176e   : >> { %v2200_v7 = vsel %vm5158_vm6, -1e+30, %v2158_v40  ;;  %v2201_v49 = vsel %vm5157_vm10, -1e+30, %v2159_v39  ;;  %vm1999_vm10 = vcmp.eq.f32.partialorder %v4602_v10, %v4647_v54  ;;  %vm2000_vm6 = vcmp.eq.f32.partialorder %v4606_v45, %v4647_v54 }
0x176f   : >> { %v2202_v60 = vmax.f32 %v2200_v7, %v2201_v49  ;;  %v2007_v10 = vsel %vm1999_vm10, %v3933_v18, 1024  ;;  %v2008_v45 = vsel %vm2000_vm6, %v3936_v43, 1024 }
0x1771   : >> { %2203 = vmax.xlane.f32.xlu1 %v2202_v60 }
0x17fe   : >> { %v4711_v8 = vpop.xlane.xlu1 %2203 }
0x17ff   : >> { %vm2205_vm0 = vcmp.eq.f32.partialorder %v2200_v7, %v4711_v8  ;;  %vm2206_vm1 = vcmp.eq.f32.partialorder %v2201_v49, %v4711_v8 }
0x1800   : >> { %v2207_v11 = vsel %vm2205_vm0, %v3927_v41, 256  ;;  %v2208_v61 = vsel %vm2206_vm1, %v3930_v42, 256 }
0x1801   : >> { %vm2209_vm4 = vcmp.lt.s32.totalorder %v2207_v11, %v2208_v61 }
0x1802   : >> { %v2210_v13 = vsel %vm2209_vm4, %v2207_v11, %v2208_v61 }
0x1803   : >> { %v2212_v16 = vshra.s32 %v2210_v13, 16  ;;  %v2211_v59 = vand.u32 65535, %v2210_v13 }
0x1805   : >> { %v2214_v3 = vcvt.s32.f32 %v2212_v16  ;;  %v2213_v23 = vcvt.s32.f32 %v2211_v59 }
0x1807   : >> { %2215 = vmin.xlane.f32.xlu0 %v2214_v3 }
0x1894   : >> { %v2216_v4 = vpop.xlane.xlu0 %2215 }
0x1895   : >> { %vm2217_vm7 = vcmp.eq.f32.partialorder %v2214_v3, %v2216_v4  ;;  %v2222_v27 = vcvt.f32.s32 %v2216_v4 }
0x1896   : >> { %v2218_v25 = vsel %vm2217_vm7, %v2213_v23, inf }
0x1897   : >> { %2219 = vmin.xlane.f32.xlu1 %v2218_v25  ;;  %v2223_v17 = vshll.u32 %v2222_v27, 16 }
0x1924   : >> { %v2220_v5 = vpop.xlane.xlu1 %2219 }
0x1925   : >> { %v2221_v29 = vcvt.f32.s32 %v2220_v5 }
0x1927   : >> { %v4717_v32 = vadd.s32 %v2223_v17, %v2221_v29 }
0x1929   : >> { %vm5147_vm0 = vcmp.eq.s32.totalorder %v3927_v41, %v4717_v32  ;;  %vm5148_vm1 = vcmp.eq.s32.totalorder %v3930_v42, %v4717_v32 }
0x192a   : >> { %v2242_v51 = vsel %vm5147_vm0, -1e+30, %v2200_v7  ;;  %v2243_v37 = vsel %vm5148_vm1, -1e+30, %v2201_v49 }
0x192b   : >> { %v2244_v48 = vmax.f32 %v2242_v51, %v2243_v37 }
0x192d   : >> { %2245 = vmax.xlane.f32.xlu0 %v2244_v48 }
0x19ba   : >> { %v4729_v34 = vpop.xlane.xlu0 %2245 }
0x19bb   : >> { %vm2247_vm7 = vcmp.eq.f32.partialorder %v2242_v51, %v4729_v34  ;;  %vm2248_vm4 = vcmp.eq.f32.partialorder %v2243_v37, %v4729_v34 }
0x19bc   : >> { %v2249_v14 = vsel %vm2247_vm7, %v3927_v41, 256  ;;  %v2250_v40 = vsel %vm2248_vm4, %v3930_v42, 256 }
0x19bd   : >> { %vm2251_vm8 = vcmp.lt.s32.totalorder %v2249_v14, %v2250_v40 }
0x19be   : >> { %v2252_v39 = vsel %vm2251_vm8, %v2249_v14, %v2250_v40 }
0x19bf   : >> { %v2254_v24 = vshra.s32 %v2252_v39, 16  ;;  %v2253_v56 = vand.u32 65535, %v2252_v39 }
0x19c1   : >> { %v2256_v62 = vcvt.s32.f32 %v2254_v24  ;;  %v2255_v50 = vcvt.s32.f32 %v2253_v56 }
0x19c3   : >> { %2257 = vmin.xlane.f32.xlu1 %v2256_v62 }
0x1a50   : >> { %v2258_v63 = vpop.xlane.xlu1 %2257 }
0x1a51   : >> { %vm2259_vm0 = vcmp.eq.f32.partialorder %v2256_v62, %v2258_v63  ;;  %v2264_v28 = vcvt.f32.s32 %v2258_v63 }
0x1a52   : >> { %v2260_v33 = vsel %vm2259_vm0, %v2255_v50, inf }
0x1a53   : >> { %2261 = vmin.xlane.f32.xlu0 %v2260_v33  ;;  %v2265_v52 = vshll.u32 %v2264_v28, 16 }
0x1ae0   : >> { %v2262_v21 = vpop.xlane.xlu0 %2261 }
0x1ae1   : >> { %v2263_v26 = vcvt.f32.s32 %v2262_v21 }
0x1ae3   : >> { %v4735_v20 = vadd.s32 %v2265_v52, %v2263_v26 }
0x1ae5   : >> { %vm5149_vm7 = vcmp.eq.s32.totalorder %v3927_v41, %v4735_v20  ;;  %vm5150_vm8 = vcmp.eq.s32.totalorder %v3930_v42, %v4735_v20 }
0x1ae6   : >> { %v2284_v53 = vsel %vm5149_vm7, -1e+30, %v2242_v51  ;;  %v2285_v1 = vsel %vm5150_vm8, -1e+30, %v2243_v37 }
0x1ae7   : >> { %v2286_v0 = vmax.f32 %v2284_v53, %v2285_v1 }
0x1ae9   : >> { %2287 = vmax.xlane.f32.xlu1 %v2286_v0 }
0x1b76   : >> { %v4747_v7 = vpop.xlane.xlu1 %2287 }
0x1b77   : >> { %vm2289_vm0 = vcmp.eq.f32.partialorder %v2284_v53, %v4747_v7  ;;  %vm2290_vm4 = vcmp.eq.f32.partialorder %v2285_v1, %v4747_v7 }
0x1b78   : >> { %v2291_v49 = vsel %vm2289_vm0, %v3927_v41, 256  ;;  %v2292_v60 = vsel %vm2290_vm4, %v3930_v42, 256 }
0x1b79   : >> { %vm2293_vm1 = vcmp.lt.s32.totalorder %v2291_v49, %v2292_v60 }
0x1b7a   : >> { %v2294_v11 = vsel %vm2293_vm1, %v2291_v49, %v2292_v60 }
0x1b7b   : >> { %v2296_v61 = vshra.s32 %v2294_v11, 16  ;;  %v2295_v16 = vand.u32 65535, %v2294_v11 }
0x1b7d   : >> { %v2298_v13 = vcvt.s32.f32 %v2296_v61  ;;  %v2297_v59 = vcvt.s32.f32 %v2295_v16 }
0x1b7f   : >> { %2299 = vmin.xlane.f32.xlu0 %v2298_v13 }
0x1c0c   : >> { %v2300_v3 = vpop.xlane.xlu0 %2299 }
0x1c0d   : >> { %vm2301_vm7 = vcmp.eq.f32.partialorder %v2298_v13, %v2300_v3  ;;  %v2306_v23 = vcvt.f32.s32 %v2300_v3 }
0x1c0e   : >> { %v2302_v4 = vsel %vm2301_vm7, %v2297_v59, inf }
0x1c0f   : >> { %2303 = vmin.xlane.f32.xlu1 %v2302_v4  ;;  %v2307_v27 = vshll.u32 %v2306_v23, 16 }
0x1c9c   : >> { %v2304_v25 = vpop.xlane.xlu1 %2303 }
0x1c9d   : >> { %v2305_v5 = vcvt.f32.s32 %v2304_v25 }
0x1c9f   : >> { %v4753_v17 = vadd.s32 %v2307_v27, %v2305_v5 }
0x1ca1   : >> { %vm5151_vm0 = vcmp.eq.s32.totalorder %v3927_v41, %v4753_v17  ;;  %vm5152_vm1 = vcmp.eq.s32.totalorder %v3930_v42, %v4753_v17 }
0x1ca2   : >> { %v2326_v29 = vsel %vm5151_vm0, -1e+30, %v2284_v53  ;;  %v2327_v51 = vsel %vm5152_vm1, -1e+30, %v2285_v1 }
0x1ca3   : >> { %v2328_v37 = vmax.f32 %v2326_v29, %v2327_v51 }
0x1ca5   : >> { %2329 = vmax.xlane.f32.xlu0 %v2328_v37 }
0x1d32   : >> { %v4765_v48 = vpop.xlane.xlu0 %2329 }
0x1d33   : >> { %vm2331_vm7 = vcmp.eq.f32.partialorder %v2326_v29, %v4765_v48  ;;  %vm2332_vm4 = vcmp.eq.f32.partialorder %v2327_v51, %v4765_v48 }
0x1d34   : >> { %v2333_v14 = vsel %vm2331_vm7, %v3927_v41, 256  ;;  %v2334_v40 = vsel %vm2332_vm4, %v3930_v42, 256 }
0x1d35   : >> { %vm2335_vm8 = vcmp.lt.s32.totalorder %v2333_v14, %v2334_v40 }
0x1d36   : >> { %v2336_v39 = vsel %vm2335_vm8, %v2333_v14, %v2334_v40 }
0x1d37   : >> { %v2338_v24 = vshra.s32 %v2336_v39, 16  ;;  %v2337_v56 = vand.u32 65535, %v2336_v39 }
0x1d39   : >> { %v2340_v62 = vcvt.s32.f32 %v2338_v24  ;;  %v2339_v50 = vcvt.s32.f32 %v2337_v56 }
0x1d3b   : >> { %2341 = vmin.xlane.f32.xlu1 %v2340_v62 }
0x1dc8   : >> { %v2342_v63 = vpop.xlane.xlu1 %2341 }
0x1dc9   : >> { %vm2343_vm0 = vcmp.eq.f32.partialorder %v2340_v62, %v2342_v63  ;;  %v2348_v28 = vcvt.f32.s32 %v2342_v63 }
0x1dca   : >> { %v2344_v33 = vsel %vm2343_vm0, %v2339_v50, inf }
0x1dcb   : >> { %2345 = vmin.xlane.f32.xlu0 %v2344_v33  ;;  %v2349_v52 = vshll.u32 %v2348_v28, 16 }
0x1e58   : >> { %v2346_v21 = vpop.xlane.xlu0 %2345 }
0x1e59   : >> { %v2347_v26 = vcvt.f32.s32 %v2346_v21  ;;  %v2012_v21 = vsel %vm2004_vm12, %v3948_v47, 1024  ;;  %vm5207_vm12 = vcmask 48128  }
0x1e5a   : >> { %vm2019_vm14 = vcmp.lt.s32.totalorder %v2008_v45, %v2012_v21 }
0x1e5b   : >> { %v4771_v53 = vadd.s32 %v2349_v52, %v2347_v26  ;;  %v2020_v52 = vsel %vm2019_vm14, %v2008_v45, %v2012_v21 }
0x1e5d   : >> { %vm5153_vm7 = vcmp.eq.s32.totalorder %v3927_v41, %v4771_v53  ;;  %vm5156_vm8 = vcmp.eq.s32.totalorder %v3930_v42, %v4771_v53 }
0x1e5e   : >> { %v2368_v1 = vsel %vm5153_vm7, -1e+30, %v2326_v29  ;;  %v2369_v0 = vsel %vm5156_vm8, -1e+30, %v2327_v51  ;;  %vm1998_vm8 = vcmp.eq.f32.partialorder %v4599_v30, %v4647_v54 }
0x1e5f   : >> { %v2370_v49 = vmax.f32 %v2368_v1, %v2369_v0  ;;  %v2006_v30 = vsel %vm1998_vm8, %v3930_v42, 1024 }
0x1e61   : >> { %2371 = vmax.xlane.f32.xlu1 %v2370_v49 }
0x1eee   : >> { %v4783_v60 = vpop.xlane.xlu1 %2371 }
0x1eef   : >> { %vm2373_vm0 = vcmp.eq.f32.partialorder %v2368_v1, %v4783_v60  ;;  %vm2374_vm4 = vcmp.eq.f32.partialorder %v2369_v0, %v4783_v60 }
0x1ef0   : >> { %v2375_v11 = vsel %vm2373_vm0, %v3927_v41, 256  ;;  %v2376_v61 = vsel %vm2374_vm4, %v3930_v42, 256 }
0x1ef1   : >> { %vm2377_vm1 = vcmp.lt.s32.totalorder %v2375_v11, %v2376_v61 }
0x1ef2   : >> { %v2378_v13 = vsel %vm2377_vm1, %v2375_v11, %v2376_v61 }
0x1ef3   : >> { %v2380_v16 = vshra.s32 %v2378_v13, 16  ;;  %v2379_v59 = vand.u32 65535, %v2378_v13 }
0x1ef5   : >> { %v2382_v3 = vcvt.s32.f32 %v2380_v16  ;;  %v2381_v23 = vcvt.s32.f32 %v2379_v59 }
0x1ef7   : >> { %2383 = vmin.xlane.f32.xlu0 %v2382_v3 }
0x1f84   : >> { %v2384_v4 = vpop.xlane.xlu0 %2383 }
0x1f85   : >> { %vm2385_vm7 = vcmp.eq.f32.partialorder %v2382_v3, %v2384_v4  ;;  %v2390_v27 = vcvt.f32.s32 %v2384_v4 }
0x1f86   : >> { %v2386_v25 = vsel %vm2385_vm7, %v2381_v23, inf }
0x1f87   : >> { %2387 = vmin.xlane.f32.xlu1 %v2386_v25  ;;  %v2391_v29 = vshll.u32 %v2390_v27, 16 }
0x2014   : >> { %v2388_v5 = vpop.xlane.xlu1 %2387 }
0x2015   : >> { %v2389_v51 = vcvt.f32.s32 %v2388_v5 }
0x2017   : >> { %v4789_v37 = vadd.s32 %v2391_v29, %v2389_v51 }
0x2019   : >> { %vm5154_vm0 = vcmp.eq.s32.totalorder %v3927_v41, %v4789_v37  ;;  %vm5155_vm1 = vcmp.eq.s32.totalorder %v3930_v42, %v4789_v37 }
0x201a   : >> { %v4798_v14 = vsel %vm5154_vm0, -1e+30, %v2368_v1  ;;  %v4803_v40 = vsel %vm5155_vm1, -1e+30, %v2369_v0  ;;  %vm1997_vm1 = vcmp.eq.f32.partialorder %v4596_v12, %v4647_v54 }
0x201b   : >> { %v2412_v39 = vmax.f32 %v4798_v14, %v4803_v40  ;;  %v2005_v12 = vsel %vm1997_vm1, %v3927_v41, 1024 }
0x201d   : >> { %2413 = vmax.xlane.f32.xlu0 %v2412_v39 }
0x20aa   : >> { %v4807_v24 = vpop.xlane.xlu0 %2413 }
0x20ab   : >> { %vm2415_vm7 = vcmp.eq.f32.partialorder %v4798_v14, %v4807_v24  ;;  %vm2416_vm4 = vcmp.eq.f32.partialorder %v4803_v40, %v4807_v24 }
0x20ac   : >> { %v2417_v62 = vsel %vm2415_vm7, %v3927_v41, 256  ;;  %v2418_v56 = vsel %vm2416_vm4, %v3930_v42, 256  ;;  %vm2001_vm7 = vcmp.eq.f32.partialorder %v4609_v55, %v4647_v54  ;;  %vm2003_vm4 = vcmp.eq.f32.partialorder %v4615_v9, %v4647_v54 }
0x20ad   : >> { %vm2419_vm0 = vcmp.lt.s32.totalorder %v2417_v62, %v2418_v56  ;;  %v2009_v28 = vsel %vm2001_vm7, %v3939_v35, 1024  ;;  %vm5208_vm7 = vcmask 56320  }
0x20ae   : >> { %v2420_v63 = vsel %vm2419_vm0, %v2417_v62, %v2418_v56  ;;  %vm2002_vm0 = vcmp.eq.f32.partialorder %v4612_v15, %v4647_v54  ;;  %v2011_v15 = vsel %vm2003_vm4, %v3945_v46, 1024  ;;  %vm2013_vm11 = vcmp.lt.s32.totalorder %v2005_v12, %v2009_v28 }
0x20af   : >> { %v2422_v50 = vshra.s32 %v2420_v63, 16  ;;  %v2010_v55 = vsel %vm2002_vm0, %v3942_v36, 1024  ;;  %vm2017_vm2 = vcmp.lt.s32.totalorder %v2007_v10, %v2011_v15  ;;  %v2014_v9 = vsel %vm2013_vm11, %v2005_v12, %v2009_v28 }
0x20b0   : >> { %vm2015_vm5 = vcmp.lt.s32.totalorder %v2006_v30, %v2010_v55  ;;  %v2018_v54 = vsel %vm2017_vm2, %v2007_v10, %v2011_v15  ;;  %v2421_v0 = vand.u32 65535, %v2420_v63  ;;  %vm5206_vm11 = vcmask 39936  }
0x20b1   : >> { %v2424_v33 = vcvt.s32.f32 %v2422_v50  ;;  %v2016_v2 = vsel %vm2015_vm5, %v2006_v30, %v2010_v55  ;;  %vm2023_vm10 = vcmp.lt.s32.totalorder %v2018_v54, %v2020_v52  ;;  %v2494_v50 = vsel %vm2042_vm9, %v4657_v58, %v4675_v22 }
0x20b2   : >> { %vm2021_vm8 = vcmp.lt.s32.totalorder %v2014_v9, %v2016_v2  ;;  %v2024_v1 = vsel %vm2023_vm10, %v2018_v54, %v2020_v52  ;;  %v2423_v61 = vcvt.s32.f32 %v2421_v0  ;;  %vm5209_vm0 = vcmask 64512  }
0x20b3   : >> { %2425 = vmin.xlane.f32.xlu1 %v2424_v33  ;;  %v2022_v26 = vsel %vm2021_vm8, %v2014_v9, %v2016_v2  ;;  %vm5210_vm10 = vcmask 72704  }
0x20b4   : >> { %vm2025_vm6 = vcmp.lt.s32.totalorder %v2022_v26, %v2024_v1 }
0x20b5   : >> { %v2026_v49 = vsel %vm2025_vm6, %v2022_v26, %v2024_v1  ;;  %vm5211_vm6 = vcmask 80896  }
0x20b6   : >> { %v2028_v13 = vshra.s32 %v2026_v49, 16  ;;  %v2027_v23 = vand.u32 65535, %v2026_v49 }
0x20b8   : >> { %v2030_v3 = vcvt.s32.f32 %v2028_v13  ;;  %v2029_v51 = vcvt.s32.f32 %v2027_v23 }
0x2140   : >> { %v2426_v11 = vpop.xlane.xlu1 %2425 }
0x2141   : >> { %vm2427_vm1 = vcmp.eq.f32.partialorder %v2424_v33, %v2426_v11  ;;  %v2432_v59 = vcvt.f32.s32 %v2426_v11  ;;  %v2495_v33 = vsel %vm2044_vm3, %v2494_v50, %v4693_v57 }
0x2142   : >> { %v2428_v16 = vsel %vm2427_vm1, %v2423_v61, inf  ;;  %v2496_v12 = vsel %vm2046_vm15, %v2495_v33, %v4711_v8 }
0x2143   : >> { %2429 = vmin.xlane.f32.xlu0 %v2428_v16  ;;  %v2433_v25 = vshll.u32 %v2432_v59, 16 }
0x2147   : >> { %2031 = vmin.xlane.f32.xlu0 %v2030_v3 }
0x21d0   : >> { %v2430_v4 = vpop.xlane.xlu0 %2429 }
0x21d1   : >> { %v2431_v27 = vcvt.f32.s32 %v2430_v4 }
0x21d3   : >> { %v4839_v5 = vadd.s32 %v2433_v25, %v2431_v27 }
0x21d4   : >> { %v2032_v29 = vpop.xlane.xlu0 %2031 }
0x21d5   : >> { %vm2033_vm14 = vcmp.eq.f32.partialorder %v2030_v3, %v2032_v29  ;;  %vm2435_vm2 = vcmp.eq.s32.totalorder %v3927_v41, %v4839_v5  ;;  %vm2436_vm5 = vcmp.eq.s32.totalorder %v3930_v42, %v4839_v5  ;;  %v2038_v30 = vcvt.f32.s32 %v2032_v29 }
0x21d6   : >> { %v2034_v39 = vsel %vm2033_vm14, %v2029_v51, inf  ;;  %v2452_v62 = vsel %vm2435_vm2, -1e+30, %v4798_v14  ;;  %v2453_v56 = vsel %vm2436_vm5, -1e+30, %v4803_v40  ;;  %v2497_v14 = vsel %vm2048_vm13, %v2496_v12, %v4729_v34  ;;  %vm5212_vm14 = vmmov %vm5210_vm10 }
0x21d7   : >> { %2035 = vmin.xlane.f32.xlu0 %v2034_v39  ;;  %v2454_v63 = vmax.f32 %v2452_v62, %v2453_v56  ;;  %v2498_v40 = vsel %vm5206_vm11, %v2497_v14, %v4747_v7  ;;  %v2039_v22 = vshll.u32 %v2038_v30, 16  ;;  %vm5213_vm11 = vmmov %vm5211_vm6 }
0x21d8   : >> { %v2499_v10 = vsel %vm5207_vm12, %v2498_v40, %v4765_v48  ;;  %vm5214_vm12 = vcmp.eq.s32.totalorder %v3927_v41, %v4663_v44 }
0x21d9   : >> { %2455 = vmax.xlane.f32.xlu1 %v2454_v63  ;;  %v2500_v58 = vsel %vm5208_vm7, %v2499_v10, %v4783_v60  ;;  %v4877_v60 = vld [vmem:[%s2074_s11] sm:$0xff]  ;;  %vm5215_vm7 = vcmp.eq.s32.totalorder %v3930_v42, %v4663_v44 }
0x21da   : >> { %v2501_v8 = vsel %vm5209_vm0, %v2500_v58, %v4807_v24  ;;  %v2101_v52 = vsel %vm5214_vm12, %v4877_v60, 0  ;;  %vm5216_vm0 = vcmp.eq.s32.totalorder %v3927_v41, %v4699_v6  ;;  %vm5224_vm12 = vcmp.eq.s32.totalorder %v3930_v42, %v4753_v17 }
0x2264   : >> { %v2036_v45 = vpop.xlane.xlu0 %2035 }
0x2265   : >> { %v2037_v57 = vcvt.f32.s32 %v2036_v45 }
0x2266   : >> { %v2456_v28 = vpop.xlane.xlu1 %2455 }
0x2267   : >> { %v2040_v34 = vadd.s32 %v2039_v22, %v2037_v57  ;;  %vm2457_vm4 = vcmp.eq.f32.partialorder %v2452_v62, %v2456_v28  ;;  %vm2458_vm8 = vcmp.eq.f32.partialorder %v2453_v56, %v2456_v28  ;;  %v2502_v7 = vsel %vm5210_vm10, %v2501_v8, %v2456_v28 }
0x2268   : >> { %v2459_v55 = vsel %vm2457_vm4, %v3927_v41, 256  ;;  %v2460_v48 = vsel %vm2458_vm8, %v3930_v42, 256  ;;  %v2503_v15 = vsel %vm5211_vm6, %v2502_v7, -1e+30  ;;  %vm5217_vm4 = vcmp.eq.s32.totalorder %v3930_v42, %v4699_v6 }
0x2269   : >> { %v2041_v21 = vadd.s32 %v2040_v34, %v4087_v19  ;;  %vm2461_vm1 = vcmp.lt.s32.totalorder %v2459_v55, %v2460_v48  ;;  %2504 = vst [vmem:[%s2072_s13] sm:$0xff] %v2503_v15  ;;  %vm5218_vm8 = vcmp.eq.s32.totalorder %v3930_v42, %v4681_v38  ;;  %vm5219_vm10 = vcmp.eq.s32.totalorder %v3927_v41, %v4681_v38 }
0x226a   : >> { %v4882_v24 = vsel %vm2461_vm1, %v2459_v55, %v2460_v48  ;;  %v2143_v61 = vsel %vm5219_vm10, %v4877_v60, 0  ;;  %vm5220_vm6 = vcmp.eq.s32.totalorder %v3930_v42, %v4717_v32  ;;  %vm5221_vm1 = vcmp.eq.s32.totalorder %v3927_v41, %v4717_v32 }
0x226b   : >> { %v2070_v9 = vsel %vm5212_vm14, %v4630_v31, %v2041_v21  ;;  %v2464_v2 = vshra.s32 %v4882_v24, 16  ;;  %v2185_v31 = vsel %vm5216_vm0, %v4877_v60, 0  ;;  %v2227_v23 = vsel %vm5221_vm1, %v4877_v60, 0 }
0x226c   : >> { %v4888_v54 = vsel %vm5213_vm11, %v2070_v9, 0  ;;  %vm5222_vm14 = vcmp.eq.s32.totalorder %v3930_v42, %v4735_v20  ;;  %vm5223_vm11 = vcmp.eq.s32.totalorder %v3927_v41, %v4735_v20  ;;  %vm5226_vm0 = vcmp.eq.s32.totalorder %v3930_v42, %v4771_v53 }
0x226d   : >> { %v4894_v26 = vcvt.s32.f32 %v2464_v2  ;;  %v2102_v19 = vsel %vm5215_vm7, %v4888_v54, 0  ;;  %v2186_v1 = vsel %vm5217_vm4, %v4888_v54, 0  ;;  %v2144_v44 = vsel %vm5218_vm8, %v4888_v54, 0 }
0x226e   : >> { %v4908_v0 = vadd.s32 %v2102_v19, %v2101_v52  ;;  %v2187_v49 = vadd.s32 %v2186_v1, %v2185_v31  ;;  %v2145_v16 = vadd.s32 %v2144_v44, %v2143_v61  ;;  %v2228_v4 = vsel %vm5220_vm6, %v4888_v54, 0 }
0x226f   : >> { %2467 = vmin.xlane.f32.xlu1 %v4894_v26  ;;  %v2229_v27 = vadd.s32 %v2228_v4, %v2227_v23  ;;  %v2270_v29 = vsel %vm5222_vm14, %v4888_v54, 0  ;;  %v2269_v51 = vsel %vm5223_vm11, %v4877_v60, 0  ;;  %v2312_v32 = vsel %vm5224_vm12, %v4888_v54, 0 }
0x2270   : >> { %v2105_v11 = vshrl.u32 %v4908_v0, 16  ;;  %v2189_v6 = vshrl.u32 %v2187_v49, 16  ;;  %v2146_v59 = vand.u32 65535, %v2145_v16  ;;  %v2188_v38 = vand.u32 65535, %v2187_v49 }
0x2271   : >> { %v2230_v62 = vand.u32 65535, %v2229_v27  ;;  %v2271_v56 = vadd.s32 %v2270_v29, %v2269_v51  ;;  %vm5225_vm7 = vcmp.eq.s32.totalorder %v3927_v41, %v4753_v17  ;;  %v2354_v20 = vsel %vm5226_vm0, %v4888_v54, 0 }
0x2272   : >> { %v2107_v13 = vcvt.s32.f32 %v2105_v11  ;;  %v2191_v3 = vcvt.s32.f32 %v2189_v6  ;;  %v2148_v25 = vcvt.s32.f32 %v2146_v59  ;;  %v2190_v39 = vcvt.s32.f32 %v2188_v38 }
0x2273   : >> { %v2311_v63 = vsel %vm5225_vm7, %v4877_v60, 0  ;;  %v2232_v50 = vcvt.s32.f32 %v2230_v62  ;;  %v2272_v33 = vand.u32 65535, %v2271_v56  ;;  %vm5227_vm4 = vcmp.eq.s32.totalorder %v3927_v41, %v4771_v53 }
0x2274   : >> { %2110 = vadd.xlane.f32.xlu0 %v2107_v13  ;;  %v2313_v12 = vadd.s32 %v2312_v32, %v2311_v63  ;;  %v2353_v30 = vsel %vm5227_vm4, %v4877_v60, 0  ;;  %vm5228_vm8 = vcmp.eq.s32.totalorder %v3930_v42, %v4789_v37  ;;  %vm5229_vm10 = vcmp.eq.s32.totalorder %v3927_v41, %v4789_v37 }
0x2275   : >> { %v2274_v14 = vcvt.s32.f32 %v2272_v33  ;;  %v2355_v10 = vadd.s32 %v2354_v20, %v2353_v30  ;;  %v2396_v17 = vsel %vm5228_vm8, %v4888_v54, 0  ;;  %v2395_v45 = vsel %vm5229_vm10, %v4877_v60, 0 }
0x2276   : >> { %v2314_v40 = vand.u32 65535, %v2313_v12  ;;  %v2397_v57 = vadd.s32 %v2396_v17, %v2395_v45  ;;  %v2438_v53 = vsel %vm2436_vm5, %v4888_v54, 0  ;;  %v2437_v8 = vsel %vm2435_vm2, %v4877_v60, 0 }
0x2277   : >> { %v2356_v22 = vand.u32 65535, %v2355_v10  ;;  %v2439_v7 = vadd.s32 %v2438_v53, %v2437_v8  ;;  %v2463_v15 = vand.u32 65535, %v4882_v24  ;;  %v2147_v2 = vshrl.u32 %v2145_v16, 16 }
0x2278   : >> { %2194 = vadd.xlane.f32.xlu0 %v2191_v3  ;;  %v2316_v58 = vcvt.s32.f32 %v2314_v40  ;;  %v2398_v34 = vand.u32 65535, %v2397_v57  ;;  %v2104_v19 = vand.u32 65535, %v4908_v0  ;;  %v2231_v1 = vshrl.u32 %v2229_v27, 16 }
0x2279   : >> { %v2358_v28 = vcvt.s32.f32 %v2356_v22  ;;  %v2440_v55 = vand.u32 65535, %v2439_v7  ;;  %v2465_v9 = vcvt.s32.f32 %v2463_v15  ;;  %v2149_v5 = vcvt.s32.f32 %v2147_v2 }
0x227a   : >> { %v2400_v37 = vcvt.s32.f32 %v2398_v34  ;;  %v2106_v31 = vcvt.s32.f32 %v2104_v19  ;;  %v2233_v49 = vcvt.s32.f32 %v2231_v1  ;;  %v2273_v44 = vshrl.u32 %v2271_v56, 16 }
0x227b   : >> { %v2442_v48 = vcvt.s32.f32 %v2440_v55  ;;  %v2315_v61 = vshrl.u32 %v2313_v12, 16  ;;  %v2357_v13 = vshrl.u32 %v2355_v10, 16  ;;  %v2399_v6 = vshrl.u32 %v2397_v57, 16 }
0x227c   : >> { %2150 = vadd.xlane.f32.xlu0 %v2148_v25  ;;  %v2275_v11 = vcvt.s32.f32 %v2273_v44  ;;  %v2441_v3 = vshrl.u32 %v2439_v7, 16  ;;  %vm5231_vm1 = vcmask 48128   ;;  %vm5232_vm14 = vcmask 56320  }
0x227d   : >> { %v2317_v24 = vcvt.s32.f32 %v2315_v61  ;;  %v2401_v16 = vcvt.s32.f32 %v2399_v6  ;;  %vm5233_vm11 = vcmask 64512   ;;  %vm5235_vm12 = vcmask 80896  }
0x227e   : >> { %v2443_v0 = vcvt.s32.f32 %v2441_v3 }
0x2280   : >> { %2192 = vadd.xlane.f32.xlu0 %v2190_v39 }
0x2284   : >> { %2234 = vadd.xlane.f32.xlu0 %v2232_v50 }
0x2288   : >> { %2276 = vadd.xlane.f32.xlu0 %v2274_v14 }
0x228c   : >> { %2318 = vadd.xlane.f32.xlu0 %v2316_v58 }
0x2290   : >> { %2360 = vadd.xlane.f32.xlu0 %v2358_v28 }
0x2294   : >> { %2402 = vadd.xlane.f32.xlu0 %v2400_v37 }
0x2298   : >> { %2444 = vadd.xlane.f32.xlu0 %v2442_v48 }
0x22fc   : >> { %v2468_v21 = vpop.xlane.xlu1 %2467 }
0x22fd   : >> { %vm2469_vm5 = vcmp.eq.f32.partialorder %v4894_v26, %v2468_v21  ;;  %v2359_v26 = vcvt.s32.f32 %v2357_v13  ;;  %v2474_v59 = vcvt.f32.s32 %v2468_v21 }
0x22fe   : >> { %v2470_v52 = vsel %vm2469_vm5, %v2465_v9, inf }
0x22ff   : >> { %2471 = vmin.xlane.f32.xlu1 %v2470_v52  ;;  %v2475_v23 = vshll.u32 %v2474_v59, 16 }
0x2301   : >> { %v2111_v63 = vpop.xlane.xlu0 %2110 }
0x2302   : >> { %v2113_v57 = vcvt.f32.s32 %v2111_v63 }
0x2303   : >> { %2152 = vadd.xlane.f32.xlu1 %v2149_v5 }
0x2304   : >> { %v2114_v7 = vshll.u32 %v2113_v57, 16 }
0x2305   : >> { %v2195_v50 = vpop.xlane.xlu0 %2194 }
0x2306   : >> { %v2197_v21 = vcvt.f32.s32 %v2195_v50 }
0x2307   : >> { %2108 = vadd.xlane.f32.xlu1 %v2106_v31 }
0x2309   : >> { %v2151_v12 = vpop.xlane.xlu0 %2150 }
0x230a   : >> { %v2154_v2 = vcvt.f32.s32 %v2151_v12 }
0x230b   : >> { %2236 = vadd.xlane.f32.xlu1 %v2233_v49 }
0x230d   : >> { %v2193_v30 = vpop.xlane.xlu0 %2192 }
0x230e   : >> { %v2196_v31 = vcvt.f32.s32 %v2193_v30 }
0x230f   : >> { %2278 = vadd.xlane.f32.xlu1 %v2275_v11 }
0x2311   : >> { %v2235_v40 = vpop.xlane.xlu0 %2234 }
0x2312   : >> { %v2238_v44 = vcvt.f32.s32 %v2235_v40 }
0x2313   : >> { %2320 = vadd.xlane.f32.xlu1 %v2317_v24  ;;  %v2198_v24 = vshll.u32 %v2197_v21, 16 }
0x2315   : >> { %v2277_v17 = vpop.xlane.xlu0 %2276 }
0x2316   : >> { %v2280_v13 = vcvt.f32.s32 %v2277_v17 }
0x2317   : >> { %2362 = vadd.xlane.f32.xlu1 %v2359_v26 }
0x2319   : >> { %v2319_v45 = vpop.xlane.xlu0 %2318 }
0x231a   : >> { %v2322_v6 = vcvt.f32.s32 %v2319_v45 }
0x231b   : >> { %2404 = vadd.xlane.f32.xlu1 %v2401_v16 }
0x231d   : >> { %v2361_v58 = vpop.xlane.xlu0 %2360 }
0x231f   : >> { %2446 = vadd.xlane.f32.xlu1 %v2443_v0 }
0x2321   : >> { %v2403_v37 = vpop.xlane.xlu0 %2402 }
0x2325   : >> { %v2445_v16 = vpop.xlane.xlu0 %2444 }
0x238c   : >> { %v2472_v4 = vpop.xlane.xlu1 %2471 }
0x238d   : >> { %v2473_v25 = vcvt.f32.s32 %v2472_v4  ;;  %v2199_v4 = vadd.s32 %v2198_v24, %v2196_v31 }
0x238f   : >> { %v2476_v38 = vadd.s32 %v2475_v23, %v2473_v25  ;;  %v2364_v23 = vcvt.f32.s32 %v2361_v58 }
0x2390   : >> { %v2153_v33 = vpop.xlane.xlu1 %2152 }
0x2391   : >> { %vm2477_vm2 = vcmp.eq.s32.totalorder %v3927_v41, %v2476_v38  ;;  %vm2478_vm6 = vcmp.eq.s32.totalorder %v3930_v42, %v2476_v38  ;;  %v2155_v53 = vcvt.f32.s32 %v2153_v33 }
0x2392   : >> { %v2479_v27 = vsel %vm2477_vm2, %v4877_v60, 0  ;;  %v2480_v29 = vsel %vm2478_vm6, %v4888_v54, 0 }
0x2393   : >> { %v2481_v51 = vadd.s32 %v2480_v29, %v2479_v27  ;;  %v2156_v55 = vshll.u32 %v2155_v53, 16  ;;  %v2406_v29 = vcvt.f32.s32 %v2403_v37 }
0x2394   : >> { %v2109_v20 = vpop.xlane.xlu1 %2108 }
0x2395   : >> { %v2483_v39 = vshrl.u32 %v2481_v51, 16  ;;  %v2482_v56 = vand.u32 65535, %v2481_v51  ;;  %v2112_v8 = vcvt.f32.s32 %v2109_v20  ;;  %v2157_v11 = vadd.s32 %v2156_v55, %v2154_v2 }
0x2397   : >> { %v2485_v62 = vcvt.s32.f32 %v2483_v39  ;;  %v2484_v32 = vcvt.s32.f32 %v2482_v56  ;;  %v2115_v52 = vadd.s32 %v2114_v7, %v2112_v8 }
0x2398   : >> { %v2237_v14 = vpop.xlane.xlu1 %2236 }
0x2399   : >> { %2488 = vadd.xlane.f32.xlu1 %v2485_v62  ;;  %v2239_v28 = vcvt.f32.s32 %v2237_v14  ;;  %v2505_v3 = vsel %vm2042_vm9, %v2115_v52, %v2157_v11  ;;  %v2448_v62 = vcvt.f32.s32 %v2445_v16  ;;  %vm5230_vm9 = vcmask 39936  }
0x239a   : >> { %v2506_v56 = vsel %vm2044_vm3, %v2505_v3, %v2199_v4  ;;  %vm5234_vm3 = vcmask 72704  }
0x239b   : >> { %v2240_v5 = vshll.u32 %v2239_v28, 16 }
0x239c   : >> { %v2279_v10 = vpop.xlane.xlu1 %2278 }
0x239d   : >> { %2486 = vadd.xlane.f32.xlu1 %v2484_v32  ;;  %v2281_v34 = vcvt.f32.s32 %v2279_v10  ;;  %v2241_v0 = vadd.s32 %v2240_v5, %v2238_v44 }
0x239f   : >> { %v2282_v1 = vshll.u32 %v2281_v34, 16  ;;  %v2507_v63 = vsel %vm2046_vm15, %v2506_v56, %v2241_v0 }
0x23a0   : >> { %v2321_v60 = vpop.xlane.xlu1 %2320 }
0x23a1   : >> { %v2323_v48 = vcvt.f32.s32 %v2321_v60  ;;  %v2283_v25 = vadd.s32 %v2282_v1, %v2280_v13 }
0x23a3   : >> { %v2324_v61 = vshll.u32 %v2323_v48, 16  ;;  %v2508_v33 = vsel %vm2048_vm13, %v2507_v63, %v2283_v25 }
0x23a4   : >> { %v2363_v54 = vpop.xlane.xlu1 %2362 }
0x23a5   : >> { %v2365_v9 = vcvt.f32.s32 %v2363_v54  ;;  %v2325_v51 = vadd.s32 %v2324_v61, %v2322_v6 }
0x23a7   : >> { %v2366_v26 = vshll.u32 %v2365_v9, 16  ;;  %v2509_v30 = vsel %vm5230_vm9, %v2508_v33, %v2325_v51 }
0x23a8   : >> { %v2405_v22 = vpop.xlane.xlu1 %2404 }
0x23a9   : >> { %v2407_v19 = vcvt.f32.s32 %v2405_v22  ;;  %v2367_v32 = vadd.s32 %v2366_v26, %v2364_v23 }
0x23ab   : >> { %v2408_v59 = vshll.u32 %v2407_v19, 16  ;;  %v2510_v10 = vsel %vm5231_vm1, %v2509_v30, %v2367_v32 }
0x23ac   : >> { %v2447_v15 = vpop.xlane.xlu1 %2446 }
0x23ad   : >> { %v2449_v49 = vcvt.f32.s32 %v2447_v15  ;;  %v2409_v50 = vadd.s32 %v2408_v59, %v2406_v29 }
0x23af   : >> { %v2450_v38 = vshll.u32 %v2449_v49, 16  ;;  %v2511_v17 = vsel %vm5232_vm14, %v2510_v10, %v2409_v50 }
0x23b1   : >> { %v2451_v12 = vadd.s32 %v2450_v38, %v2448_v62 }
0x23b3   : >> { %v2512_v45 = vsel %vm5233_vm11, %v2511_v17, %v2451_v12 }
0x2426   : >> { %v2489_v27 = vpop.xlane.xlu1 %2488 }
0x2427   : >> { %v2491_v39 = vcvt.f32.s32 %v2489_v27 }
0x2429   : >> { %v2492_v14 = vshll.u32 %v2491_v39, 16 }
0x242a   : >> { %v2487_v20 = vpop.xlane.xlu1 %2486 }
0x242b   : >> { %v2490_v40 = vcvt.f32.s32 %v2487_v20  ;;  %1341 = sbr.rel (!%p1339_p2) target bundleno = 397 (0x18d), region = 161 }
0x242d   : >> { %v2493_v60 = vadd.s32 %v2492_v14, %v2490_v40 }
0x242f   : >> { %v2513_v54 = vsel %vm5234_vm3, %v2512_v45, %v2493_v60 }
0x2430   : >> { %v2514_v58 = vsel %vm5235_vm12, %v2513_v54, 0 }
0x2431   : >> { %2515 = vst [vmem:[%s2074_s11] sm:$0xff] %v2514_v58 }
0x2432   : > { %2519 = sbr.rel (%p2827_p1) target bundleno = 9277 (0x243d), region = 89 }
0x2438   : > { %v2520_v22 = vld [vmem:[#allocation4] sm:$0xff] (!%p2827_p1)  ;;  %v2521_v57 = vld [vmem:[#allocation4 + $0x8] sm:$0xff] (!%p2827_p1)  ;;  %v2522_v53 = vld [vmem:[#allocation4 + $0x10] sm:$0xff] (!%p2827_p1) }
0x2439   : > { %2528 = vst [vmem:[%s3923_s23] sm:$0xff] %v2520_v22  ;;  %2529 = vst [vmem:[%s3923_s23 + $0x8] sm:$0xff] %v2521_v57  ;;  %v2523_v8 = vld [vmem:[#allocation4 + $0x18] sm:$0xff]  ;;  %v2524_v28 = vld [vmem:[#allocation4 + $0x20] sm:$0xff] }
0x243a   : > { %2530 = vst [vmem:[%s3923_s23 + $0x10] sm:$0xff] %v2522_v53  ;;  %v2525_v34 = vld [vmem:[#allocation4 + $0x28] sm:$0xff]  ;;  %2531 = vst [vmem:[%s3923_s23 + $0x18] sm:$0xff] %v2523_v8  ;;  %v2526_v41 = vld [vmem:[#allocation4 + $0x30] sm:$0xff] }
0x243b   : > { %2532 = vst [vmem:[%s3923_s23 + $0x20] sm:$0xff] %v2524_v28  ;;  %2533 = vst [vmem:[%s3923_s23 + $0x28] sm:$0xff] %v2525_v34  ;;  %v2527_v42 = vld [vmem:[#allocation4 + $0x38] sm:$0xff] }
0x243c   : > { %2534 = vst [vmem:[%s3923_s23 + $0x30] sm:$0xff] %v2526_v41  ;;  %2535 = vst [vmem:[%s3923_s23 + $0x38] sm:$0xff] %v2527_v42 }
0x243d PF: > { %s2831_s14 = sshll.u32 %s3218_s24, 3  ;;  %s2873_s8 = sshll.u32 %s3222_s25, 7 }
0x243e   : > { %s2558_s30 = sshll.u32 %s3635_s18, 4  ;;  %s2555_s12 = sadd.s32 %s2873_s8, %s2831_s14  ;;  %s5002_s30 = int_to_ptr.vmem [resolvable:$true] %s2558_s30 }
0x243f   : > { %s2833_s6 = sshll.u32 %s2555_s12, 6  ;;  %s2537_s9 = scalar_lea.sflag [#allocation7], %s3531_s21 }
0x2440   : > { %s5007_s15 = scalar_lea.hbm %s5126_s3, %s2833_s6  ;;  %s3052_s7 = scalar_lea.vmem %s5002_s30, 4096 }
0x2441   : > { %p3053_p7 = scmp.ne.s32.totalorder %s5002_s30, %s3052_s7  ;;  %p5236_p10 = scmp.ne.s32.totalorder %s5177_s5, 0 }
0x2442   : > { %s3247_s24 = smov [#allocation9]  }
0x2443   : > { %p3054_p11 = pnand %p3053_p7, %p5236_p10  ;;  %s3056_s18 = sshll.u32 %s3247_s24, 4  ;;  %s3057_s18 = int_to_ptr.vmem [resolvable:$false] %s3056_s18 }
0x2444   : > { %s3058_s1 = scalar_lea.vmem %s3057_s18, 8192  ;;  %p3059_p4 = scmp.lt.s32.totalorder %s5002_s30, %s3057_s18 }
0x2445   : > { %p3055_p12 = pneg %p3054_p11  ;;  %p3060_p5 = scmp.lt.s32.totalorder %s3058_s1, %s3052_s7 }
0x2447   : > { %p3061_p3 = por %p3060_p5, %p3059_p4 }
0x2449   : > { %p3062_p8 = pnand %p3061_p3, %p3055_p12 }
0x244b   : > { %3065 = shalt.err (!%p3062_p8)
}
0x244c   : > { %s3066_s29 = scalar_lea.hbm %s5007_s15, 4096  ;;  %s3070_s14 = scalar_lea.hbm %s5126_s3, 16384 }
0x244d   : > { %p3067_p13 = scmp.ne.s32.totalorder %s5007_s15, %s3066_s29  ;;  %p3071_p9 = scmp.lt.u32.totalorder %s5007_s15, %s5126_s3 }
0x244e   : > { %p3072_p2 = scmp.lt.u32.totalorder %s3070_s14, %s3066_s29  ;;  %p3074_p7 = scmp.lt.u32.totalorder %s3066_s29, %s5007_s15 }
0x244f   : > { %p3068_p0 = pnand %p3067_p13, %p5236_p10 }
0x2450   : > { %p3073_p1 = por %p3072_p2, %p3071_p9 }
0x2451   : > { %p3069_p6 = pneg %p3068_p0 }
0x2452   : > { %p3075_p11 = por %p3074_p7, %p3073_p1 }
0x2454   : > { %p3076_p12 = pnand %p3075_p11, %p3069_p6 }
0x2456   : > { %3079 = shalt.err (!%p3076_p12)
}
0x2457   : > { %s3248_s6 = smov 512   ;;  %s5237_s17 = sld [smem:[#allocation25_spill]] }
0x2458   : > { %s3249_s10 = smov 1024   ;;  %s3250_s7 = smov 32  }
0x2459   : > { %2877 = dma.vmem_to_hbm [thread:$0]  (%p5236_p10), %s5002_s30, 4096, %s5007_s15, %s2537_s9, %s3248_s6, %s3249_s10, %s3250_s7  }
0x245a   : > { %s2874_s24 = sshll.u32 %s3222_s25, 10  ;;  %s2574_s18 = sshll.u32 %s3923_s23, 4  ;;  %s5040_s18 = int_to_ptr.vmem [resolvable:$true] %s2574_s18 }
0x245b   : > { %s5238_s13 = sld [smem:[#allocation28_spill]]  ;;  %s5044_s14 = scalar_lea.sflag [#allocation11], %s317_s4 }
0x245c   : > { %s3080_s8 = scalar_lea.vmem %s5040_s18, 1024  ;;  %s3251_s25 = smov [#allocation10]  }
0x245d   : > { %p3081_p4 = scmp.ne.s32.totalorder %s5040_s18, %s3080_s8  ;;  %p5239_p5 = scmp.ne.s32.totalorder %s5237_s17, 0 }
0x245e   : > { %s3084_s5 = sshll.u32 %s3251_s25, 4  ;;  %s3085_s5 = int_to_ptr.vmem [resolvable:$false] %s3084_s5 }
0x245f   : > { %p3082_p3 = pnand %p3081_p4, %p5239_p5  ;;  %s3086_s21 = scalar_lea.vmem %s3085_s5, 2048 }
0x2460   : > { %p3087_p8 = scmp.lt.s32.totalorder %s5040_s18, %s3085_s5  ;;  %p3088_p13 = scmp.lt.s32.totalorder %s3086_s21, %s3080_s8 }
0x2461   : > { %s5038_s11 = scalar_lea.hbm %s5238_s13, %s2874_s24  ;;  %p3083_p10 = pneg %p3082_p3 }
0x2462   : > { %p3089_p0 = por %p3088_p13, %p3087_p8 }
0x2464   : > { %p3090_p6 = pnand %p3089_p0, %p3083_p10 }
0x2466   : > { %3093 = shalt.err (!%p3090_p6)
}
0x2467   : > { %s3094_s4 = scalar_lea.hbm %s5038_s11, 1024  ;;  %s3098_s15 = scalar_lea.hbm %s5238_s13, 2048 }
0x2468   : > { %p3095_p9 = scmp.ne.s32.totalorder %s5038_s11, %s3094_s4  ;;  %p3099_p7 = scmp.lt.u32.totalorder %s5038_s11, %s5238_s13 }
0x2469   : > { %p3100_p11 = scmp.lt.u32.totalorder %s3098_s15, %s3094_s4  ;;  %p3102_p4 = scmp.lt.u32.totalorder %s3094_s4, %s5038_s11 }
0x246a   : > { %p3096_p2 = pnand %p3095_p9, %p5239_p5 }
0x246b   : > { %p3101_p12 = por %p3100_p11, %p3099_p7 }
0x246c   : > { %p3097_p1 = pneg %p3096_p2 }
0x246d   : > { %p3103_p3 = por %p3102_p4, %p3101_p12 }
0x246f   : > { %p3104_p10 = pnand %p3103_p3, %p3097_p1 }
0x2471   : > { %3107 = shalt.err (!%p3104_p10)
}
0x2472   : > { %s3252_s6 = smov 128   ;;  %s3253_s10 = smov 8  }
0x2473   : > { %2878 = dma.vmem_to_hbm [thread:$0]  (%p5239_p5), %s5040_s18, 1024, %s5038_s11, %s5044_s14, %s3252_s6, %s3252_s6, %s3253_s10  }
0x2474 PF: > { %s5240_s7 = sld [smem:[#allocation17_spill]]  ;;  %s5241_s24 = sld [smem:[#allocation23_spill]] }
0x2475   : > { %p2888_p8 = scmp.ge.s32.totalorder %s3234_s28, 2 }
0x247a   : > { %s2589_s1 = sand.u32 1, %s5240_s7   ;;  %p5242_p13 = scmp.ne.s32.totalorder %s5241_s24, 0 }
0x247b   : > { %s2590_s29 = scalar_lea.sflag [#allocation7], %s2589_s1 }
0x247c   : > { %p2882_p0 = pnand %p2888_p8, %p5242_p13 }
0x247e   : > { %3173 = dma.done.wait (!%p2882_p0), %s2590_s29, 4096  }
0x247f   : > { %3175 = vsyncadd (!%p2882_p0), %s2590_s29, 4294963200  ;;  %s5243_s8 = sld [smem:[#allocation15_spill]]  ;;  %s5244_s25 = sld [smem:[#allocation26_spill]] }
0x2485   : > { %s2598_s5 = sand.u32 1, %s5243_s8   ;;  %p5245_p6 = scmp.ne.s32.totalorder %s5244_s25, 0 }
0x2486   : > { %s2599_s21 = scalar_lea.sflag [#allocation11], %s2598_s5 }
0x2487   : > { %p2885_p9 = pnand %p2888_p8, %p5245_p6 }
0x2489   : > { %3177 = dma.done.wait (!%p2885_p9), %s2599_s21, 1024  }
0x248a   : > { %3179 = vsyncadd (!%p2885_p9), %s2599_s21, 4294966272  ;;  %s24_s28 = sadd.s32 1, %s3234_s28   ;;  %s5247_s18 = sld [smem:[#allocation16_spill]] }
0x248b   : > { %p5076_p5 = scmp.ge.s32.totalorder %s24_s28, 6   ;;  %s5248_s11 = sld [smem:[#allocation24_spill]] }
0x248c   : > { %s5249_s14 = sld [smem:[#allocation22_spill]]  ;;  %s5250_s4 = sld [smem:[#allocation18_spill]] }
0x248d   : > { %s5251_s23 = sld [smem:[#allocation21_spill]]  ;;  %s5252_s30 = sld [smem:[#allocation19_spill]] }
0x248e   : > { %s5253_s9 = sld [smem:[#allocation20_spill]]  ;;  %s5255_s15 = smov %s3186_s16 }
0x248f   : > { %s5261_s21 = smov %s3210_s22  ;;  %s5263_s24 = smov %s3226_s26 }
0x2490   : > { %s5256_s16 = smov %s5247_s18  ;;  %s5258_s18 = smov %s3198_s19 }
0x2491   : > { %s5257_s17 = smov %s5248_s11  ;;  %s5259_s19 = smov %s3202_s20 }
0x2492   : > { %s5260_s20 = smov %s5249_s14  ;;  %s5262_s22 = smov %s5250_s4 }
0x2493   : > { %s5264_s25 = smov %s3230_s27  ;;  %s5265_s26 = smov %s5252_s30 }
0x2494   : > { %s5266_s27 = smov %s5253_s9  ;;  %23 = sbr.rel (!%p5076_p5) target bundleno = 15 (0xf), region = 172 }
0x249b   :  { %2604 = vsyncpa [#allocation6], 1 }
0x249c   :  { %2606 = vsyncpa [#allocation6 + $0x1], 1 }
0x249d   :  { %2607 = vsyncpa [#allocation7], 1 }
0x249e   :  { %2609 = vsyncpa [#allocation7 + $0x1], 1 }
0x249f   :  { %2610 = vsyncpa [#allocation11], 1 }
0x24a0   :  { %2612 = vsyncpa [#allocation11 + $0x1], 1 }

</bundles_post_ra>
